<compile_context>
chip_gen: v7x
topology: tpu7x:2x2x1
jax: 0.10.0
libtpu: 0.0.40
codegen_flags: <defaults>
</compile_context>

<pallas_src>
from functools import partial

import jax
import jax.numpy as jnp
from jax.experimental import pallas as pl
from jax.experimental.pallas import tpu as pltpu


def attention_kernel(x_ref, wqkv_ref, bqkv_ref, wo_ref, bo_ref, o_ref,
                     *, num_heads):
    # x_ref block: (G, T, H) -- G sequences of length T, model dim H.
    G, T, H = x_ref.shape
    hd = H // num_heads

    x = x_ref[...].reshape(G * T, H)                                  # (G*T, H)

    # Fused Q/K/V projection over the whole slab (M = G*T rows on the MXU).
    # Columns [0:H) = Q (pre-scaled by 1/sqrt(hd)), [H:2H) = K, [2H:3H) = V.
    qkv = jnp.dot(x, wqkv_ref[...],
                  preferred_element_type=jnp.float32) + bqkv_ref[...]  # (G*T, 3H)

    # Accumulate residual + out-proj bias; heads add their out-proj slices.
    out = x + bo_ref[...]                                             # (G*T, H)

    for h in range(num_heads):                                        # static unroll (small)
        lo = h * hd
        q_h = qkv[:, lo:lo + hd].reshape(G, T, hd)                    # (G, T, hd)
        k_h = qkv[:, H + lo:H + lo + hd].reshape(G, T, hd)            # (G, T, hd)
        v_h = qkv[:, 2 * H + lo:2 * H + lo + hd].reshape(G, T, hd)    # (G, T, hd)

        # Batched attention over the group axis (scale already folded into Q).
        s = jnp.einsum('gqd,gkd->gqk', q_h, k_h,
                       preferred_element_type=jnp.float32)            # (G, T, T)
        s = s - jnp.max(s, axis=-1, keepdims=True)
        p = jnp.exp(s)
        p = p * pl.reciprocal(jnp.sum(p, axis=-1, keepdims=True), approx=True)
        o_h = jnp.einsum('gqk,gkd->gqd', p, v_h,
                         preferred_element_type=jnp.float32)          # (G, T, hd)

        # Head-sliced out-projection: sum_h  o_h @ Wo^T[h*hd:(h+1)*hd, :]
        # == concat(heads) @ Wo^T, without an explicit lane concatenate.
        out = out + jnp.dot(o_h.reshape(G * T, hd), wo_ref[lo:lo + hd, :],
                            preferred_element_type=jnp.float32)

    o_ref[...] = out.reshape(G, T, H)


def _choose_group(bn, t, h, itemsize=4, vmem_budget=4 * 1024 * 1024):
    """Largest divisor G of bn that keeps >= 2 grid steps (v7x: 2 TCs) and a
    comfortably small per-step block (safe even under v5e's 16 MiB scoped VMEM)."""
    best = 1
    for g in range(1, bn + 1):
        if bn % g:
            continue
        # rough block footprint: in+out (double buffered) + qkv + intermediates
        block_bytes = (4 * g * t * h + 3 * g * t * h + 4 * g * t * h) * itemsize
        if block_bytes > vmem_budget:
            continue
        if bn // g >= 2 or bn == 1:
            best = g
    return best


def attention_layer_pallas(x, params, num_heads):
    """x: (B, T, N, H) float32  ->  (B, T, N, H) float32"""
    B, T, N, H = x.shape
    head_dim = H // num_heads
    wq, bq, wk, bk, wv, bv, wo, bo = params

    BN = B * N
    G = _choose_group(BN, T, H)

    # (B, T, N, H) -> (B*N, T, H): each row-group is one (batch, node) sequence.
    xs = jnp.transpose(x, (0, 2, 1, 3)).reshape(BN, T, H)

    # Weight prep (one-time, host/XLA side):
    #  - nn.Linear weights are (out, in); transpose so the kernel does x @ W.
    #  - fold the 1/sqrt(head_dim) attention scale into the Q weight + bias.
    #  - fuse Q/K/V into a single (H, 3H) weight and (1, 3H) bias.
    scale = 1.0 / (head_dim ** 0.5)
    wqkv = jnp.concatenate([wq.T * scale, wk.T, wv.T], axis=1)         # (H, 3H)
    bqkv = jnp.concatenate([bq * scale, bk, bv]).reshape(1, 3 * H)     # (1, 3H)
    woT = wo.T                                                         # (H, H)
    bo2 = bo.reshape(1, H)                                             # (1, H)

    kern = partial(attention_kernel, num_heads=num_heads)

    out = pl.pallas_call(
        kern,
        out_shape=jax.ShapeDtypeStruct((BN, T, H), jnp.float32),
        grid=(BN // G,),
        in_specs=[
            pl.BlockSpec((G, T, H), lambda i: (i, 0, 0)),      # x block (G sequences)
            pl.BlockSpec((H, 3 * H), lambda i: (0, 0)),        # fused W_qkv
            pl.BlockSpec((1, 3 * H), lambda i: (0, 0)),        # fused b_qkv
            pl.BlockSpec((H, H), lambda i: (0, 0)),            # W_out^T
            pl.BlockSpec((1, H), lambda i: (0, 0)),            # b_out
        ],
        out_specs=pl.BlockSpec((G, T, H), lambda i: (i, 0, 0)),
        compiler_params=pltpu.CompilerParams(
            dimension_semantics=("parallel",)),
    )(xs, wqkv, bqkv, woT, bo2)

    # (B*N, T, H) -> (B, T, N, H)
    return out.reshape(B, N, T, H).transpose(0, 2, 1, 3)


def attention_layer_ref(x, params, num_heads):
    """Pure-JAX reference mirroring the PyTorch forward exactly."""
    B, T, N, H = x.shape
    head_dim = H // num_heads
    wq, bq, wk, bk, wv, bv, wo, bo = params
    residual = x
    q = x @ wq.T + bq
    k = x @ wk.T + bk
    v = x @ wv.T + bv
    q = q.reshape(B, T, N, num_heads, head_dim).transpose(0, 2, 3, 1, 4)
    k = k.reshape(B, T, N, num_heads, head_dim).transpose(0, 2, 3, 1, 4)
    v = v.reshape(B, T, N, num_heads, head_dim).transpose(0, 2, 3, 1, 4)
    s = (q @ jnp.swapaxes(k, -1, -2)) / (head_dim ** 0.5)
    s = jax.nn.softmax(s, axis=-1)
    ao = s @ v                                                # (B, N, nh, T, hd)
    ao = jnp.swapaxes(ao, 2, 3).reshape(B, N, T, H)
    ao = (ao @ wo.T + bo).transpose(0, 2, 1, 3)
    return ao + residual


def init_params(key, model_dim):
    ks = jax.random.split(key, 8)
    scale = 1.0 / (model_dim ** 0.5)
    def w(k):
        return (jax.random.uniform(k, (model_dim, model_dim), jnp.float32) * 2 - 1) * scale
    def b(k):
        return (jax.random.uniform(k, (model_dim,), jnp.float32) * 2 - 1) * scale
    return (w(ks[0]), b(ks[1]), w(ks[2]), b(ks[3]),
            w(ks[4]), b(ks[5]), w(ks[6]), b(ks[7]))


if __name__ == "__main__":
    B, T, N, H = 2, 8, 16, 32
    num_heads = 4

    key = jax.random.PRNGKey(0)
    kx, kp = jax.random.split(key)
    x = jax.random.normal(kx, (B, T, N, H), jnp.float32)
    params = init_params(kp, H)

    out = attention_layer_pallas(x, params, num_heads)
    out = jax.block_until_ready(out)

    ref = attention_layer_ref(x, params, num_heads)
    assert out.shape == (B, T, N, H)
    # Tolerance slightly relaxed vs. exact f32 because the softmax denominator
    # uses the approximate EUP reciprocal (pl.reciprocal(..., approx=True)).
    assert jnp.allclose(out, ref, atol=2e-3, rtol=2e-3), \
        f"max abs err {jnp.max(jnp.abs(out - ref))}"

    print("KERNEL_OK")
</pallas_src>

<mosaic_0001>
module attributes {stable_mosaic.version = 11 : i64} {
  func.func @attention_kernel(%arg0: i32, %arg1: memref<16x8x32xf32, #tpu.memory_space<vmem>>, %arg2: memref<32x96xf32, #tpu.memory_space<vmem>>, %arg3: memref<1x96xf32, #tpu.memory_space<vmem>>, %arg4: memref<32x32xf32, #tpu.memory_space<vmem>>, %arg5: memref<1x32xf32, #tpu.memory_space<vmem>>, %arg6: memref<16x8x32xf32, #tpu.memory_space<vmem>>) attributes {dimension_semantics = [#tpu.dimension_semantics<parallel>], iteration_bounds = array<i64: 2>, scalar_prefetch = 0 : i64, scratch_operands = 0 : i64, tpu.core_type = #tpu.core_type<tc>, window_params = [{transform_indices = @transform_0, window_bounds = array<i64: 16, 8, 32>}, {pipeline_mode = #tpu.pipeline_mode<synchronous>, transform_indices = @transform_1, window_bounds = array<i64: 32, 96>}, {pipeline_mode = #tpu.pipeline_mode<synchronous>, transform_indices = @transform_2, window_bounds = array<i64: 1, 96>}, {pipeline_mode = #tpu.pipeline_mode<synchronous>, transform_indices = @transform_3, window_bounds = array<i64: 32, 32>}, {pipeline_mode = #tpu.pipeline_mode<synchronous>, transform_indices = @transform_4, window_bounds = array<i64: 1, 32>}, {transform_indices = @transform_5, window_bounds = array<i64: 16, 8, 32>}]} {
    %c0 = arith.constant 0 : index
    %c0_0 = arith.constant 0 : index
    %c0_1 = arith.constant 0 : index
    %0 = vector.load %arg1[%c0, %c0_0, %c0_1] : memref<16x8x32xf32, #tpu.memory_space<vmem>>, vector<16x8x32xf32>
    %1 = vector.shape_cast %0 : vector<16x8x32xf32> to vector<128x32xf32>
    %c0_2 = arith.constant 0 : index
    %c0_3 = arith.constant 0 : index
    %2 = vector.load %arg2[%c0_2, %c0_3] : memref<32x96xf32, #tpu.memory_space<vmem>>, vector<32x96xf32>
    %cst = arith.constant dense<0.000000e+00> : vector<128x96xf32>
    %3 = tpu.matmul %1, %2, %cst {dimension_numbers = #tpu.dot_dimension_numbers<[1], [0], [0], [1], [0, 0, 1, 1], [], []>} : vector<128x32xf32>, vector<32x96xf32>, vector<128x96xf32> -> vector<128x96xf32>
    %c0_4 = arith.constant 0 : index
    %c0_5 = arith.constant 0 : index
    %4 = vector.load %arg3[%c0_4, %c0_5] : memref<1x96xf32, #tpu.memory_space<vmem>>, vector<1x96xf32>
    %5 = vector.broadcast %4 : vector<1x96xf32> to vector<128x96xf32>
    %6 = arith.addf %3, %5 : vector<128x96xf32>
    %c0_6 = arith.constant 0 : index
    %c0_7 = arith.constant 0 : index
    %7 = vector.load %arg5[%c0_6, %c0_7] : memref<1x32xf32, #tpu.memory_space<vmem>>, vector<1x32xf32>
    %8 = vector.broadcast %7 : vector<1x32xf32> to vector<128x32xf32>
    %9 = arith.addf %1, %8 : vector<128x32xf32>
    %10 = vector.extract_strided_slice %6 {offsets = [0, 0], sizes = [128, 8], strides = [1, 1]} : vector<128x96xf32> to vector<128x8xf32>
    %11 = vector.shape_cast %10 : vector<128x8xf32> to vector<16x8x8xf32>
    %12 = vector.extract_strided_slice %6 {offsets = [0, 32], sizes = [128, 8], strides = [1, 1]} : vector<128x96xf32> to vector<128x8xf32>
    %13 = vector.shape_cast %12 : vector<128x8xf32> to vector<16x8x8xf32>
    %14 = vector.extract_strided_slice %6 {offsets = [0, 64], sizes = [128, 8], strides = [1, 1]} : vector<128x96xf32> to vector<128x8xf32>
    %15 = vector.shape_cast %14 : vector<128x8xf32> to vector<16x8x8xf32>
    "tpu.trace_start"() <{level = 10 : i32, message = "gqd,gkd->gqk"}> : () -> ()
    %cst_8 = arith.constant dense<0.000000e+00> : vector<16x8x8xf32>
    %16 = tpu.matmul %11, %13, %cst_8 {dimension_numbers = #tpu.dot_dimension_numbers<[2], [2], [1], [1], [0, 0, 0, 1, 1, 1], [0], [0]>} : vector<16x8x8xf32>, vector<16x8x8xf32>, vector<16x8x8xf32> -> vector<16x8x8xf32>
    "tpu.trace_stop"() : () -> ()
    %cst_9 = arith.constant dense<0xFF800000> : vector<16x8xf32>
    %17 = vector.multi_reduction <maximumf>, %16, %cst_9 [2] : vector<16x8x8xf32> to vector<16x8xf32>
    %18 = vector.shape_cast %17 : vector<16x8xf32> to vector<16x8x1xf32>
    %19 = vector.broadcast %18 : vector<16x8x1xf32> to vector<16x8x8xf32>
    %20 = arith.subf %16, %19 : vector<16x8x8xf32>
    %21 = math.exp %20 : vector<16x8x8xf32>
    %cst_10 = arith.constant dense<0.000000e+00> : vector<16x8xf32>
    %22 = vector.multi_reduction <add>, %21, %cst_10 [2] : vector<16x8x8xf32> to vector<16x8xf32>
    %23 = vector.shape_cast %22 : vector<16x8xf32> to vector<16x8x1xf32>
    %24 = tpu.reciprocal %23 {approx = true} : vector<16x8x1xf32> -> vector<16x8x1xf32>
    %25 = vector.broadcast %24 : vector<16x8x1xf32> to vector<16x8x8xf32>
    %26 = arith.mulf %21, %25 : vector<16x8x8xf32>
    "tpu.trace_start"() <{level = 10 : i32, message = "gqk,gkd->gqd"}> : () -> ()
    %cst_11 = arith.constant dense<0.000000e+00> : vector<16x8x8xf32>
    %27 = tpu.matmul %26, %15, %cst_11 {dimension_numbers = #tpu.dot_dimension_numbers<[2], [1], [1], [2], [0, 0, 0, 1, 1, 2], [0], [0]>} : vector<16x8x8xf32>, vector<16x8x8xf32>, vector<16x8x8xf32> -> vector<16x8x8xf32>
    "tpu.trace_stop"() : () -> ()
    %28 = vector.shape_cast %27 : vector<16x8x8xf32> to vector<128x8xf32>
    %c0_12 = arith.constant 0 : index
    %c0_13 = arith.constant 0 : index
    %29 = vector.load %arg4[%c0_12, %c0_13] : memref<32x32xf32, #tpu.memory_space<vmem>>, vector<8x32xf32>
    %cst_14 = arith.constant dense<0.000000e+00> : vector<128x32xf32>
    %30 = tpu.matmul %28, %29, %cst_14 {dimension_numbers = #tpu.dot_dimension_numbers<[1], [0], [0], [1], [0, 0, 1, 1], [], []>} : vector<128x8xf32>, vector<8x32xf32>, vector<128x32xf32> -> vector<128x32xf32>
    %31 = arith.addf %9, %30 : vector<128x32xf32>
    %32 = vector.extract_strided_slice %6 {offsets = [0, 8], sizes = [128, 8], strides = [1, 1]} : vector<128x96xf32> to vector<128x8xf32>
    %33 = vector.shape_cast %32 : vector<128x8xf32> to vector<16x8x8xf32>
    %34 = vector.extract_strided_slice %6 {offsets = [0, 40], sizes = [128, 8], strides = [1, 1]} : vector<128x96xf32> to vector<128x8xf32>
    %35 = vector.shape_cast %34 : vector<128x8xf32> to vector<16x8x8xf32>
    %36 = vector.extract_strided_slice %6 {offsets = [0, 72], sizes = [128, 8], strides = [1, 1]} : vector<128x96xf32> to vector<128x8xf32>
    %37 = vector.shape_cast %36 : vector<128x8xf32> to vector<16x8x8xf32>
    "tpu.trace_start"() <{level = 10 : i32, message = "gqd,gkd->gqk"}> : () -> ()
    %cst_15 = arith.constant dense<0.000000e+00> : vector<16x8x8xf32>
    %38 = tpu.matmul %33, %35, %cst_15 {dimension_numbers = #tpu.dot_dimension_numbers<[2], [2], [1], [1], [0, 0, 0, 1, 1, 1], [0], [0]>} : vector<16x8x8xf32>, vector<16x8x8xf32>, vector<16x8x8xf32> -> vector<16x8x8xf32>
    "tpu.trace_stop"() : () -> ()
    %cst_16 = arith.constant dense<0xFF800000> : vector<16x8xf32>
    %39 = vector.multi_reduction <maximumf>, %38, %cst_16 [2] : vector<16x8x8xf32> to vector<16x8xf32>
    %40 = vector.shape_cast %39 : vector<16x8xf32> to vector<16x8x1xf32>
    %41 = vector.broadcast %40 : vector<16x8x1xf32> to vector<16x8x8xf32>
    %42 = arith.subf %38, %41 : vector<16x8x8xf32>
    %43 = math.exp %42 : vector<16x8x8xf32>
    %cst_17 = arith.constant dense<0.000000e+00> : vector<16x8xf32>
    %44 = vector.multi_reduction <add>, %43, %cst_17 [2] : vector<16x8x8xf32> to vector<16x8xf32>
    %45 = vector.shape_cast %44 : vector<16x8xf32> to vector<16x8x1xf32>
    %46 = tpu.reciprocal %45 {approx = true} : vector<16x8x1xf32> -> vector<16x8x1xf32>
    %47 = vector.broadcast %46 : vector<16x8x1xf32> to vector<16x8x8xf32>
    %48 = arith.mulf %43, %47 : vector<16x8x8xf32>
    "tpu.trace_start"() <{level = 10 : i32, message = "gqk,gkd->gqd"}> : () -> ()
    %cst_18 = arith.constant dense<0.000000e+00> : vector<16x8x8xf32>
    %49 = tpu.matmul %48, %37, %cst_18 {dimension_numbers = #tpu.dot_dimension_numbers<[2], [1], [1], [2], [0, 0, 0, 1, 1, 2], [0], [0]>} : vector<16x8x8xf32>, vector<16x8x8xf32>, vector<16x8x8xf32> -> vector<16x8x8xf32>
    "tpu.trace_stop"() : () -> ()
    %50 = vector.shape_cast %49 : vector<16x8x8xf32> to vector<128x8xf32>
    %c8 = arith.constant 8 : index
    %c0_19 = arith.constant 0 : index
    %51 = vector.load %arg4[%c8, %c0_19] : memref<32x32xf32, #tpu.memory_space<vmem>>, vector<8x32xf32>
    %cst_20 = arith.constant dense<0.000000e+00> : vector<128x32xf32>
    %52 = tpu.matmul %50, %51, %cst_20 {dimension_numbers = #tpu.dot_dimension_numbers<[1], [0], [0], [1], [0, 0, 1, 1], [], []>} : vector<128x8xf32>, vector<8x32xf32>, vector<128x32xf32> -> vector<128x32xf32>
    %53 = arith.addf %31, %52 : vector<128x32xf32>
    %54 = vector.extract_strided_slice %6 {offsets = [0, 16], sizes = [128, 8], strides = [1, 1]} : vector<128x96xf32> to vector<128x8xf32>
    %55 = vector.shape_cast %54 : vector<128x8xf32> to vector<16x8x8xf32>
    %56 = vector.extract_strided_slice %6 {offsets = [0, 48], sizes = [128, 8], strides = [1, 1]} : vector<128x96xf32> to vector<128x8xf32>
    %57 = vector.shape_cast %56 : vector<128x8xf32> to vector<16x8x8xf32>
    %58 = vector.extract_strided_slice %6 {offsets = [0, 80], sizes = [128, 8], strides = [1, 1]} : vector<128x96xf32> to vector<128x8xf32>
    %59 = vector.shape_cast %58 : vector<128x8xf32> to vector<16x8x8xf32>
    "tpu.trace_start"() <{level = 10 : i32, message = "gqd,gkd->gqk"}> : () -> ()
    %cst_21 = arith.constant dense<0.000000e+00> : vector<16x8x8xf32>
    %60 = tpu.matmul %55, %57, %cst_21 {dimension_numbers = #tpu.dot_dimension_numbers<[2], [2], [1], [1], [0, 0, 0, 1, 1, 1], [0], [0]>} : vector<16x8x8xf32>, vector<16x8x8xf32>, vector<16x8x8xf32> -> vector<16x8x8xf32>
    "tpu.trace_stop"() : () -> ()
    %cst_22 = arith.constant dense<0xFF800000> : vector<16x8xf32>
    %61 = vector.multi_reduction <maximumf>, %60, %cst_22 [2] : vector<16x8x8xf32> to vector<16x8xf32>
    %62 = vector.shape_cast %61 : vector<16x8xf32> to vector<16x8x1xf32>
    %63 = vector.broadcast %62 : vector<16x8x1xf32> to vector<16x8x8xf32>
    %64 = arith.subf %60, %63 : vector<16x8x8xf32>
    %65 = math.exp %64 : vector<16x8x8xf32>
    %cst_23 = arith.constant dense<0.000000e+00> : vector<16x8xf32>
    %66 = vector.multi_reduction <add>, %65, %cst_23 [2] : vector<16x8x8xf32> to vector<16x8xf32>
    %67 = vector.shape_cast %66 : vector<16x8xf32> to vector<16x8x1xf32>
    %68 = tpu.reciprocal %67 {approx = true} : vector<16x8x1xf32> -> vector<16x8x1xf32>
    %69 = vector.broadcast %68 : vector<16x8x1xf32> to vector<16x8x8xf32>
    %70 = arith.mulf %65, %69 : vector<16x8x8xf32>
    "tpu.trace_start"() <{level = 10 : i32, message = "gqk,gkd->gqd"}> : () -> ()
    %cst_24 = arith.constant dense<0.000000e+00> : vector<16x8x8xf32>
    %71 = tpu.matmul %70, %59, %cst_24 {dimension_numbers = #tpu.dot_dimension_numbers<[2], [1], [1], [2], [0, 0, 0, 1, 1, 2], [0], [0]>} : vector<16x8x8xf32>, vector<16x8x8xf32>, vector<16x8x8xf32> -> vector<16x8x8xf32>
    "tpu.trace_stop"() : () -> ()
    %72 = vector.shape_cast %71 : vector<16x8x8xf32> to vector<128x8xf32>
    %c16 = arith.constant 16 : index
    %c0_25 = arith.constant 0 : index
    %73 = vector.load %arg4[%c16, %c0_25] : memref<32x32xf32, #tpu.memory_space<vmem>>, vector<8x32xf32>
    %cst_26 = arith.constant dense<0.000000e+00> : vector<128x32xf32>
    %74 = tpu.matmul %72, %73, %cst_26 {dimension_numbers = #tpu.dot_dimension_numbers<[1], [0], [0], [1], [0, 0, 1, 1], [], []>} : vector<128x8xf32>, vector<8x32xf32>, vector<128x32xf32> -> vector<128x32xf32>
    %75 = arith.addf %53, %74 : vector<128x32xf32>
    %76 = vector.extract_strided_slice %6 {offsets = [0, 24], sizes = [128, 8], strides = [1, 1]} : vector<128x96xf32> to vector<128x8xf32>
    %77 = vector.shape_cast %76 : vector<128x8xf32> to vector<16x8x8xf32>
    %78 = vector.extract_strided_slice %6 {offsets = [0, 56], sizes = [128, 8], strides = [1, 1]} : vector<128x96xf32> to vector<128x8xf32>
    %79 = vector.shape_cast %78 : vector<128x8xf32> to vector<16x8x8xf32>
    %80 = vector.extract_strided_slice %6 {offsets = [0, 88], sizes = [128, 8], strides = [1, 1]} : vector<128x96xf32> to vector<128x8xf32>
    %81 = vector.shape_cast %80 : vector<128x8xf32> to vector<16x8x8xf32>
    "tpu.trace_start"() <{level = 10 : i32, message = "gqd,gkd->gqk"}> : () -> ()
    %cst_27 = arith.constant dense<0.000000e+00> : vector<16x8x8xf32>
    %82 = tpu.matmul %77, %79, %cst_27 {dimension_numbers = #tpu.dot_dimension_numbers<[2], [2], [1], [1], [0, 0, 0, 1, 1, 1], [0], [0]>} : vector<16x8x8xf32>, vector<16x8x8xf32>, vector<16x8x8xf32> -> vector<16x8x8xf32>
    "tpu.trace_stop"() : () -> ()
    %cst_28 = arith.constant dense<0xFF800000> : vector<16x8xf32>
    %83 = vector.multi_reduction <maximumf>, %82, %cst_28 [2] : vector<16x8x8xf32> to vector<16x8xf32>
    %84 = vector.shape_cast %83 : vector<16x8xf32> to vector<16x8x1xf32>
    %85 = vector.broadcast %84 : vector<16x8x1xf32> to vector<16x8x8xf32>
    %86 = arith.subf %82, %85 : vector<16x8x8xf32>
    %87 = math.exp %86 : vector<16x8x8xf32>
    %cst_29 = arith.constant dense<0.000000e+00> : vector<16x8xf32>
    %88 = vector.multi_reduction <add>, %87, %cst_29 [2] : vector<16x8x8xf32> to vector<16x8xf32>
    %89 = vector.shape_cast %88 : vector<16x8xf32> to vector<16x8x1xf32>
    %90 = tpu.reciprocal %89 {approx = true} : vector<16x8x1xf32> -> vector<16x8x1xf32>
    %91 = vector.broadcast %90 : vector<16x8x1xf32> to vector<16x8x8xf32>
    %92 = arith.mulf %87, %91 : vector<16x8x8xf32>
    "tpu.trace_start"() <{level = 10 : i32, message = "gqk,gkd->gqd"}> : () -> ()
    %cst_30 = arith.constant dense<0.000000e+00> : vector<16x8x8xf32>
    %93 = tpu.matmul %92, %81, %cst_30 {dimension_numbers = #tpu.dot_dimension_numbers<[2], [1], [1], [2], [0, 0, 0, 1, 1, 2], [0], [0]>} : vector<16x8x8xf32>, vector<16x8x8xf32>, vector<16x8x8xf32> -> vector<16x8x8xf32>
    "tpu.trace_stop"() : () -> ()
    %94 = vector.shape_cast %93 : vector<16x8x8xf32> to vector<128x8xf32>
    %c24 = arith.constant 24 : index
    %c0_31 = arith.constant 0 : index
    %95 = vector.load %arg4[%c24, %c0_31] : memref<32x32xf32, #tpu.memory_space<vmem>>, vector<8x32xf32>
    %cst_32 = arith.constant dense<0.000000e+00> : vector<128x32xf32>
    %96 = tpu.matmul %94, %95, %cst_32 {dimension_numbers = #tpu.dot_dimension_numbers<[1], [0], [0], [1], [0, 0, 1, 1], [], []>} : vector<128x8xf32>, vector<8x32xf32>, vector<128x32xf32> -> vector<128x32xf32>
    %97 = arith.addf %75, %96 : vector<128x32xf32>
    %98 = vector.shape_cast %97 : vector<128x32xf32> to vector<16x8x32xf32>
    %c0_33 = arith.constant 0 : index
    %c0_34 = arith.constant 0 : index
    %c0_35 = arith.constant 0 : index
    %99 = vector.load %arg6[%c0_33, %c0_34, %c0_35] : memref<16x8x32xf32, #tpu.memory_space<vmem>>, vector<16x8x32xf32>
    tpu.vector_store %arg6[%c0_33, %c0_34, %c0_35], %98 {strides = array<i32>} : memref<16x8x32xf32, #tpu.memory_space<vmem>>, vector<16x8x32xf32>,
    return
  }
  func.func @transform_0(%arg0: i32) -> (i32, i32, i32) {
    %c0_i32 = arith.constant 0 : i32
    %c0_i32_0 = arith.constant 0 : i32
    %c0_i32_1 = arith.constant 0 : i32
    return %arg0, %c0_i32, %c0_i32_0 : i32, i32, i32
  }
  func.func @transform_1(%arg0: i32) -> (i32, i32) {
    %c0_i32 = arith.constant 0 : i32
    %c0_i32_0 = arith.constant 0 : i32
    %c0_i32_1 = arith.constant 0 : i32
    return %c0_i32, %c0_i32_0 : i32, i32
  }
  func.func @transform_2(%arg0: i32) -> (i32, i32) {
    %c0_i32 = arith.constant 0 : i32
    %c0_i32_0 = arith.constant 0 : i32
    %c0_i32_1 = arith.constant 0 : i32
    return %c0_i32, %c0_i32_0 : i32, i32
  }
  func.func @transform_3(%arg0: i32) -> (i32, i32) {
    %c0_i32 = arith.constant 0 : i32
    %c0_i32_0 = arith.constant 0 : i32
    %c0_i32_1 = arith.constant 0 : i32
    return %c0_i32, %c0_i32_0 : i32, i32
  }
  func.func @transform_4(%arg0: i32) -> (i32, i32) {
    %c0_i32 = arith.constant 0 : i32
    %c0_i32_0 = arith.constant 0 : i32
    %c0_i32_1 = arith.constant 0 : i32
    return %c0_i32, %c0_i32_0 : i32, i32
  }
  func.func @transform_5(%arg0: i32) -> (i32, i32, i32) {
    %c0_i32 = arith.constant 0 : i32
    %c0_i32_0 = arith.constant 0 : i32
    %c0_i32_1 = arith.constant 0 : i32
    return %arg0, %c0_i32, %c0_i32_0 : i32, i32, i32
  }
}

</mosaic_0001>

<bundles_post_ra>
// kernel: tpu_custom_call.1
= control target key start
LH: loop header
LB: loop body
LE: loop exit
PB: predicated region body
PF: predicated region fallthrough
CT: control target
= control target key end

     0   :  { %10 = vsyncpa [#allocation3], 0  ;;  %s16241_s0 = inlined_call_operand.hbm [shape: f32[32,8,32], index: 0, kind: input, shape index: {}]   ;;  %s16242_s1 = inlined_call_operand.hbm [shape: f32[32,96], index: 1, kind: input, shape index: {}]   ;;  %s16243_s2 = inlined_call_operand.vmem [shape: f32[1,96], index: 2, kind: input, shape index: {}]   ;;  %s16244_s3 = inlined_call_operand.hbm [shape: f32[32,32], index: 3, kind: input, shape index: {}]   ;;  %s16245_s4 = inlined_call_operand.vmem [shape: f32[1,32], index: 4, kind: input, shape index: {}]   ;;  %s16246_s5 = inlined_call_operand.hbm [shape: f32[32,8,32], index: 5, kind: output, shape index: {}]  }
   0x1   :  { %12 = vsyncpa [#allocation3 + $0x1], 0 }
   0x2   :  { %13 = vsyncpa [#allocation6], 0 }
   0x3   :  { %14 = vsyncpa [#allocation4], 0 }
   0x4   :  { %16 = vsyncpa [#allocation4 + $0x1], 0  ;;  %s14079_s18 = smov 0   ;;  %s14081_s19 = smov 0  }
   0x5   :  { %s14083_s20 = smov 0   ;;  %s14085_s21 = smov 0  }
   0x6 LB: > { %s14100_s22 = sadd.s32 4294967295, %s14026_s21   ;;  %s12025_s23 = sadd.s32 4294967294, %s14026_s21   ;;  %s14026_s21 = sphi %s14085_s21, %s16266_s21   ;;  %s14022_s20 = sphi %s14083_s20, %s16265_s20   ;;  %s14018_s19 = sphi %s14081_s19, %s16264_s19   ;;  %s14014_s18 = sphi %s14079_s18, %s16263_s18  }
   0x7   : > { %p42_p0 = scmp.ne.s32.totalorder %s14018_s19, %s14014_s18  ;;  %p16247_p1 = scmp.eq.s32.totalorder %s14100_s22, 0 }
   0x8   : > { %p156_p3 = scmp.eq.s32.totalorder %s12025_s23, 1  ;;  %p12026_p5 = scmp.ge.s32.totalorder %s14026_s21, 1 }
   0x9   : > { %p14109_p4 = por %p16247_p1, %p42_p0  ;;  %p163_p7 = scmp.lt.s32.totalorder %s14026_s21, 3 }
   0xa   : > { %p14114_p6 = por %p156_p3, %p42_p0  ;;  %s14028_s27 = smov [#allocation5]  }
   0xb   : > { %s16250_s24 = scalar_select %p14109_p4, 1, 0 }
   0xc   : > { %s16251_s25 = scalar_select %p14114_p6, 1, 0 }
   0xd   : > { %p14119_p8 = pnand %p12026_p5, %p163_p7  ;;  %s175_s28 = sshll.u32 %s14028_s27, 4  ;;  %s14123_s28 = int_to_ptr.vmem [resolvable:$true] %s175_s28 }
   0xe   : > { %s14029_s30 = smov [#allocation7]   ;;  %s13870_s9 = scalar_lea.hbm %s16242_s1, 512 }
   0xf   : > { %p13525_p9 = pneg %p14119_p8  ;;  %s191_s6 = sshll.u32 %s14029_s30, 4  ;;  %s14134_s6 = int_to_ptr.vmem [resolvable:$true] %s191_s6 }
  0x10   : > { %p13871_p12 = scmp.ne.s32.totalorder %s16242_s1, %s13870_s9  ;;  %p13877_p5 = scmp.lt.u32.totalorder %s13870_s9, %s16242_s1 }
  0x11   : > { %p14130_p11 = pnand %p13525_p9, %p16247_p1 }
  0x13   : > { %p13872_p13 = pneg %p14130_p11 }
  0x15   : > { %p13873_p0 = pnand %p13872_p13, %p13871_p12 }
  0x17   : > { %p13874_p3 = pneg %p13873_p0 }
  0x19   : > { %p13879_p7 = pnand %p13877_p5, %p13874_p3 }
  0x1b   : > { %13882 = shalt.err (!%p13879_p7)
}
  0x1c   : > { %s13883_s14 = scalar_lea.vmem %s14123_s28, 512  ;;  %p13891_p2 = scmp.lt.s32.totalorder %s14123_s28, %s14123_s28 }
  0x1d   : > { %p13884_p9 = scmp.ne.s32.totalorder %s14123_s28, %s13883_s14  ;;  %p13892_p12 = scmp.lt.s32.totalorder %s13883_s14, %s13883_s14 }
  0x1f   : > { %p13886_p10 = pnand %p13884_p9, %p13872_p13  ;;  %p13893_p0 = por %p13892_p12, %p13891_p2 }
  0x21   : > { %p13887_p1 = pneg %p13886_p10 }
  0x23   : > { %p13894_p6 = pnand %p13893_p0, %p13887_p1 }
  0x25   : > { %13897 = shalt.err (!%p13894_p6)
}
  0x26   : > { %s14030_s15 = smov 128   ;;  %s14031_s16 = smov 8  }
  0x27   : > { %13528 = dma.hbm_to_vmem [thread:$0]  (!%p14130_p11), %s16242_s1, 512, %s14123_s28, [#allocation6], %s14030_s15, %s14030_s15, %s14031_s16  }
  0x28   : > { %s13898_s7 = scalar_lea.hbm %s16244_s3, 512 }
  0x29   : > { %p13899_p1 = scmp.ne.s32.totalorder %s16244_s3, %s13898_s7  ;;  %p13905_p10 = scmp.lt.u32.totalorder %s13898_s7, %s16244_s3 }
  0x2b   : > { %p13901_p2 = pnand %p13899_p1, %p13872_p13 }
  0x2d   : > { %p13902_p6 = pneg %p13901_p2 }
  0x2f   : > { %p13907_p3 = pnand %p13905_p10, %p13902_p6 }
  0x31   : > { %13910 = shalt.err (!%p13907_p3)
}
  0x32   : > { %s13911_s28 = scalar_lea.vmem %s14134_s6, 512  ;;  %p13919_p12 = scmp.lt.s32.totalorder %s14134_s6, %s14134_s6 }
  0x33   : > { %p13912_p5 = scmp.ne.s32.totalorder %s14134_s6, %s13911_s28  ;;  %p13920_p0 = scmp.lt.s32.totalorder %s13911_s28, %s13911_s28 }
  0x35   : > { %p13914_p7 = pnand %p13912_p5, %p13872_p13  ;;  %p13921_p1 = por %p13920_p0, %p13919_p12 }
  0x37   : > { %p13915_p9 = pneg %p13914_p7 }
  0x39   : > { %p13922_p2 = pnand %p13921_p1, %p13915_p9 }
  0x3b   : > { %13925 = shalt.err (!%p13922_p2)
}
  0x3c   : > { %13531 = dma.hbm_to_vmem [thread:$0]  (!%p14130_p11), %s16244_s3, 512, %s14134_s6, [#allocation6], %s14030_s15, %s14030_s15, %s14031_s16  }
  0x3d   : > { %s14195_s29 = sadd.s32 1, %s14026_s21   ;;  %s29_s14 = sadd.s32 1, %s14022_s20 }
  0x3e   : > { %s26_s17 = ssub.s32 %s14026_s21, %s14195_s29  ;;  %p36_p13 = scmp.ne.s32.totalorder %s14022_s20, %s14018_s19 }
  0x3f   : > { %p27_p6 = scmp.eq.s32.totalorder %s26_s17, 0  ;;  %p37_p10 = scmp.eq.s32.totalorder %s14026_s21, 0 }
  0x40   : > { %p16254_p3 = scmp.eq.s32.totalorder %s14100_s22, 1  ;;  %p13542_p7 = scmp.lt.s32.totalorder %s14026_s21, 2 }
  0x41   : > { %s14211_s27 = scalar_select %p27_p6, %s14022_s20, %s29_s14  }
  0x42   : > { %p14205_p5 = por %p16254_p3, %p36_p13  ;;  %p38_p9 = por %p37_p10, %p36_p13 }
  0x43   : > { %s208_s30 = sand.u32 1, %s14022_s20   ;;  %s12317_s6 = sshll.u32 %s14026_s21, 11 }
  0x44   : > { %s16255_s23 = scalar_select %p14205_p5, 1, 0 }
  0x45   : > { %s12030_s7 = sshll.u32 %s208_s30, 7  ;;  %s14218_s10 = scalar_lea.hbm %s16241_s0, %s12317_s6 }
  0x46   : > { %s212_s11 = scalar_lea.vmem [#allocation2], %s12030_s7  ;;  %p14222_p11 = pnand %p13542_p7, %p38_p9 }
  0x47   : > { %s219_s28 = sshll.u32 %s212_s11, 4  ;;  %s14226_s13 = scalar_lea.sflag [#allocation3], %s208_s30  ;;  %s14220_s28 = int_to_ptr.vmem [resolvable:$true] %s219_s28 }
  0x48   : > { %s13926_s14 = scalar_lea.hbm %s14218_s10, 2048  ;;  %p13928_p0 = pneg %p14222_p11 }
  0x49   : > { %p13927_p12 = scmp.ne.s32.totalorder %s14218_s10, %s13926_s14  ;;  %s13931_s6 = scalar_lea.hbm %s16241_s0, 4096 }
  0x4a   : > { %p13932_p13 = scmp.lt.u32.totalorder %s14218_s10, %s16241_s0  ;;  %p13933_p6 = scmp.lt.u32.totalorder %s13931_s6, %s13926_s14 }
  0x4b   : > { %p13929_p1 = pnand %p13928_p0, %p13927_p12  ;;  %p13935_p3 = scmp.lt.u32.totalorder %s13926_s14, %s14218_s10 }
  0x4c   : > { %p13934_p10 = por %p13933_p6, %p13932_p13 }
  0x4d   : > { %p13930_p2 = pneg %p13929_p1 }
  0x4e   : > { %p13936_p7 = por %p13935_p3, %p13934_p10 }
  0x50   : > { %p13937_p9 = pnand %p13936_p7, %p13930_p2 }
  0x52   : > { %13940 = shalt.err (!%p13937_p9)
}
  0x53   : > { %s13941_s30 = scalar_lea.vmem %s14220_s28, 2048  ;;  %s14032_s11 = smov [#allocation2]  }
  0x54   : > { %p13942_p12 = scmp.ne.s32.totalorder %s14220_s28, %s13941_s30  ;;  %s13946_s17 = sshll.u32 %s14032_s11, 4  ;;  %s13947_s17 = int_to_ptr.vmem [resolvable:$false] %s13946_s17 }
  0x55   : > { %s13948_s7 = scalar_lea.vmem %s13947_s17, 4096  ;;  %p13949_p4 = scmp.lt.s32.totalorder %s14220_s28, %s13947_s17 }
  0x56   : > { %p13944_p1 = pnand %p13942_p12, %p13928_p0  ;;  %p13950_p13 = scmp.lt.s32.totalorder %s13948_s7, %s13941_s30 }
  0x58   : > { %p13945_p5 = pneg %p13944_p1  ;;  %p13951_p6 = por %p13950_p13, %p13949_p4 }
  0x5a   : > { %p13952_p10 = pnand %p13951_p6, %p13945_p5 }
  0x5c   : > { %13955 = shalt.err (!%p13952_p10)
}
  0x5d   : > { %13535 = dma.hbm_to_vmem [thread:$0]  (!%p14222_p11), %s14218_s10, 2048, %s14220_s28, %s14226_s13, %s14030_s15, %s14030_s15, %s14031_s16  }
  0x5e   : > { %231 = sbr.rel (%p14119_p8) target bundleno = 3833 (0xef9), region = 40  ;;  %s14260_s14 = sand.u32 (!%p14119_p8), 1, %s14018_s19  }
  0x5f   : > { %s12034_s6 = sshll.u32 (!%p14119_p8), %s14260_s14, 7  ;;  %s234_s8 = scalar_lea.sflag (!%p14119_p8), [#allocation3], %s14260_s14 }
  0x60   : > { %s14266_s12 = scalar_lea.vmem (!%p14119_p8), [#allocation2], %s12034_s6  ;;  %p16257_p4 = scmp.ne.s32.totalorder (!%p14119_p8), %s16250_s24, 0 }
  0x65   : > { %14001 = dma.done.wait (%p16257_p4), %s234_s8, 2048  }
  0x66   : > { %14003 = vsyncadd (%p16257_p4), %s234_s8, 4294965248  ;;  %p16258_p5 = scmp.eq.s32.totalorder %s14100_s22, 0 }
  0x68   : > { %14005 = dma.done.wait (%p16258_p5), [#allocation6], 1024   ;;  %p16259_p8 = pmov %p16258_p5 }
  0x69   : > { %vm301_vm0 = vcmask 261120   ;;  %v290_v0 = vld [vmem:[#allocation5] sm:$0xff]  ;;  %v291_v1 = vld [vmem:[#allocation5 + $0x8] sm:$0xff]  ;;  %v292_v2 = vld [vmem:[#allocation5 + $0x10] sm:$0xff]  ;;  %v14033_v22 = vmov 0.0   ;;  %vm14034_vm1 = vmmov 0  }
  0x6a   : > { %14007 = vsyncadd (%p16259_p8), [#allocation6], 4294966272  ;;  %v13439_v3 = vpack.c.bf16 %v291_v1, %v290_v0  ;;  %v293_v4 = vld [vmem:[#allocation5 + $0x18] sm:$0xff]  ;;  %v274_v5 = vld [vmem:[%s14266_s12] sm:$0xff]  ;;  %12695 = vmatprep.subr.mxu1 %v14033_v22  ;;  %12697 = vmatprep.mubr.msk.f32.mxu1 %vm14034_vm1, %v14033_v22  ;;  %s14035_s15 = smov 96   ;;  %s14036_s16 = smov 64  }
  0x6b   : > { %v13443_v6 = vpack.c.bf16 %v293_v4, %v292_v2  ;;  %12671 = vmatprep.mubr.msk.f32.mxu0 %vm301_vm0, %v274_v5  ;;  %v275_v7 = vld [vmem:[%s14266_s12 + $0x8] sm:$0xff]  ;;  %v276_v8 = vld [vmem:[%s14266_s12 + $0x10] sm:$0xff]  ;;  %v277_v9 = vld [vmem:[%s14266_s12 + $0x18] sm:$0xff]  ;;  %vm521_vm2 = vcmask 64512   ;;  %s14037_s10 = smov 88   ;;  %s14038_s28 = smov 120  }
  0x6c   : > { %13440 = vmatprep.subr.bf16.mxu0 %v13439_v3  ;;  %v278_v10 = vld [vmem:[%s14266_s12 + $0x20] sm:$0xff]  ;;  %v279_v11 = vld [vmem:[%s14266_s12 + $0x28] sm:$0xff]  ;;  %v280_v12 = vld [vmem:[%s14266_s12 + $0x30] sm:$0xff]  ;;  %s14039_s13 = smov 56   ;;  %s14040_s11 = smov 80  }
  0x6d   : > { %13442 = vmatpush3.bf16.msra.mxu0 %v13439_v3  ;;  %v281_v13 = vld [vmem:[%s14266_s12 + $0x38] sm:$0xff]  ;;  %v282_v14 = vld [vmem:[%s14266_s12 + $0x40] sm:$0xff]  ;;  %v283_v15 = vld [vmem:[%s14266_s12 + $0x48] sm:$0xff]  ;;  %s14041_s17 = smov 112   ;;  %s14042_s7 = smov 48  }
  0x6e   : > { %13444 = vmatprep.subr.bf16.mxu0 %v13443_v6  ;;  %v284_v16 = vld [vmem:[%s14266_s12 + $0x50] sm:$0xff]  ;;  %v285_v17 = vld [vmem:[%s14266_s12 + $0x58] sm:$0xff]  ;;  %v286_v18 = vld [vmem:[%s14266_s12 + $0x60] sm:$0xff]  ;;  %s14043_s8 = smov 72   ;;  %s14044_s24 = smov 104  }
  0x6f   : > { %v287_v19 = vld [vmem:[%s14266_s12 + $0x68] sm:$0xff]  ;;  %v288_v20 = vld [vmem:[%s14266_s12 + $0x70] sm:$0xff]  ;;  %v289_v21 = vld [vmem:[%s14266_s12 + $0x78] sm:$0xff]  ;;  %s14045_s26 = smov 40   ;;  %p16260_p0 = scmp.ne.s32.totalorder %s16255_s23, 0 }
  0x70   : > { %v12038_v23 = vld [vmem:[%s16243_s2] ss:$0 sm:$0xff] }
  0x71   : > { %13446 = vmatpush3.bf16.msra.mxu0 %v13443_v6 }
  0x72   : > { %12740 = vmatprep.subr.mxu0 %v14033_v22 }
  0x74   : > { %12672 = vmatmul.mubr.msk.f32.vlgmr.msra.gmra.mrb[0].mxu0 %vm301_vm0, %v275_v7 }
  0x75   : > { %12674 = vmatprep.mubr.msk.f32.mxu0 %vm301_vm0, %v276_v8 }
  0x78   : > { %12675 = vmatmul.mubr.msk.f32.gmra.mrb[2].mxu0 %vm301_vm0, %v277_v9 }
  0x79   : > { %12677 = vmatprep.mubr.msk.f32.mxu0 %vm301_vm0, %v278_v10 }
  0x7c   : > { %12678 = vmatmul.mubr.msk.f32.gmra.mrb[4].mxu0 %vm301_vm0, %v279_v11 }
  0x7d   : > { %12680 = vmatprep.mubr.msk.f32.mxu0 %vm301_vm0, %v280_v12 }
  0x80   : > { %12681 = vmatmul.mubr.msk.f32.gmra.mrb[6].mxu0 %vm301_vm0, %v281_v13 }
  0x81   : > { %12683 = vmatprep.mubr.msk.f32.mxu0 %vm301_vm0, %v282_v14 }
  0x84   : > { %12684 = vmatmul.mubr.msk.f32.gmra.mrb[8].mxu0 %vm301_vm0, %v283_v15 }
  0x85   : > { %12686 = vmatprep.mubr.msk.f32.mxu0 %vm301_vm0, %v284_v16 }
  0x88   : > { %12687 = vmatmul.mubr.msk.f32.gmra.mrb[10].mxu0 %vm301_vm0, %v285_v17 }
  0x89   : > { %12689 = vmatprep.mubr.msk.f32.mxu0 %vm301_vm0, %v286_v18 }
  0x8c   : > { %12690 = vmatmul.mubr.msk.f32.gmra.mrb[12].mxu0 %vm301_vm0, %v287_v19 }
  0x8d   : > { %12692 = vmatprep.mubr.msk.f32.mxu0 %vm301_vm0, %v288_v20 }
  0x90   : > { %12693 = vmatmul.mubr.msk.f32.gmra.mrb[14].mxu0 %vm301_vm0, %v289_v21 }
  0x91   : > { %12742 = vmatprep.mubr.msk.f32.mxu0 %vm14034_vm1, %v14033_v22 }
 0x147   : > { %v12673_v24 = vpop.f32.mrb[0].mxu0 }
 0x148   : > { %v416_v25 = vpop.f32.mrb[1].mxu0  ;;  %v14321_v29 = vadd.f32 %v12673_v24, %v12038_v23 }
 0x149   : > { %v14317_v26 = vadd.f32 %v12038_v23, %v416_v25 }
 0x14b   : > { %v12676_v27 = vpop.f32.mrb[2].mxu0  ;;  %519 = vrot.lane.b32.xlu0 %v14317_v26, %s14035_s15 }
 0x14c   : > { %v426_v28 = vpop.f32.mrb[3].mxu0  ;;  %v14329_v33 = vadd.f32 %v12676_v27, %v12038_v23 }
 0x14d   : > { %v14323_v30 = vadd.f32 %v12038_v23, %v426_v28 }
 0x14f   : > { %v12679_v31 = vpop.f32.mrb[4].mxu0  ;;  %674 = vrot.lane.b32.xlu1 %v14323_v30, %s14035_s15  ;;  %597 = vrot.lane.b32.xlu0 %v14321_v29, %s14035_s15 }
 0x150   : > { %v436_v32 = vpop.f32.mrb[5].mxu0  ;;  %v14333_v35 = vadd.f32 %v12679_v31, %v12038_v23 }
 0x151   : > { %v14331_v34 = vadd.f32 %v12038_v23, %v436_v32 }
 0x153   : > { %v12682_v36 = vpop.f32.mrb[6].mxu0  ;;  %751 = vrot.lane.b32.xlu1 %v14329_v33, %s14035_s15  ;;  %828 = vrot.lane.b32.xlu0 %v14331_v34, %s14035_s15 }
 0x154   : > { %v446_v37 = vpop.f32.mrb[7].mxu0  ;;  %v14341_v39 = vadd.f32 %v12682_v36, %v12038_v23 }
 0x155   : > { %v14339_v38 = vadd.f32 %v12038_v23, %v446_v37 }
 0x157   : > { %v12685_v40 = vpop.f32.mrb[8].mxu0  ;;  %905 = vrot.lane.b32.xlu1 %v14333_v35, %s14035_s15  ;;  %982 = vrot.lane.b32.xlu0 %v14339_v38, %s14035_s15 }
 0x158   : > { %v456_v41 = vpop.f32.mrb[9].mxu0  ;;  %v14349_v43 = vadd.f32 %v12685_v40, %v12038_v23 }
 0x159   : > { %v14347_v42 = vadd.f32 %v12038_v23, %v456_v41 }
 0x15b   : > { %v12688_v44 = vpop.f32.mrb[10].mxu0  ;;  %1059 = vrot.lane.b32.xlu1 %v14341_v39, %s14035_s15  ;;  %1136 = vrot.lane.b32.xlu0 %v14347_v42, %s14035_s15 }
 0x15c   : > { %v466_v45 = vpop.f32.mrb[11].mxu0  ;;  %v14357_v47 = vadd.f32 %v12688_v44, %v12038_v23 }
 0x15d   : > { %v14355_v46 = vadd.f32 %v12038_v23, %v466_v45 }
 0x15f   : > { %v12691_v48 = vpop.f32.mrb[12].mxu0  ;;  %1213 = vrot.lane.b32.xlu1 %v14349_v43, %s14035_s15  ;;  %1290 = vrot.lane.b32.xlu0 %v14355_v46, %s14035_s15 }
 0x160   : > { %v476_v49 = vpop.f32.mrb[13].mxu0  ;;  %v14365_v51 = vadd.f32 %v12691_v48, %v12038_v23 }
 0x161   : > { %v14363_v50 = vadd.f32 %v12038_v23, %v476_v49 }
 0x163   : > { %v12694_v52 = vpop.f32.mrb[14].mxu0  ;;  %1367 = vrot.lane.b32.xlu1 %v14357_v47, %s14035_s15  ;;  %1444 = vrot.lane.b32.xlu0 %v14363_v50, %s14035_s15 }
 0x164   : > { %v486_v53 = vpop.f32.mrb[15].mxu0  ;;  %v14373_v55 = vadd.f32 %v12694_v52, %v12038_v23 }
 0x165   : > { %v14371_v54 = vadd.f32 %v12038_v23, %v486_v53 }
 0x167   : > { %1521 = vrot.lane.b32.xlu1 %v14365_v51, %s14035_s15  ;;  %1598 = vrot.lane.b32.xlu0 %v14371_v54, %s14035_s15 }
 0x16b   : > { %1675 = vrot.lane.b32.xlu1 %v14373_v55, %s14035_s15  ;;  %2003 = vrot.lane.b32.xlu0 %v14321_v29, %s14036_s16 }
 0x16f   : > { %1927 = vrot.lane.b32.xlu1 %v14317_v26, %s14036_s16  ;;  %2079 = vrot.lane.b32.xlu0 %v14323_v30, %s14036_s16 }
 0x173   : > { %2155 = vrot.lane.b32.xlu1 %v14329_v33, %s14036_s16  ;;  %2231 = vrot.lane.b32.xlu0 %v14331_v34, %s14036_s16 }
 0x1bd   : > { %v520_v56 = vpop.permute.xlu0 %519 }
 0x1be   : > { %12696 = vmatpush3.xpose.msk.msra.mxu1 %vm521_vm2, %v520_v56 }
 0x1bf   : > { %12700 = vmatprep.subr.mxu1 %v14033_v22 }
 0x1c1   : > { %v675_v57 = vpop.permute.xlu1 %674  ;;  %12698 = vmatmul.mubr.msk.f32.vlgmr.msra.gmra.mrb[0].mxu1 %vm521_vm2, %v14317_v26  ;;  %v598_v58 = vpop.permute.xlu0 %597 }
 0x1c2   : > { %12701 = vmatpush3.xpose.msk.msra.mxu1 %vm521_vm2, %v598_v58  ;;  %12702 = vmatprep.mubr.msk.f32.mxu1 %vm14034_vm1, %v14033_v22 }
 0x1c3   : > { %12705 = vmatprep.subr.mxu1 %v14033_v22 }
 0x1c5   : > { %v752_v59 = vpop.permute.xlu1 %751  ;;  %12703 = vmatmul.mubr.msk.f32.vlgmr.msra.gmra.mrb[2].mxu1 %vm521_vm2, %v14321_v29  ;;  %v829_v60 = vpop.permute.xlu0 %828 }
 0x1c6   : > { %12706 = vmatpush3.xpose.msk.msra.mxu1 %vm521_vm2, %v675_v57  ;;  %12707 = vmatprep.mubr.msk.f32.mxu1 %vm14034_vm1, %v14033_v22 }
 0x1c7   : > { %12710 = vmatprep.subr.mxu1 %v14033_v22 }
 0x1c9   : > { %v906_v61 = vpop.permute.xlu1 %905  ;;  %12708 = vmatmul.mubr.msk.f32.vlgmr.msra.gmra.mrb[4].mxu1 %vm521_vm2, %v14323_v30  ;;  %v983_v62 = vpop.permute.xlu0 %982 }
 0x1ca   : > { %12711 = vmatpush3.xpose.msk.msra.mxu1 %vm521_vm2, %v752_v59  ;;  %12712 = vmatprep.mubr.msk.f32.mxu1 %vm14034_vm1, %v14033_v22 }
 0x1cb   : > { %12715 = vmatprep.subr.mxu1 %v14033_v22 }
 0x1cd   : > { %v1060_v63 = vpop.permute.xlu1 %1059  ;;  %12713 = vmatmul.mubr.msk.f32.vlgmr.msra.gmra.mrb[6].mxu1 %vm521_vm2, %v14329_v33  ;;  %v1137_v0 = vpop.permute.xlu0 %1136 }
 0x1ce   : > { %12716 = vmatpush3.xpose.msk.msra.mxu1 %vm521_vm2, %v829_v60  ;;  %12717 = vmatprep.mubr.msk.f32.mxu1 %vm14034_vm1, %v14033_v22 }
 0x1cf   : > { %12720 = vmatprep.subr.mxu1 %v14033_v22 }
 0x1d1   : > { %v1214_v1 = vpop.permute.xlu1 %1213  ;;  %12718 = vmatmul.mubr.msk.f32.vlgmr.msra.gmra.mrb[8].mxu1 %vm521_vm2, %v14331_v34  ;;  %v1291_v2 = vpop.permute.xlu0 %1290 }
 0x1d2   : > { %12721 = vmatpush3.xpose.msk.msra.mxu1 %vm521_vm2, %v906_v61  ;;  %12741 = vmatpush3.xpose.msk.msra.mxu0 %vm521_vm2, %v1214_v1 }
 0x1d3   : > { %12722 = vmatprep.mubr.msk.f32.mxu1 %vm14034_vm1, %v14033_v22  ;;  %12750 = vmatprep.subr.mxu0 %v14033_v22 }
 0x1d4   : > { %12725 = vmatprep.subr.mxu1 %v14033_v22 }
 0x1d5   : > { %12743 = vmatmul.mubr.msk.f32.vlgmr.msra.gmra.mrb[16].mxu0 %vm521_vm2, %v14349_v43  ;;  %v1368_v3 = vpop.permute.xlu1 %1367  ;;  %12723 = vmatmul.mubr.msk.f32.vlgmr.msra.gmra.mrb[10].mxu1 %vm521_vm2, %v14333_v35  ;;  %v1445_v4 = vpop.permute.xlu0 %1444 }
 0x1d6   : > { %12726 = vmatpush3.xpose.msk.msra.mxu1 %vm521_vm2, %v983_v62  ;;  %12751 = vmatpush3.xpose.msk.msra.mxu0 %vm521_vm2, %v1368_v3 }
 0x1d7   : > { %12727 = vmatprep.mubr.msk.f32.mxu1 %vm14034_vm1, %v14033_v22  ;;  %12752 = vmatprep.mubr.msk.f32.mxu0 %vm14034_vm1, %v14033_v22 }
 0x1d8   : > { %12760 = vmatprep.subr.mxu0 %v14033_v22  ;;  %12730 = vmatprep.subr.mxu1 %v14033_v22 }
 0x1d9   : > { %12753 = vmatmul.mubr.msk.f32.vlgmr.msra.gmra.mrb[18].mxu0 %vm521_vm2, %v14357_v47  ;;  %v1522_v5 = vpop.permute.xlu1 %1521  ;;  %12728 = vmatmul.mubr.msk.f32.vlgmr.msra.gmra.mrb[12].mxu1 %vm521_vm2, %v14339_v38  ;;  %v1599_v6 = vpop.permute.xlu0 %1598 }
 0x1da   : > { %12731 = vmatpush3.xpose.msk.msra.mxu1 %vm521_vm2, %v1060_v63  ;;  %12761 = vmatpush3.xpose.msk.msra.mxu0 %vm521_vm2, %v1522_v5 }
 0x1db   : > { %12732 = vmatprep.mubr.msk.f32.mxu1 %vm14034_vm1, %v14033_v22  ;;  %12762 = vmatprep.mubr.msk.f32.mxu0 %vm14034_vm1, %v14033_v22 }
 0x1dc   : > { %12770 = vmatprep.subr.mxu0 %v14033_v22  ;;  %12735 = vmatprep.subr.mxu1 %v14033_v22 }
 0x1dd   : > { %12763 = vmatmul.mubr.msk.f32.vlgmr.msra.gmra.mrb[20].mxu0 %vm521_vm2, %v14365_v51  ;;  %v1676_v7 = vpop.permute.xlu1 %1675  ;;  %12733 = vmatmul.mubr.msk.f32.vlgmr.msra.gmra.mrb[14].mxu1 %vm521_vm2, %v14341_v39  ;;  %v2004_v8 = vpop.permute.xlu0 %2003 }
 0x1de   : > { %12736 = vmatpush3.xpose.msk.msra.mxu1 %vm521_vm2, %v1137_v0  ;;  %12771 = vmatpush3.xpose.msk.msra.mxu0 %vm521_vm2, %v1676_v7 }
 0x1df   : > { %12737 = vmatprep.mubr.msk.f32.mxu1 %vm14034_vm1, %v14033_v22  ;;  %12772 = vmatprep.mubr.msk.f32.mxu0 %vm14034_vm1, %v14033_v22 }
 0x1e0   : > { %12780 = vmatprep.subr.mxu0 %v14033_v22  ;;  %12745 = vmatprep.subr.mxu1 %v14033_v22 }
 0x1e1   : > { %12773 = vmatmul.mubr.msk.f32.vlgmr.msra.gmra.mrb[22].mxu0 %vm521_vm2, %v14373_v55  ;;  %12738 = vmatmul.mubr.msk.f32.vlgmr.msra.gmra.mrb[16].mxu1 %vm521_vm2, %v14347_v42  ;;  %v1928_v9 = vpop.permute.xlu1 %1927 }
 0x1e2   : > { %12746 = vmatpush3.xpose.msk.msra.mxu1 %vm521_vm2, %v1291_v2  ;;  %12781 = vmatpush3.msra.mxu0 %v2004_v8 }
 0x1e3   : > { %12747 = vmatprep.mubr.msk.f32.mxu1 %vm14034_vm1, %v14033_v22  ;;  %12755 = vmatprep.subr.mxu1 %v14033_v22 }
 0x1e4   : > { %12782 = vmatprep.mubr.msk.f32.mxu0 %vm14034_vm1, %v14033_v22  ;;  %12790 = vmatprep.subr.mxu0 %v14033_v22 }
 0x1e5   : > { %12748 = vmatmul.mubr.msk.f32.vlgmr.msra.gmra.mrb[18].mxu1 %vm521_vm2, %v14355_v46 }
 0x1e6   : > { %12756 = vmatpush3.xpose.msk.msra.mxu1 %vm521_vm2, %v1445_v4  ;;  %12757 = vmatprep.mubr.msk.f32.mxu1 %vm14034_vm1, %v14033_v22 }
 0x1e7   : > { %12765 = vmatprep.subr.mxu1 %v14033_v22 }
 0x1e9   : > { %12758 = vmatmul.mubr.msk.f32.vlgmr.msra.gmra.mrb[20].mxu1 %vm521_vm2, %v14363_v50 }
 0x1ea   : > { %12766 = vmatpush3.xpose.msk.msra.mxu1 %vm521_vm2, %v1599_v6  ;;  %12767 = vmatprep.mubr.msk.f32.mxu1 %vm14034_vm1, %v14033_v22 }
 0x1eb   : > { %12775 = vmatprep.subr.mxu1 %v14033_v22 }
 0x1ed   : > { %12768 = vmatmul.mubr.msk.f32.vlgmr.msra.gmra.mrb[22].mxu1 %vm521_vm2, %v14371_v54 }
 0x1ee   : > { %12776 = vmatpush3.msra.mxu1 %v1928_v9  ;;  %12777 = vmatprep.mubr.msk.f32.mxu1 %vm14034_vm1, %v14033_v22 }
 0x1ef   : > { %12785 = vmatprep.subr.mxu1 %v14033_v22 }
 0x294   : > { %v14489_v10 = vpop.f32.mrb[0].mxu1 }
 0x295   : > { %v12699_v11 = vpop.f32.mrb[1].mxu1  ;;  %v1751_v12 = vsel %vm521_vm2, %v14489_v10, -inf }
 0x296   : > { %1752 = vmax.xlane.f32.xlu0 %v1751_v12  ;;  %v14557_v12 = vpop.permute.xlu0 %2079 }
 0x298   : > { %v14493_v13 = vpop.f32.mrb[2].mxu1 }
 0x299   : > { %v12704_v14 = vpop.f32.mrb[3].mxu1  ;;  %v1754_v15 = vsel %vm521_vm2, %v14493_v13, -inf }
 0x29a   : > { %1755 = vmax.xlane.f32.xlu1 %v1754_v15  ;;  %v14559_v14 = vpop.permute.xlu0 %2231  ;;  %v14561_v15 = vpop.permute.xlu1 %2155 }
 0x29c   : > { %v14497_v16 = vpop.f32.mrb[4].mxu1 }
 0x29d   : > { %v12709_v17 = vpop.f32.mrb[5].mxu1  ;;  %v1757_v18 = vsel %vm521_vm2, %v14497_v16, -inf }
 0x29e   : > { %1758 = vmax.xlane.f32.xlu0 %v1757_v18 }
 0x2a0   : > { %v14501_v19 = vpop.f32.mrb[6].mxu1 }
 0x2a1   : > { %v12714_v20 = vpop.f32.mrb[7].mxu1  ;;  %v1760_v21 = vsel %vm521_vm2, %v14501_v19, -inf }
 0x2a2   : > { %1761 = vmax.xlane.f32.xlu0 %v1760_v21 }
 0x2a4   : > { %v14505_v23 = vpop.f32.mrb[8].mxu1 }
 0x2a5   : > { %v12719_v24 = vpop.f32.mrb[9].mxu1  ;;  %v1763_v25 = vsel %vm521_vm2, %v14505_v23, -inf }
 0x2a6   : > { %1764 = vmax.xlane.f32.xlu1 %v1763_v25 }
 0x2a8   : > { %v14509_v27 = vpop.f32.mrb[10].mxu1  ;;  %v14511_v28 = vpop.f32.mrb[16].mxu0 }
 0x2a9   : > { %v12724_v31 = vpop.f32.mrb[11].mxu1  ;;  %v12744_v32 = vpop.f32.mrb[17].mxu0  ;;  %v1778_v36 = vsel %vm521_vm2, %v14511_v28, -inf  ;;  %v1766_v57 = vsel %vm521_vm2, %v14509_v27, -inf }
 0x2aa   : > { %1779 = vmax.xlane.f32.xlu0 %v1778_v36 }
 0x2ac   : > { %v14515_v37 = vpop.f32.mrb[12].mxu1  ;;  %v14517_v40 = vpop.f32.mrb[18].mxu0 }
 0x2ad   : > { %v12729_v41 = vpop.f32.mrb[13].mxu1  ;;  %v12754_v44 = vpop.f32.mrb[19].mxu0  ;;  %v1784_v45 = vsel %vm521_vm2, %v14517_v40, -inf  ;;  %v1769_v48 = vsel %vm521_vm2, %v14515_v37, -inf }
 0x2ae   : > { %1785 = vmax.xlane.f32.xlu0 %v1784_v45  ;;  %1770 = vmax.xlane.f32.xlu1 %v1769_v48 }
 0x2b0   : > { %v14523_v49 = vpop.f32.mrb[14].mxu1  ;;  %v14525_v52 = vpop.f32.mrb[20].mxu0 }
 0x2b1   : > { %v12734_v53 = vpop.f32.mrb[15].mxu1  ;;  %v12764_v56 = vpop.f32.mrb[21].mxu0  ;;  %v1790_v62 = vsel %vm521_vm2, %v14525_v52, -inf  ;;  %v1772_v4 = vsel %vm521_vm2, %v14523_v49, -inf }
 0x2b2   : > { %1767 = vmax.xlane.f32.xlu0 %v1766_v57 }
 0x2b4   : > { %v14529_v58 = vpop.f32.mrb[16].mxu1  ;;  %v14531_v59 = vpop.f32.mrb[22].mxu0 }
 0x2b5   : > { %v12739_v60 = vpop.f32.mrb[17].mxu1  ;;  %v12774_v61 = vpop.f32.mrb[23].mxu0  ;;  %v1796_v1 = vsel %vm521_vm2, %v14531_v59, -inf  ;;  %v1775_v7 = vsel %vm521_vm2, %v14529_v58, -inf }
 0x2b6   : > { %1791 = vmax.xlane.f32.xlu0 %v1790_v62 }
 0x2b8   : > { %v14535_v63 = vpop.f32.mrb[18].mxu1 }
 0x2b9   : > { %v12749_v0 = vpop.f32.mrb[19].mxu1  ;;  %v1781_v8 = vsel %vm521_vm2, %v14535_v63, -inf }
 0x2ba   : > { %1797 = vmax.xlane.f32.xlu0 %v1796_v1 }
 0x2bc   : > { %v14539_v2 = vpop.f32.mrb[20].mxu1 }
 0x2bd   : > { %v12759_v3 = vpop.f32.mrb[21].mxu1  ;;  %v1787_v9 = vsel %vm521_vm2, %v14539_v2, -inf }
 0x2be   : > { %1773 = vmax.xlane.f32.xlu0 %v1772_v4 }
 0x2bf   : > { %2383 = vrot.lane.b32.xlu1 %v14339_v38, %s14036_s16 }
 0x2c0   : > { %v14545_v5 = vpop.f32.mrb[22].mxu1 }
 0x2c1   : > { %v12769_v6 = vpop.f32.mrb[23].mxu1  ;;  %v1793_v11 = vsel %vm521_vm2, %v14545_v5, -inf }
 0x2d4   : > { %2307 = vrot.lane.b32.xlu0 %v14333_v35, %s14036_s16 }
 0x2e3   : > { %1776 = vmax.xlane.f32.xlu1 %v1775_v7 }
 0x2e7   : > { %1782 = vmax.xlane.f32.xlu1 %v1781_v8 }
 0x2eb   : > { %1788 = vmax.xlane.f32.xlu1 %v1787_v9 }
 0x2ef   : > { %1794 = vmax.xlane.f32.xlu1 %v1793_v11 }
 0x323   : > { %v1753_v17 = vpop.xlane.xlu0 %1752 }
 0x324   : > { %v1799_v18 = vsub.f32 %v14489_v10, %v1753_v17 }
 0x326   : > { %v1815_v20 = vmul.f32 1.442695, %v1799_v18 }
 0x327   : > { %v1756_v21 = vpop.xlane.xlu1 %1755 }
 0x328   : > { %13597 = vpow2.f32 %v1815_v20  ;;  %v1800_v24 = vsub.f32 %v14493_v13, %v1756_v21 }
 0x32a   : > { %v1817_v25 = vmul.f32 1.442695, %v1800_v24 }
 0x32b   : > { %v1759_v31 = vpop.xlane.xlu0 %1758 }
 0x32c   : > { %13599 = vpow2.f32 %v1817_v25  ;;  %v1801_v32 = vsub.f32 %v14497_v16, %v1759_v31 }
 0x32e   : > { %v1819_v36 = vmul.f32 1.442695, %v1801_v32 }
 0x32f   : > { %v1762_v41 = vpop.xlane.xlu0 %1761 }
 0x330   : > { %13601 = vpow2.f32 %v1819_v36  ;;  %v1802_v44 = vsub.f32 %v14501_v19, %v1762_v41 }
 0x332   : > { %v14567_v45 = vpop.eup %13597  ;;  %v1821_v48 = vmul.f32 1.442695, %v1802_v44 }
 0x333   : > { %v1765_v53 = vpop.xlane.xlu1 %1764  ;;  %v1847_v10 = vsel %vm521_vm2, %v14567_v45, 0.0 }
 0x334   : > { %13603 = vpow2.f32 %v1821_v48  ;;  %1848 = vadd.xlane.f32.xlu1 %v1847_v10  ;;  %v1803_v56 = vsub.f32 %v14505_v23, %v1765_v53 }
 0x336   : > { %v14571_v13 = vpop.eup %13599  ;;  %v1823_v61 = vmul.f32 1.442695, %v1803_v56 }
 0x337   : > { %v1780_v57 = vpop.xlane.xlu0 %1779  ;;  %v1850_v16 = vsel %vm521_vm2, %v14571_v13, 0.0 }
 0x338   : > { %v1808_v60 = vsub.f32 %v14511_v28, %v1780_v57  ;;  %1851 = vadd.xlane.f32.xlu0 %v1850_v16 }
 0x33a   : > { %v14577_v19 = vpop.eup %13601  ;;  %v1833_v62 = vmul.f32 1.442695, %v1808_v60 }
 0x33b   : > { %v1786_v0 = vpop.xlane.xlu0 %1785  ;;  %v1853_v1 = vsel %vm521_vm2, %v14577_v19, 0.0  ;;  %v1771_v25 = vpop.xlane.xlu1 %1770 }
 0x33c   : > { %13605 = vpow2.f32 %v1833_v62  ;;  %v1810_v3 = vsub.f32 %v14517_v40, %v1786_v0  ;;  %1854 = vadd.xlane.f32.xlu1 %v1853_v1  ;;  %v1805_v10 = vsub.f32 %v14515_v37, %v1771_v25 }
 0x33d   : > { %13607 = vpow2.f32 %v1823_v61 }
 0x33e   : > { %v14582_v23 = vpop.eup %13603  ;;  %v1837_v4 = vmul.f32 1.442695, %v1810_v3  ;;  %v1827_v60 = vmul.f32 1.442695, %v1805_v10 }
 0x33f   : > { %v1768_v6 = vpop.xlane.xlu0 %1767  ;;  %v1856_v28 = vsel %vm521_vm2, %v14582_v23, 0.0  ;;  %v14613_v32 = vpop.permute.xlu1 %2383 }
 0x340   : > { %v1804_v7 = vsub.f32 %v14509_v27, %v1768_v6  ;;  %1857 = vadd.xlane.f32.xlu0 %v1856_v28  ;;  %13609 = vpow2.f32 %v1837_v4 }
 0x342   : > { %v1825_v8 = vmul.f32 1.442695, %v1804_v7 }
 0x343   : > { %v1792_v24 = vpop.xlane.xlu0 %1791 }
 0x344   : > { %13611 = vpow2.f32 %v1825_v8  ;;  %v1812_v36 = vsub.f32 %v14525_v52, %v1792_v24 }
 0x346   : > { %v14587_v9 = vpop.eup %13605  ;;  %v1841_v48 = vmul.f32 1.442695, %v1812_v36 }
 0x347   : > { %v1874_v40 = vsel %vm521_vm2, %v14587_v9, 0.0  ;;  %v14591_v11 = vpop.eup %13607  ;;  %v1798_v31 = vpop.xlane.xlu0 %1797 }
 0x348   : > { %1875 = vadd.xlane.f32.xlu1 %v1874_v40  ;;  %v1859_v18 = vsel %vm521_vm2, %v14591_v11, 0.0  ;;  %13613 = vpow2.f32 %v1841_v48  ;;  %v1814_v61 = vsub.f32 %v14531_v59, %v1798_v31 }
 0x34a   : > { %v14593_v17 = vpop.eup %13609  ;;  %v1845_v52 = vmul.f32 1.442695, %v1814_v61 }
 0x34b   : > { %v1880_v27 = vsel %vm521_vm2, %v14593_v17, 0.0  ;;  %v1774_v41 = vpop.xlane.xlu0 %1773 }
 0x34c   : > { %1860 = vadd.xlane.f32.xlu1 %v1859_v18  ;;  %1881 = vadd.xlane.f32.xlu0 %v1880_v27  ;;  %v1806_v53 = vsub.f32 %v14523_v49, %v1774_v41 }
 0x34e   : > { %v14599_v20 = vpop.eup %13611  ;;  %v1829_v56 = vmul.f32 1.442695, %v1806_v53 }
 0x34f   : > { %v1862_v21 = vsel %vm521_vm2, %v14599_v20, 0.0 }
 0x350   : > { %1863 = vadd.xlane.f32.xlu0 %v1862_v21  ;;  %13615 = vpow2.f32 %v1829_v56 }
 0x351   : > { %13617 = vpow2.f32 %v1827_v60 }
 0x352   : > { %v14621_v3 = vpop.eup %13613 }
 0x353   : > { %v1886_v37 = vsel %vm521_vm2, %v14621_v3, 0.0 }
 0x35a   : > { %v14625_v49 = vpop.eup %13615 }
 0x35b   : > { %v1868_v59 = vsel %vm521_vm2, %v14625_v49, 0.0 }
 0x35d   : > { %2535 = vrot.lane.b32.xlu1 %v14347_v42, %s14036_s16 }
 0x361   : > { %2611 = vrot.lane.b32.xlu1 %v14349_v43, %s14036_s16 }
 0x365   : > { %2687 = vrot.lane.b32.xlu1 %v14355_v46, %s14036_s16 }
 0x366   : > { %2459 = vrot.lane.b32.xlu0 %v14341_v39, %s14036_s16 }
 0x369   : > { %2763 = vrot.lane.b32.xlu1 %v14357_v47, %s14036_s16 }
 0x370   : > { %v1777_v44 = vpop.xlane.xlu1 %1776 }
 0x371   : > { %v1807_v57 = vsub.f32 %v14529_v58, %v1777_v44  ;;  %v14627_v58 = vpop.eup %13617 }
 0x372   : > { %v1865_v4 = vsel %vm521_vm2, %v14627_v58, 0.0 }
 0x373   : > { %v1831_v62 = vmul.f32 1.442695, %v1807_v57 }
 0x374   : > { %v1783_v16 = vpop.xlane.xlu1 %1782 }
 0x375   : > { %v1809_v0 = vsub.f32 %v14535_v63, %v1783_v16  ;;  %13619 = vpow2.f32 %v1831_v62 }
 0x376   : > { %13621 = vpow2.f32 %v1845_v52 }
 0x377   : > { %v1835_v1 = vmul.f32 1.442695, %v1809_v0 }
 0x378   : > { %v1789_v18 = vpop.xlane.xlu1 %1788 }
 0x379   : > { %13623 = vpow2.f32 %v1835_v1  ;;  %v1811_v27 = vsub.f32 %v14539_v2, %v1789_v18  ;;  %v2308_v2 = vpop.permute.xlu0 %2307 }
 0x37b   : > { %v1839_v24 = vmul.f32 1.442695, %v1811_v27 }
 0x37c   : > { %v1795_v21 = vpop.xlane.xlu1 %1794 }
 0x37d   : > { %v1813_v25 = vsub.f32 %v14545_v5, %v1795_v21  ;;  %13625 = vpow2.f32 %v1839_v24 }
 0x37f   : > { %v14631_v63 = vpop.eup %13619  ;;  %v1843_v31 = vmul.f32 1.442695, %v1813_v25 }
 0x380   : > { %v14635_v6 = vpop.eup %13621  ;;  %v1871_v28 = vsel %vm521_vm2, %v14631_v63, 0.0 }
 0x381   : > { %v1892_v8 = vsel %vm521_vm2, %v14635_v6, 0.0  ;;  %13627 = vpow2.f32 %v1843_v31 }
 0x383   : > { %v14639_v7 = vpop.eup %13623 }
 0x384   : > { %v1877_v40 = vsel %vm521_vm2, %v14639_v7, 0.0 }
 0x385   : > { %1887 = vadd.xlane.f32.xlu0 %v1886_v37 }
 0x387   : > { %v14663_v41 = vpop.eup %13625 }
 0x388   : > { %v1883_v44 = vsel %vm521_vm2, %v14663_v41, 0.0 }
 0x389   : > { %1869 = vadd.xlane.f32.xlu0 %v1868_v59 }
 0x38b   : > { %v14669_v48 = vpop.eup %13627 }
 0x38c   : > { %v1889_v10 = vsel %vm521_vm2, %v14669_v48, 0.0 }
 0x38d   : > { %1866 = vadd.xlane.f32.xlu1 %v1865_v4  ;;  %1872 = vadd.xlane.f32.xlu0 %v1871_v28 }
 0x391   : > { %1893 = vadd.xlane.f32.xlu1 %v1892_v8  ;;  %1878 = vadd.xlane.f32.xlu0 %v1877_v40 }
 0x3a2   : > { %2915 = vrot.lane.b32.xlu1 %v14365_v51, %s14036_s16 }
 0x3a7   : > { %2839 = vrot.lane.b32.xlu0 %v14363_v50, %s14036_s16 }
 0x3ab   : > { %2991 = vrot.lane.b32.xlu0 %v14371_v54, %s14036_s16 }
 0x3af   : > { %3355 = vrot.lane.b32.xlu0 %v14317_v26, %s14037_s10 }
 0x3b3   : > { %3433 = vrot.lane.b32.xlu0 %v14321_v29, %s14037_s10 }
 0x3b7   : > { %3511 = vrot.lane.b32.xlu0 %v14323_v30, %s14037_s10 }
 0x3bb   : > { %3589 = vrot.lane.b32.xlu0 %v14329_v33, %s14037_s10 }
 0x3bf   : > { %3667 = vrot.lane.b32.xlu0 %v14331_v34, %s14037_s10 }
 0x3c1   : > { %v1849_v36 = vpop.xlane.xlu1 %1848 }
 0x3c2   : > { %13629 = vrcp.f32 %v1849_v36 }
 0x3c3   : > { %3745 = vrot.lane.b32.xlu0 %v14333_v35, %s14037_s10 }
 0x3c5   : > { %v1852_v5 = vpop.xlane.xlu0 %1851 }
 0x3c6   : > { %13631 = vrcp.f32 %v1852_v5  ;;  %1884 = vadd.xlane.f32.xlu1 %v1883_v44 }
 0x3c7   : > { %3823 = vrot.lane.b32.xlu0 %v14339_v38, %s14037_s10 }
 0x3c9   : > { %v1855_v53 = vpop.xlane.xlu1 %1854 }
 0x3ca   : > { %13633 = vrcp.f32 %v1855_v53  ;;  %1890 = vadd.xlane.f32.xlu1 %v1889_v10 }
 0x3cb   : > { %3901 = vrot.lane.b32.xlu0 %v14341_v39, %s14037_s10 }
 0x3cc   : > { %v13630_v56 = vpop.eup %13629 }
 0x3cd   : > { %v1858_v57 = vpop.xlane.xlu0 %1857  ;;  %v1911_v16 = vmul.f32 %v13630_v56, %v14567_v45 }
 0x3ce   : > { %13635 = vrcp.f32 %v1858_v57 }
 0x3cf   : > { %12778 = vmatmul.mubr.msk.f32.vlgmr.msra.gmra.mrb[24].mxu1 %vm521_vm2, %v1911_v16  ;;  %3979 = vrot.lane.b32.xlu0 %v14347_v42, %s14037_s10 }
 0x3d0   : > { %v13632_v60 = vpop.eup %13631  ;;  %12786 = vmatpush3.msra.mxu1 %v14557_v12  ;;  %12787 = vmatprep.mubr.msk.f32.mxu1 %vm14034_vm1, %v14033_v22 }
 0x3d1   : > { %v1912_v61 = vmul.f32 %v13632_v60, %v14571_v13  ;;  %12795 = vmatprep.subr.mxu1 %v14033_v22  ;;  %v3143_v60 = vld [vmem:[#allocation7] sm:$0xff] }
 0x3d3   : > { %12783 = vmatmul.mubr.msk.f32.vlgmr.msra.gmra.mrb[24].mxu0 %vm521_vm2, %v1912_v61  ;;  %3977 = vrot.lane.b32.xlu0 %v14347_v42, %s14038_s28 }
 0x3d4   : > { %v13634_v62 = vpop.eup %13633  ;;  %12791 = vmatpush3.msra.mxu0 %v14561_v15  ;;  %12792 = vmatprep.mubr.msk.f32.mxu0 %vm14034_vm1, %v14033_v22 }
 0x3d5   : > { %v14690_v12 = vpop.xlane.xlu1 %1875  ;;  %v1913_v45 = vmul.f32 %v13634_v62, %v14577_v19  ;;  %12800 = vmatprep.subr.mxu0 %v14033_v22 }
 0x3d7   : > { %12788 = vmatmul.mubr.msk.f32.vlgmr.msra.gmra.mrb[26].mxu1 %vm521_vm2, %v1913_v45  ;;  %4135 = vrot.lane.b32.xlu0 %v14355_v46, %s14037_s10 }
 0x3d8   : > { %v13636_v13 = vpop.eup %13635  ;;  %12796 = vmatpush3.msra.mxu1 %v14559_v14  ;;  %12797 = vmatprep.mubr.msk.f32.mxu1 %vm14034_vm1, %v14033_v22 }
 0x3d9   : > { %v1861_v0 = vpop.xlane.xlu1 %1860  ;;  %v1914_v15 = vmul.f32 %v13636_v13, %v14582_v23  ;;  %12805 = vmatprep.subr.mxu1 %v14033_v22  ;;  %v1882_v19 = vpop.xlane.xlu0 %1881 }
 0x3da   : > { %13637 = vrcp.f32 %v1861_v0 }
 0x3db   : > { %3067 = vrot.lane.b32.xlu1 %v14373_v55, %s14036_s16  ;;  %12793 = vmatmul.mubr.msk.f32.vlgmr.msra.gmra.mrb[26].mxu0 %vm521_vm2, %v1914_v15 }
 0x3dc   : > { %4133 = vrot.lane.b32.xlu0 %v14355_v46, %s14038_s28  ;;  %12801 = vmatpush3.msra.mxu0 %v2308_v2 }
 0x3dd   : > { %12802 = vmatprep.mubr.msk.f32.mxu0 %vm14034_vm1, %v14033_v22  ;;  %12810 = vmatprep.subr.mxu0 %v14033_v22  ;;  %v1864_v14 = vpop.xlane.xlu0 %1863 }
 0x3de   : > { %13639 = vrcp.f32 %v1864_v14 }
 0x3df   : > { %3353 = vrot.lane.b32.xlu1 %v14317_v26, %s14038_s28 }
 0x3e0   : > { %4291 = vrot.lane.b32.xlu0 %v14363_v50, %s14037_s10 }
 0x3e3   : > { %3431 = vrot.lane.b32.xlu1 %v14321_v29, %s14038_s28 }
 0x3e4   : > { %v13638_v23 = vpop.eup %13637  ;;  %4289 = vrot.lane.b32.xlu0 %v14363_v50, %s14038_s28 }
 0x3e5   : > { %v1915_v52 = vmul.f32 %v13638_v23, %v14591_v11  ;;  %v2460_v11 = vpop.permute.xlu0 %2459 }
 0x3e7   : > { %12798 = vmatmul.mubr.msk.f32.vlgmr.msra.gmra.mrb[28].mxu1 %vm521_vm2, %v1915_v52  ;;  %3509 = vrot.lane.b32.xlu1 %v14323_v30, %s14038_s28 }
 0x3e8   : > { %12806 = vmatpush3.msra.mxu1 %v14613_v32  ;;  %4447 = vrot.lane.b32.xlu0 %v14371_v54, %s14037_s10  ;;  %v13640_v1 = vpop.eup %13639 }
 0x3e9   : > { %12807 = vmatprep.mubr.msk.f32.mxu1 %vm14034_vm1, %v14033_v22  ;;  %12815 = vmatprep.subr.mxu1 %v14033_v22  ;;  %v1916_v37 = vmul.f32 %v13640_v1, %v14599_v20  ;;  %v2536_v20 = vpop.permute.xlu1 %2535 }
 0x3eb   : > { %3587 = vrot.lane.b32.xlu1 %v14329_v33, %s14038_s28  ;;  %12803 = vmatmul.mubr.msk.f32.vlgmr.msra.gmra.mrb[28].mxu0 %vm521_vm2, %v1916_v37 }
 0x3ec   : > { %4445 = vrot.lane.b32.xlu0 %v14371_v54, %s14038_s28  ;;  %12811 = vmatpush3.msra.mxu0 %v2460_v11 }
 0x3ed   : > { %12812 = vmatprep.mubr.msk.f32.mxu0 %vm14034_vm1, %v14033_v22  ;;  %12820 = vmatprep.subr.mxu0 %v14033_v22  ;;  %v2612_v32 = vpop.permute.xlu1 %2611 }
 0x3ef   : > { %3665 = vrot.lane.b32.xlu1 %v14331_v34, %s14038_s28 }
 0x3f0   : > { %4853 = vrot.lane.b32.xlu0 %v14321_v29, %s14039_s13 }
 0x3f1   : > { %v2688_v59 = vpop.permute.xlu1 %2687 }
 0x3f3   : > { %3743 = vrot.lane.b32.xlu1 %v14333_v35, %s14038_s28 }
 0x3f4   : > { %5005 = vrot.lane.b32.xlu0 %v14329_v33, %s14039_s13 }
 0x3f5   : > { %v2764_v28 = vpop.permute.xlu1 %2763 }
 0x3f7   : > { %3821 = vrot.lane.b32.xlu1 %v14339_v38, %s14038_s28 }
 0x3f8   : > { %5233 = vrot.lane.b32.xlu0 %v14339_v38, %s14039_s13 }
 0x3fb   : > { %3899 = vrot.lane.b32.xlu1 %v14341_v39, %s14038_s28 }
 0x3fc   : > { %5385 = vrot.lane.b32.xlu0 %v14347_v42, %s14039_s13 }
 0x3ff   : > { %4057 = vrot.lane.b32.xlu1 %v14349_v43, %s14037_s10 }
 0x403   : > { %4055 = vrot.lane.b32.xlu1 %v14349_v43, %s14038_s28 }
 0x407   : > { %4213 = vrot.lane.b32.xlu1 %v14357_v47, %s14037_s10 }
 0x40b   : > { %4211 = vrot.lane.b32.xlu1 %v14357_v47, %s14038_s28 }
 0x40f   : > { %4369 = vrot.lane.b32.xlu1 %v14365_v51, %s14037_s10 }
 0x412   : > { %v1888_v4 = vpop.xlane.xlu0 %1887 }
 0x413   : > { %4367 = vrot.lane.b32.xlu1 %v14365_v51, %s14038_s28 }
 0x416   : > { %v1870_v8 = vpop.xlane.xlu0 %1869 }
 0x417   : > { %4525 = vrot.lane.b32.xlu1 %v14373_v55, %s14037_s10  ;;  %13641 = vrcp.f32 %v1870_v8  ;;  %s16129_s10 = scalar_lea.vmem [#allocation8], %s12034_s6  ;;  %s12318_s6 = sshll.u32 %s14100_s22, 11 }
 0x418   : > { %13643 = vrcp.f32 %v14690_v12  ;;  %s16191_s30 = scalar_lea.hbm %s16246_s5, %s12318_s6  ;;  %s11920_s22 = scalar_lea.sflag [#allocation4], %s14260_s14 }
 0x41a   : > { %v1867_v40 = vpop.xlane.xlu1 %1866  ;;  %v1873_v18 = vpop.xlane.xlu0 %1872 }
 0x41b   : > { %13645 = vrcp.f32 %v1867_v40  ;;  %4523 = vrot.lane.b32.xlu1 %v14373_v55, %s14038_s28  ;;  %s11933_s28 = sshll.u32 %s16129_s10, 4  ;;  %s16193_s28 = int_to_ptr.vmem [resolvable:$true] %s11933_s28 }
 0x41c   : > { %13647 = vrcp.f32 %v1882_v19 }
 0x41d   : > { %13649 = vrcp.f32 %v1873_v18 }
 0x41e   : > { %v1879_v27 = vpop.xlane.xlu0 %1878  ;;  %13651 = vrcp.f32 %v1888_v4  ;;  %v1894_v5 = vpop.xlane.xlu1 %1893 }
 0x41f   : > { %4777 = vrot.lane.b32.xlu1 %v14317_v26, %s14039_s13  ;;  %13653 = vrcp.f32 %v1879_v27 }
 0x420   : > { %13655 = vrcp.f32 %v1894_v5 }
 0x421   : > { %v13642_v21 = vpop.eup %13641 }
 0x422   : > { %v1918_v24 = vmul.f32 %v13642_v21, %v14625_v49  ;;  %v13644_v25 = vpop.eup %13643  ;;  %v2916_v56 = vpop.permute.xlu1 %2915 }
 0x423   : > { %4929 = vrot.lane.b32.xlu1 %v14323_v30, %s14039_s13  ;;  %v1920_v44 = vmul.f32 %v13644_v25, %v14587_v9  ;;  %v2840_v57 = vpop.permute.xlu0 %2839 }
 0x424   : > { %12813 = vmatmul.mubr.msk.f32.vlgmr.msra.gmra.mrb[30].mxu0 %vm521_vm2, %v1918_v24 }
 0x425   : > { %v13646_v31 = vpop.eup %13645  ;;  %12821 = vmatpush3.msra.mxu0 %v2612_v32  ;;  %12822 = vmatprep.mubr.msk.f32.mxu0 %vm14034_vm1, %v14033_v22 }
 0x426   : > { %v1917_v2 = vmul.f32 %v13646_v31, %v14627_v58  ;;  %v13648_v36 = vpop.eup %13647  ;;  %12830 = vmatprep.subr.mxu0 %v14033_v22 }
 0x427   : > { %5081 = vrot.lane.b32.xlu1 %v14331_v34, %s14039_s13  ;;  %v13650_v49 = vpop.eup %13649  ;;  %v1922_v9 = vmul.f32 %v13648_v36, %v14593_v17  ;;  %v2992_v13 = vpop.permute.xlu0 %2991 }
 0x428   : > { %12808 = vmatmul.mubr.msk.f32.vlgmr.msra.gmra.mrb[30].mxu1 %vm521_vm2, %v1917_v2  ;;  %12823 = vmatmul.mubr.msk.f32.vlgmr.msra.gmra.mrb[32].mxu0 %vm521_vm2, %v1920_v44  ;;  %v13652_v58 = vpop.eup %13651  ;;  %v1919_v53 = vmul.f32 %v13650_v49, %v14631_v63 }
 0x429   : > { %12816 = vmatpush3.msra.mxu1 %v2536_v20  ;;  %12831 = vmatpush3.msra.mxu0 %v2764_v28  ;;  %v13654_v10 = vpop.eup %13653  ;;  %v1924_v63 = vmul.f32 %v13652_v58, %v14621_v3 }
 0x42a   : > { %12817 = vmatprep.mubr.msk.f32.mxu1 %vm14034_vm1, %v14033_v22  ;;  %12825 = vmatprep.subr.mxu1 %v14033_v22  ;;  %v1921_v17 = vmul.f32 %v13654_v10, %v14639_v7  ;;  %v13656_v16 = vpop.eup %13655 }
 0x42b   : > { %5157 = vrot.lane.b32.xlu1 %v14333_v35, %s14039_s13  ;;  %12832 = vmatprep.mubr.msk.f32.mxu0 %vm14034_vm1, %v14033_v22  ;;  %v1926_v62 = vmul.f32 %v13656_v16, %v14635_v6  ;;  %v3356_v15 = vpop.permute.xlu0 %3355 }
 0x42c   : > { %12840 = vmatprep.subr.mxu0 %v14033_v22  ;;  %12818 = vmatmul.mubr.msk.f32.vlgmr.msra.gmra.mrb[32].mxu1 %vm521_vm2, %v1919_v53 }
 0x42d   : > { %12833 = vmatmul.mubr.msk.f32.vlgmr.msra.gmra.mrb[34].mxu0 %vm521_vm2, %v1922_v9  ;;  %12826 = vmatpush3.msra.mxu1 %v2688_v59 }
 0x42e   : > { %12841 = vmatpush3.msra.mxu0 %v2916_v56  ;;  %12827 = vmatprep.mubr.msk.f32.mxu1 %vm14034_vm1, %v14033_v22 }
 0x42f   : > { %5309 = vrot.lane.b32.xlu1 %v14341_v39, %s14039_s13  ;;  %12835 = vmatprep.subr.mxu1 %v14033_v22  ;;  %v3434_v19 = vpop.permute.xlu0 %3433 }
 0x430   : > { %12842 = vmatprep.mubr.msk.f32.mxu0 %vm14034_vm1, %v14033_v22  ;;  %12828 = vmatmul.mubr.msk.f32.vlgmr.msra.gmra.mrb[34].mxu1 %vm521_vm2, %v1921_v17 }
 0x431   : > { %12843 = vmatmul.mubr.msk.f32.vlgmr.msra.gmra.mrb[36].mxu0 %vm521_vm2, %v1924_v63  ;;  %12836 = vmatpush3.msra.mxu1 %v2840_v57 }
 0x432   : > { %12850 = vmatprep.subr.mxu0 %v14033_v22  ;;  %12852 = vmatprep.mubr.msk.f32.mxu0 %vm14034_vm1, %v14033_v22 }
 0x433   : > { %5461 = vrot.lane.b32.xlu1 %v14349_v43, %s14039_s13  ;;  %12837 = vmatprep.mubr.msk.f32.mxu1 %vm14034_vm1, %v14033_v22  ;;  %v3512_v23 = vpop.permute.xlu0 %3511 }
 0x434   : > { %12845 = vmatprep.subr.mxu1 %v14033_v22 }
 0x437   : > { %v3590_v1 = vpop.permute.xlu0 %3589 }
 0x43b   : > { %v3668_v59 = vpop.permute.xlu0 %3667 }
 0x43f   : > { %v3746_v40 = vpop.permute.xlu0 %3745 }
 0x443   : > { %v3824_v24 = vpop.permute.xlu0 %3823 }
 0x447   : > { %v3902_v31 = vpop.permute.xlu0 %3901 }
 0x44b   : > { %v14835_v49 = vpop.permute.xlu0 %3979 }
 0x44f   : > { %v14844_v9 = vpop.permute.xlu0 %3977 }
 0x453   : > { %v1885_v3 = vpop.xlane.xlu1 %1884  ;;  %v14852_v56 = vpop.permute.xlu0 %4135 }
 0x454   : > { %13657 = vrcp.f32 %v1885_v3 }
 0x457   : > { %v1891_v7 = vpop.xlane.xlu1 %1890  ;;  %v14863_v63 = vpop.permute.xlu0 %4133 }
 0x458   : > { %13659 = vrcp.f32 %v1891_v7 }
 0x45b   : > { %v3068_v61 = vpop.permute.xlu1 %3067  ;;  %v14871_v3 = vpop.permute.xlu0 %4291 }
 0x45c   : > { %12851 = vmatpush3.msra.mxu0 %v3068_v61 }
 0x45d   : > { %12853 = vmatmul.mubr.msk.f32.vlgmr.msra.gmra.mrb[38].mxu0 %vm521_vm2, %v1926_v62  ;;  %12855 = vmatprep.subr.mxu0 %v3143_v60 }
 0x45e   : > { %v13658_v12 = vpop.eup %13657  ;;  %12856 = vmatpush3.msra.mxu0 %v3143_v60 }
 0x45f   : > { %v1923_v45 = vmul.f32 %v13658_v12, %v14663_v41  ;;  %12881 = vmatprep.subr.mxu0 %v14033_v22  ;;  %v3354_v41 = vpop.permute.xlu1 %3353  ;;  %v14882_v16 = vpop.permute.xlu0 %4289 }
 0x461   : > { %12838 = vmatmul.mubr.msk.f32.vlgmr.msra.gmra.mrb[36].mxu1 %vm521_vm2, %v1923_v45 }
 0x462   : > { %v13660_v0 = vpop.eup %13659  ;;  %12846 = vmatpush3.msra.mxu1 %v2992_v13  ;;  %12847 = vmatprep.mubr.msk.f32.mxu1 %vm14034_vm1, %v14033_v22 }
 0x463   : > { %v1925_v6 = vmul.f32 %v13660_v0, %v14669_v48  ;;  %13447 = vmatprep.subr.mxu1 %v3143_v60  ;;  %v3432_v14 = vpop.permute.xlu1 %3431  ;;  %v14890_v61 = vpop.permute.xlu0 %4447 }
 0x465   : > { %12848 = vmatmul.mubr.msk.f32.vlgmr.msra.gmra.mrb[38].mxu1 %vm521_vm2, %v1925_v6 }
 0x466   : > { %13448 = vmatpush3.msra.mxu1 %v3143_v60 }
 0x467   : > { %12921 = vmatprep.subr.mxu1 %v14033_v22  ;;  %v3510_v52 = vpop.permute.xlu1 %3509  ;;  %v4446_v12 = vpop.permute.xlu0 %4445 }
 0x46b   : > { %v3588_v32 = vpop.permute.xlu1 %3587  ;;  %v4854_v13 = vpop.permute.xlu0 %4853 }
 0x46f   : > { %v3666_v8 = vpop.permute.xlu1 %3665 }
 0x473   : > { %v3744_v21 = vpop.permute.xlu1 %3743 }
 0x477   : > { %v3822_v25 = vpop.permute.xlu1 %3821 }
 0x47b   : > { %v3900_v5 = vpop.permute.xlu1 %3899 }
 0x47f   : > { %v4058_v53 = vpop.permute.xlu1 %4057 }
 0x483   : > { %v4056_v10 = vpop.permute.xlu1 %4055 }
 0x487   : > { %v4214_v17 = vpop.permute.xlu1 %4213 }
 0x48b   : > { %v4212_v57 = vpop.permute.xlu1 %4211 }
 0x48f   : > { %v4370_v7 = vpop.permute.xlu1 %4369 }
 0x493   : > { %v4368_v60 = vpop.permute.xlu1 %4367 }
 0x497   : > { %v4526_v62 = vpop.permute.xlu1 %4525 }
 0x49b   : > { %v4524_v45 = vpop.permute.xlu1 %4523 }
 0x4a2   : > { %v1999_v37 = vpop.f32.mrb[24].mxu1 }
 0x4a3   : > { %v12779_v11 = vpop.f32.mrb[25].mxu1  ;;  %12857 = vmatprep.mubr.msk.f32.mxu0 %vm521_vm2, %v1999_v37 }
 0x4a6   : > { %v2075_v20 = vpop.f32.mrb[24].mxu0 }
 0x4a7   : > { %v12784_v48 = vpop.f32.mrb[25].mxu0  ;;  %12858 = vmatmul.mubr.msk.f32.vlgmr.msra.gmra.mrb[40].mxu0 %vm521_vm2, %v2075_v20 }
 0x4a8   : > { %12882 = vmatpush3.xpose.msk.msra.mxu0 %vm521_vm2, %v3356_v15 }
 0x4a9   : > { %12886 = vmatprep.subr.mxu0 %v14033_v22 }
 0x4aa   : > { %v2151_v4 = vpop.f32.mrb[26].mxu1 }
 0x4ab   : > { %v12789_v28 = vpop.f32.mrb[27].mxu1  ;;  %12860 = vmatprep.mubr.msk.f32.mxu0 %vm521_vm2, %v2151_v4 }
 0x4ae   : > { %v2227_v18 = vpop.f32.mrb[26].mxu0 }
 0x4af   : > { %v12794_v27 = vpop.f32.mrb[27].mxu0  ;;  %12861 = vmatmul.mubr.msk.f32.gmra.mrb[42].mxu0 %vm521_vm2, %v2227_v18 }
 0x4b0   : > { %v4778_v27 = vpop.permute.xlu1 %4777 }
 0x4ba   : > { %v2303_v2 = vpop.f32.mrb[28].mxu1 }
 0x4bb   : > { %v12799_v36 = vpop.f32.mrb[29].mxu1  ;;  %12863 = vmatprep.mubr.msk.f32.mxu0 %vm521_vm2, %v2303_v2 }
 0x4be   : > { %v2379_v44 = vpop.f32.mrb[28].mxu0 }
 0x4bf   : > { %v12804_v58 = vpop.f32.mrb[29].mxu0  ;;  %12864 = vmatmul.mubr.msk.f32.gmra.mrb[44].mxu0 %vm521_vm2, %v2379_v44 }
 0x4c0   : > { %12883 = vmatprep.mubr.msk.f32.mxu0 %vm14034_vm1, %v14033_v22 }
 0x4c3   : > { %12884 = vmatmul.mubr.msk.f32.vlgmr.msra.gmra.mrb[46].mxu0 %vm521_vm2, %v3354_v41 }
 0x4c4   : > { %12887 = vmatpush3.xpose.msk.msra.mxu0 %vm521_vm2, %v3434_v19  ;;  %12888 = vmatprep.mubr.msk.f32.mxu0 %vm14034_vm1, %v14033_v22 }
 0x4c5   : > { %12891 = vmatprep.subr.mxu0 %v14033_v22 }
 0x4c7   : > { %12889 = vmatmul.mubr.msk.f32.vlgmr.msra.gmra.mrb[48].mxu0 %vm521_vm2, %v3432_v14 }
 0x4c8   : > { %12892 = vmatpush3.xpose.msk.msra.mxu0 %vm521_vm2, %v3512_v23  ;;  %12893 = vmatprep.mubr.msk.f32.mxu0 %vm14034_vm1, %v14033_v22 }
 0x4c9   : > { %12896 = vmatprep.subr.mxu0 %v14033_v22 }
 0x4cb   : > { %12894 = vmatmul.mubr.msk.f32.vlgmr.msra.gmra.mrb[50].mxu0 %vm521_vm2, %v3510_v52 }
 0x4cc   : > { %12897 = vmatpush3.xpose.msk.msra.mxu0 %vm521_vm2, %v3590_v1  ;;  %12898 = vmatprep.mubr.msk.f32.mxu0 %vm14034_vm1, %v14033_v22 }
 0x4cd   : > { %12901 = vmatprep.subr.mxu0 %v14033_v22 }
 0x4cf   : > { %12899 = vmatmul.mubr.msk.f32.vlgmr.msra.gmra.mrb[52].mxu0 %vm521_vm2, %v3588_v32 }
 0x4d0   : > { %12902 = vmatpush3.xpose.msk.msra.mxu0 %vm521_vm2, %v3668_v59  ;;  %12903 = vmatprep.mubr.msk.f32.mxu0 %vm14034_vm1, %v14033_v22 }
 0x4d1   : > { %12906 = vmatprep.subr.mxu0 %v14033_v22 }
 0x4d3   : > { %12904 = vmatmul.mubr.msk.f32.vlgmr.msra.gmra.mrb[54].mxu0 %vm521_vm2, %v3666_v8 }
 0x4d4   : > { %12907 = vmatpush3.xpose.msk.msra.mxu0 %vm521_vm2, %v3746_v40  ;;  %12908 = vmatprep.mubr.msk.f32.mxu0 %vm14034_vm1, %v14033_v22 }
 0x4d5   : > { %12911 = vmatprep.subr.mxu0 %v14033_v22 }
 0x4d7   : > { %12909 = vmatmul.mubr.msk.f32.vlgmr.msra.gmra.mrb[56].mxu0 %vm521_vm2, %v3744_v21  ;;  %v12055_v21 = vld [vmem:[%s16245_s4] ss:$0 sm:$0xff] }
 0x4d8   : > { %12912 = vmatpush3.xpose.msk.msra.mxu0 %vm521_vm2, %v3824_v24  ;;  %12913 = vmatprep.mubr.msk.f32.mxu0 %vm14034_vm1, %v14033_v22  ;;  %v13853_v24 = vld [vmem:[%s14266_s12] sm:$0xff] }
 0x4d9   : > { %12916 = vmatprep.subr.mxu0 %v14033_v22 }
 0x4db   : > { %12914 = vmatmul.mubr.msk.f32.vlgmr.msra.gmra.mrb[58].mxu0 %vm521_vm2, %v3822_v25  ;;  %v502_v25 = vadd.f32 %v13853_v24, %v12055_v21 }
 0x4dc   : > { %12917 = vmatpush3.xpose.msk.msra.mxu0 %vm521_vm2, %v3902_v31  ;;  %12918 = vmatprep.mubr.msk.f32.mxu0 %vm14034_vm1, %v14033_v22 }
 0x4dd   : > { %12926 = vmatprep.subr.mxu0 %v14033_v22 }
 0x4df   : > { %12919 = vmatmul.mubr.msk.f32.vlgmr.msra.gmra.mrb[60].mxu0 %vm521_vm2, %v3900_v5 }
 0x4e0   : > { %12927 = vmatpush3.xpose.msk.msra.mxu0 %vm521_vm2, %v4058_v53  ;;  %12928 = vmatprep.mubr.msk.f32.mxu0 %vm14034_vm1, %v14033_v22 }
 0x4e1   : > { %12936 = vmatprep.subr.mxu0 %v14033_v22 }
 0x4e3   : > { %12929 = vmatmul.mubr.msk.f32.vlgmr.msra.gmra.mrb[62].mxu0 %vm521_vm2, %v4056_v10 }
 0x4e4   : > { %12937 = vmatpush3.xpose.msk.msra.mxu0 %vm521_vm2, %v4214_v17  ;;  %12938 = vmatprep.mubr.msk.f32.mxu0 %vm14034_vm1, %v14033_v22 }
 0x4e5   : > { %12946 = vmatprep.subr.mxu0 %v14033_v22 }
 0x4e7   : > { %12939 = vmatmul.mubr.msk.f32.vlgmr.msra.gmra.mrb[64].mxu0 %vm521_vm2, %v4212_v57 }
 0x4e8   : > { %12947 = vmatpush3.xpose.msk.msra.mxu0 %vm521_vm2, %v4370_v7  ;;  %12948 = vmatprep.mubr.msk.f32.mxu0 %vm14034_vm1, %v14033_v22 }
 0x4e9   : > { %12956 = vmatprep.subr.mxu0 %v14033_v22 }
 0x4eb   : > { %12949 = vmatmul.mubr.msk.f32.vlgmr.msra.gmra.mrb[66].mxu0 %vm521_vm2, %v4368_v60 }
 0x4ec   : > { %12957 = vmatpush3.xpose.msk.msra.mxu0 %vm521_vm2, %v4526_v62  ;;  %12958 = vmatprep.mubr.msk.f32.mxu0 %vm14034_vm1, %v14033_v22 }
 0x4ed   : > { %12966 = vmatprep.subr.mxu0 %v14033_v22 }
 0x4ef   : > { %12959 = vmatmul.mubr.msk.f32.vlgmr.msra.gmra.mrb[68].mxu0 %vm521_vm2, %v4524_v45 }
 0x4f0   : > { %12967 = vmatpush3.msra.mxu0 %v4854_v13  ;;  %12968 = vmatprep.mubr.msk.f32.mxu0 %vm14034_vm1, %v14033_v22 }
 0x4f1   : > { %12976 = vmatprep.subr.mxu0 %v14033_v22 }
 0x4f7   : > { %v2531_v0 = vpop.f32.mrb[30].mxu0 }
 0x4f8   : > { %v12814_v6 = vpop.f32.mrb[31].mxu0 }
 0x4fb   : > { %v2455_v15 = vpop.f32.mrb[30].mxu1  ;;  %v2683_v41 = vpop.f32.mrb[32].mxu0 }
 0x4fc   : > { %v12809_v19 = vpop.f32.mrb[31].mxu1  ;;  %12866 = vmatprep.mubr.msk.f32.mxu1 %vm521_vm2, %v2455_v15  ;;  %v12824_v14 = vpop.f32.mrb[33].mxu0 }
 0x4fd   : > { %12867 = vmatmul.mubr.msk.f32.vlgmr.msra.gmra.mrb[40].mxu1 %vm521_vm2, %v2531_v0 }
 0x4fe   : > { %12922 = vmatpush3.xpose.msk.msra.mxu1 %vm521_vm2, %v14835_v49 }
 0x4ff   : > { %12931 = vmatprep.subr.mxu1 %v14033_v22  ;;  %v2607_v23 = vpop.f32.mrb[32].mxu1 }
 0x500   : > { %v2835_v52 = vpop.f32.mrb[34].mxu0  ;;  %v12819_v1 = vpop.f32.mrb[33].mxu1  ;;  %12869 = vmatprep.mubr.msk.f32.mxu1 %vm521_vm2, %v2607_v23 }
 0x501   : > { %v12834_v37 = vpop.f32.mrb[35].mxu0  ;;  %12870 = vmatmul.mubr.msk.f32.gmra.mrb[42].mxu1 %vm521_vm2, %v2683_v41 }
 0x503   : > { %v2759_v11 = vpop.f32.mrb[34].mxu1 }
 0x504   : > { %v2987_v20 = vpop.f32.mrb[36].mxu0  ;;  %v12829_v32 = vpop.f32.mrb[35].mxu1  ;;  %12872 = vmatprep.mubr.msk.f32.mxu1 %vm521_vm2, %v2759_v11 }
 0x505   : > { %v12844_v48 = vpop.f32.mrb[37].mxu0  ;;  %12873 = vmatmul.mubr.msk.f32.gmra.mrb[44].mxu1 %vm521_vm2, %v2835_v52 }
 0x530   : > { %v3139_v59 = vpop.f32.mrb[38].mxu0 }
 0x531   : > { %v12854_v4 = vpop.f32.mrb[39].mxu0 }
 0x534   : > { %v2911_v28 = vpop.f32.mrb[36].mxu1 }
 0x535   : > { %v12839_v8 = vpop.f32.mrb[37].mxu1  ;;  %12875 = vmatprep.mubr.msk.f32.mxu1 %vm521_vm2, %v2911_v28 }
 0x536   : > { %12876 = vmatmul.mubr.msk.f32.gmra.mrb[46].mxu1 %vm521_vm2, %v2987_v20 }
 0x538   : > { %v3063_v40 = vpop.f32.mrb[38].mxu1 }
 0x539   : > { %v12849_v18 = vpop.f32.mrb[39].mxu1  ;;  %12878 = vmatprep.mubr.msk.f32.mxu1 %vm521_vm2, %v3063_v40 }
 0x53a   : > { %12879 = vmatmul.mubr.msk.f32.gmra.mrb[48].mxu1 %vm521_vm2, %v3139_v59 }
 0x53b   : > { %12923 = vmatprep.mubr.msk.f32.mxu1 %vm14034_vm1, %v14033_v22 }
 0x53e   : > { %12924 = vmatmul.mubr.msk.f32.vlgmr.msra.gmra.mrb[50].mxu1 %vm521_vm2, %v14844_v9 }
 0x53f   : > { %12932 = vmatpush3.xpose.msk.msra.mxu1 %vm521_vm2, %v14852_v56  ;;  %12933 = vmatprep.mubr.msk.f32.mxu1 %vm14034_vm1, %v14033_v22 }
 0x540   : > { %12941 = vmatprep.subr.mxu1 %v14033_v22 }
 0x542   : > { %12934 = vmatmul.mubr.msk.f32.vlgmr.msra.gmra.mrb[52].mxu1 %vm521_vm2, %v14863_v63 }
 0x543   : > { %12942 = vmatpush3.xpose.msk.msra.mxu1 %vm521_vm2, %v14871_v3  ;;  %12943 = vmatprep.mubr.msk.f32.mxu1 %vm14034_vm1, %v14033_v22 }
 0x544   : > { %12951 = vmatprep.subr.mxu1 %v14033_v22 }
 0x546   : > { %12944 = vmatmul.mubr.msk.f32.vlgmr.msra.gmra.mrb[54].mxu1 %vm521_vm2, %v14882_v16 }
 0x547   : > { %12952 = vmatpush3.xpose.msk.msra.mxu1 %vm521_vm2, %v14890_v61  ;;  %12953 = vmatprep.mubr.msk.f32.mxu1 %vm14034_vm1, %v14033_v22 }
 0x548   : > { %12961 = vmatprep.subr.mxu1 %v14033_v22 }
 0x54a   : > { %12954 = vmatmul.mubr.msk.f32.vlgmr.msra.gmra.mrb[56].mxu1 %vm521_vm2, %v4446_v12 }
 0x54b   : > { %12962 = vmatpush3.msra.mxu1 %v4778_v27  ;;  %12963 = vmatprep.mubr.msk.f32.mxu1 %vm14034_vm1, %v14033_v22  ;;  %v15019_v27 = vpop.permute.xlu1 %4929 }
 0x54c   : > { %12971 = vmatprep.subr.mxu1 %v14033_v22 }
 0x57a   : > { %v14955_v31 = vpop.f32.mrb[40].mxu0 }
 0x57b   : > { %v3258_v2 = vpop.f32.mrb[41].mxu0 }
 0x57c   : > { %v14957_v36 = vadd.f32 %v3258_v2, %v502_v25  ;;  %v15025_v2 = vpop.permute.xlu1 %5081 }
 0x582   : > { %v14959_v5 = vpop.f32.mrb[42].mxu0 }
 0x583   : > { %v14961_v44 = vpop.f32.mrb[43].mxu0 }
 0x592   : > { %v14963_v49 = vpop.f32.mrb[44].mxu0 }
 0x593   : > { %v14965_v58 = vpop.f32.mrb[45].mxu0 }
 0x596   : > { %v14967_v53 = vpop.f32.mrb[46].mxu0 }
 0x597   : > { %v12885_v9 = vpop.f32.mrb[47].mxu0  ;;  %v4601_v10 = vsel %vm521_vm2, %v14967_v53, -inf }
 0x598   : > { %4602 = vmax.xlane.f32.xlu0 %v4601_v10 }
 0x59a   : > { %v14971_v56 = vpop.f32.mrb[48].mxu0 }
 0x59b   : > { %v12890_v17 = vpop.f32.mrb[49].mxu0  ;;  %v4604_v63 = vsel %vm521_vm2, %v14971_v56, -inf }
 0x59c   : > { %4605 = vmax.xlane.f32.xlu1 %v4604_v63  ;;  %v15031_v63 = vpop.permute.xlu0 %5005 }
 0x59e   : > { %v14975_v57 = vpop.f32.mrb[50].mxu0 }
 0x59f   : > { %v12895_v3 = vpop.f32.mrb[51].mxu0  ;;  %v4607_v7 = vsel %vm521_vm2, %v14975_v57, -inf }
 0x5a0   : > { %4608 = vmax.xlane.f32.xlu0 %v4607_v7  ;;  %v15035_v7 = vpop.permute.xlu1 %5157 }
 0x5a2   : > { %v14979_v16 = vpop.f32.mrb[52].mxu0 }
 0x5a3   : > { %v12900_v60 = vpop.f32.mrb[53].mxu0  ;;  %v4610_v61 = vsel %vm521_vm2, %v14979_v16, -inf }
 0x5a4   : > { %4611 = vmax.xlane.f32.xlu0 %v4610_v61 }
 0x5a6   : > { %v14983_v62 = vpop.f32.mrb[54].mxu0 }
 0x5a7   : > { %v12905_v12 = vpop.f32.mrb[55].mxu0  ;;  %v4613_v45 = vsel %vm521_vm2, %v14983_v62, -inf }
 0x5a8   : > { %4614 = vmax.xlane.f32.xlu1 %v4613_v45 }
 0x5aa   : > { %v14987_v13 = vpop.f32.mrb[56].mxu0 }
 0x5ab   : > { %v12910_v0 = vpop.f32.mrb[57].mxu0  ;;  %v4616_v6 = vsel %vm521_vm2, %v14987_v13, -inf }
 0x5ac   : > { %4617 = vmax.xlane.f32.xlu0 %v4616_v6  ;;  %v15043_v6 = vpop.permute.xlu0 %5233 }
 0x5ae   : > { %v14991_v15 = vpop.f32.mrb[58].mxu0 }
 0x5af   : > { %v12915_v41 = vpop.f32.mrb[59].mxu0  ;;  %v4619_v19 = vsel %vm521_vm2, %v14991_v15, -inf }
 0x5b0   : > { %4620 = vmax.xlane.f32.xlu1 %v4619_v19  ;;  %v15045_v41 = vpop.permute.xlu1 %5309  ;;  %v15047_v19 = vpop.permute.xlu0 %5385 }
 0x5b2   : > { %v14995_v14 = vpop.f32.mrb[60].mxu0 }
 0x5b3   : > { %v12920_v23 = vpop.f32.mrb[61].mxu0  ;;  %v4622_v52 = vsel %vm521_vm2, %v14995_v14, -inf }
 0x5b4   : > { %4623 = vmax.xlane.f32.xlu0 %v4622_v52  ;;  %v15049_v23 = vpop.permute.xlu1 %5461 }
 0x5b6   : > { %v14999_v1 = vpop.f32.mrb[62].mxu0 }
 0x5b7   : > { %v12930_v37 = vpop.f32.mrb[63].mxu0  ;;  %v4628_v11 = vsel %vm521_vm2, %v14999_v1, -inf }
 0x5b8   : > { %4629 = vmax.xlane.f32.xlu0 %v4628_v11 }
 0x5ba   : > { %v15003_v20 = vpop.f32.mrb[64].mxu0 }
 0x5bb   : > { %v12940_v32 = vpop.f32.mrb[65].mxu0  ;;  %v4634_v48 = vsel %vm521_vm2, %v15003_v20, -inf }
 0x5bc   : > { %4635 = vmax.xlane.f32.xlu0 %v4634_v48 }
 0x5be   : > { %v15007_v59 = vpop.f32.mrb[66].mxu0 }
 0x5bf   : > { %v12950_v4 = vpop.f32.mrb[67].mxu0  ;;  %v4640_v28 = vsel %vm521_vm2, %v15007_v59, -inf }
 0x5c0   : > { %4641 = vmax.xlane.f32.xlu0 %v4640_v28 }
 0x5c2   : > { %v15011_v8 = vpop.f32.mrb[68].mxu0 }
 0x5c3   : > { %v12960_v40 = vpop.f32.mrb[69].mxu0  ;;  %v4646_v18 = vsel %vm521_vm2, %v15011_v8, -inf }
 0x5c4   : > { %4647 = vmax.xlane.f32.xlu0 %v4646_v18 }
 0x5da   : > { %5537 = vrot.lane.b32.xlu0 %v14355_v46, %s14039_s13 }
 0x5de   : > { %5689 = vrot.lane.b32.xlu0 %v14363_v50, %s14039_s13 }
 0x611   : > { %v15021_v21 = vpop.f32.mrb[50].mxu1 }
 0x612   : > { %v12925_v24 = vpop.f32.mrb[51].mxu1  ;;  %v4625_v25 = vsel %vm521_vm2, %v15021_v21, -inf }
 0x613   : > { %4626 = vmax.xlane.f32.xlu1 %v4625_v25 }
 0x615   : > { %v15027_v9 = vpop.f32.mrb[52].mxu1 }
 0x616   : > { %v12935_v10 = vpop.f32.mrb[53].mxu1  ;;  %v4631_v17 = vsel %vm521_vm2, %v15027_v9, -inf }
 0x617   : > { %4632 = vmax.xlane.f32.xlu1 %v4631_v17 }
 0x619   : > { %v15033_v3 = vpop.f32.mrb[54].mxu1 }
 0x61a   : > { %v12945_v60 = vpop.f32.mrb[55].mxu1  ;;  %v4637_v61 = vsel %vm521_vm2, %v15033_v3, -inf }
 0x61b   : > { %4638 = vmax.xlane.f32.xlu1 %v4637_v61 }
 0x61d   : > { %v15039_v12 = vpop.f32.mrb[56].mxu1 }
 0x61e   : > { %v12955_v45 = vpop.f32.mrb[57].mxu1  ;;  %v4643_v0 = vsel %vm521_vm2, %v15039_v12, -inf }
 0x61f   : > { %4644 = vmax.xlane.f32.xlu1 %v4643_v0 }
 0x625   : > { %v4603_v52 = vpop.xlane.xlu0 %4602 }
 0x629   : > { %v4606_v37 = vpop.xlane.xlu1 %4605 }
 0x62a   : > { %v4650_v11 = vsub.f32 %v14971_v56, %v4606_v37 }
 0x62c   : > { %v4667_v32 = vmul.f32 1.442695, %v4650_v11 }
 0x62d   : > { %v4609_v48 = vpop.xlane.xlu0 %4608 }
 0x62e   : > { %13661 = vpow2.f32 %v4667_v32  ;;  %v4651_v11 = vsub.f32 %v14975_v57, %v4609_v48 }
 0x630   : > { %5613 = vrot.lane.b32.xlu1 %v14357_v47, %s14039_s13 }
 0x631   : > { %v4612_v4 = vpop.xlane.xlu0 %4611 }
 0x632   : > { %v4652_v28 = vsub.f32 %v14979_v16, %v4612_v4  ;;  %v4649_v16 = vsub.f32 %v14967_v53, %v4603_v52  ;;  %v4669_v53 = vmul.f32 1.442695, %v4651_v11 }
 0x634   : > { %5765 = vrot.lane.b32.xlu1 %v14365_v51, %s14039_s13  ;;  %v4671_v40 = vmul.f32 1.442695, %v4652_v28  ;;  %v4665_v37 = vmul.f32 1.442695, %v4649_v16 }
 0x636   : > { %13663 = vpow2.f32 %v4671_v40 }
 0x638   : > { %v15057_v18 = vpop.eup %13661 }
 0x639   : > { %v4618_v24 = vpop.xlane.xlu0 %4617  ;;  %v4700_v56 = vsel %vm521_vm2, %v15057_v18, 0.0 }
 0x63a   : > { %v4654_v25 = vsub.f32 %v14987_v13, %v4618_v24  ;;  %4701 = vadd.xlane.f32.xlu0 %v4700_v56  ;;  %v4615_v13 = vpop.xlane.xlu1 %4614 }
 0x63b   : > { %v4653_v52 = vsub.f32 %v14983_v62, %v4615_v13 }
 0x63c   : > { %v4675_v10 = vmul.f32 1.442695, %v4654_v25 }
 0x63d   : > { %v4673_v25 = vmul.f32 1.442695, %v4653_v52 }
 0x63e   : > { %13665 = vpow2.f32 %v4675_v10  ;;  %v4621_v56 = vpop.xlane.xlu1 %4620 }
 0x640   : > { %v15062_v17 = vpop.eup %13663 }
 0x641   : > { %v4624_v60 = vpop.xlane.xlu0 %4623  ;;  %v4706_v61 = vsel %vm521_vm2, %v15062_v17, 0.0 }
 0x642   : > { %v4656_v45 = vsub.f32 %v14995_v14, %v4624_v60  ;;  %4707 = vadd.xlane.f32.xlu0 %v4706_v61 }
 0x644   : > { %v4679_v0 = vmul.f32 1.442695, %v4656_v45 }
 0x645   : > { %v4630_v32 = vpop.xlane.xlu0 %4629 }
 0x646   : > { %13667 = vpow2.f32 %v4679_v0  ;;  %v4658_v4 = vsub.f32 %v14999_v1, %v4630_v32  ;;  %v4655_v1 = vsub.f32 %v14991_v15, %v4621_v56 }
 0x647   : > { %13669 = vpow2.f32 %v4665_v37 }
 0x648   : > { %v15070_v28 = vpop.eup %13665  ;;  %v4683_v40 = vmul.f32 1.442695, %v4658_v4  ;;  %v4677_v61 = vmul.f32 1.442695, %v4655_v1 }
 0x649   : > { %v4636_v24 = vpop.xlane.xlu0 %4635  ;;  %v4712_v14 = vsel %vm521_vm2, %v15070_v28, 0.0 }
 0x64a   : > { %13671 = vpow2.f32 %v4683_v40  ;;  %v4660_v57 = vsub.f32 %v15003_v20, %v4636_v24  ;;  %4713 = vadd.xlane.f32.xlu0 %v4712_v14 }
 0x64b   : > { %13673 = vpow2.f32 %v4669_v53 }
 0x64c   : > { %v4687_v48 = vmul.f32 1.442695, %v4660_v57 }
 0x64d   : > { %v4642_v10 = vpop.xlane.xlu0 %4641 }
 0x64e   : > { %13675 = vpow2.f32 %v4687_v48  ;;  %v4662_v16 = vsub.f32 %v15007_v59, %v4642_v10 }
 0x64f   : > { %13677 = vpow2.f32 %v4673_v25 }
 0x650   : > { %v15078_v60 = vpop.eup %13667  ;;  %v4691_v62 = vmul.f32 1.442695, %v4662_v16 }
 0x651   : > { %v4648_v45 = vpop.xlane.xlu0 %4647  ;;  %v4718_v0 = vsel %vm521_vm2, %v15078_v60, 0.0  ;;  %v15083_v37 = vpop.eup %13669 }
 0x652   : > { %13679 = vpow2.f32 %v4691_v62  ;;  %v4664_v20 = vsub.f32 %v15011_v8, %v4648_v45  ;;  %4719 = vadd.xlane.f32.xlu0 %v4718_v0  ;;  %v4697_v32 = vsel %vm521_vm2, %v15083_v37, 0.0 }
 0x653   : > { %13681 = vpow2.f32 %v4677_v61 }
 0x654   : > { %v15085_v15 = vpop.eup %13671  ;;  %v4695_v11 = vmul.f32 1.442695, %v4664_v20 }
 0x655   : > { %v4724_v59 = vsel %vm521_vm2, %v15085_v15, 0.0  ;;  %v15091_v13 = vpop.eup %13673 }
 0x656   : > { %13683 = vpow2.f32 %v4695_v11  ;;  %4725 = vadd.xlane.f32.xlu0 %v4724_v59  ;;  %v4703_v40 = vsel %vm521_vm2, %v15091_v13, 0.0 }
 0x658   : > { %4698 = vadd.xlane.f32.xlu1 %v4697_v32  ;;  %v15093_v4 = vpop.eup %13675 }
 0x659   : > { %v4730_v8 = vsel %vm521_vm2, %v15093_v4, 0.0  ;;  %v15099_v53 = vpop.eup %13677 }
 0x65a   : > { %4731 = vadd.xlane.f32.xlu0 %v4730_v8  ;;  %v4709_v14 = vsel %vm521_vm2, %v15099_v53, 0.0 }
 0x65c   : > { %4704 = vadd.xlane.f32.xlu1 %v4703_v40  ;;  %v15101_v52 = vpop.eup %13679 }
 0x65d   : > { %v4736_v24 = vsel %vm521_vm2, %v15101_v52, 0.0  ;;  %v15107_v56 = vpop.eup %13681 }
 0x65e   : > { %4737 = vadd.xlane.f32.xlu0 %v4736_v24  ;;  %v4715_v25 = vsel %vm521_vm2, %v15107_v56, 0.0 }
 0x660   : > { %4710 = vadd.xlane.f32.xlu1 %v4709_v14  ;;  %v15109_v57 = vpop.eup %13683 }
 0x661   : > { %v4742_v48 = vsel %vm521_vm2, %v15109_v57, 0.0 }
 0x662   : > { %4743 = vadd.xlane.f32.xlu0 %v4742_v48 }
 0x664   : > { %4716 = vadd.xlane.f32.xlu1 %v4715_v25  ;;  %v15171_v25 = vpop.permute.xlu0 %5537 }
 0x678   : > { %5841 = vrot.lane.b32.xlu0 %v14371_v54, %s14039_s13 }
 0x67c   : > { %6205 = vrot.lane.b32.xlu0 %v14317_v26, %s14040_s11 }
 0x680   : > { %6283 = vrot.lane.b32.xlu0 %v14321_v29, %s14040_s11 }
 0x684   : > { %6361 = vrot.lane.b32.xlu0 %v14323_v30, %s14040_s11 }
 0x688   : > { %6439 = vrot.lane.b32.xlu0 %v14329_v33, %s14040_s11 }
 0x68c   : > { %6517 = vrot.lane.b32.xlu0 %v14331_v34, %s14040_s11 }
 0x690   : > { %6595 = vrot.lane.b32.xlu0 %v14333_v35, %s14040_s11 }
 0x694   : > { %6673 = vrot.lane.b32.xlu0 %v14339_v38, %s14040_s11 }
 0x698   : > { %6751 = vrot.lane.b32.xlu0 %v14341_v39, %s14040_s11 }
 0x69c   : > { %6829 = vrot.lane.b32.xlu0 %v14347_v42, %s14040_s11 }
 0x6a0   : > { %v4627_v1 = vpop.xlane.xlu1 %4626  ;;  %6827 = vrot.lane.b32.xlu0 %v14347_v42, %s14041_s17 }
 0x6a1   : > { %v4657_v10 = vsub.f32 %v15021_v21, %v4627_v1  ;;  %v15173_v1 = vpop.permute.xlu0 %5689 }
 0x6a3   : > { %v4681_v16 = vmul.f32 1.442695, %v4657_v10 }
 0x6a4   : > { %v4633_v62 = vpop.xlane.xlu1 %4632  ;;  %6985 = vrot.lane.b32.xlu0 %v14355_v46, %s14040_s11 }
 0x6a5   : > { %13685 = vpow2.f32 %v4681_v16  ;;  %v4659_v61 = vsub.f32 %v15027_v9, %v4633_v62 }
 0x6a7   : > { %v4685_v45 = vmul.f32 1.442695, %v4659_v61 }
 0x6a8   : > { %v4639_v0 = vpop.xlane.xlu1 %4638  ;;  %6983 = vrot.lane.b32.xlu0 %v14355_v46, %s14041_s17 }
 0x6a9   : > { %13687 = vpow2.f32 %v4685_v45  ;;  %v4661_v20 = vsub.f32 %v15033_v3, %v4639_v0 }
 0x6ab   : > { %v4689_v21 = vmul.f32 1.442695, %v4661_v20 }
 0x6ac   : > { %v4645_v11 = vpop.xlane.xlu1 %4644  ;;  %7141 = vrot.lane.b32.xlu0 %v14363_v50, %s14040_s11 }
 0x6ad   : > { %13689 = vpow2.f32 %v4689_v21  ;;  %v4663_v59 = vsub.f32 %v15039_v12, %v4645_v11 }
 0x6af   : > { %v15147_v9 = vpop.eup %13685  ;;  %v4693_v32 = vmul.f32 1.442695, %v4663_v59 }
 0x6b0   : > { %v4721_v8 = vsel %vm521_vm2, %v15147_v9, 0.0  ;;  %7139 = vrot.lane.b32.xlu0 %v14363_v50, %s14041_s17  ;;  %v5614_v20 = vpop.permute.xlu1 %5613 }
 0x6b1   : > { %13691 = vpow2.f32 %v4693_v32  ;;  %4722 = vadd.xlane.f32.xlu1 %v4721_v8 }
 0x6b3   : > { %v15153_v3 = vpop.eup %13687 }
 0x6b4   : > { %v4727_v40 = vsel %vm521_vm2, %v15153_v3, 0.0  ;;  %7297 = vrot.lane.b32.xlu0 %v14371_v54, %s14040_s11  ;;  %v5766_v21 = vpop.permute.xlu1 %5765 }
 0x6b5   : > { %4728 = vadd.xlane.f32.xlu1 %v4727_v40 }
 0x6b7   : > { %v15159_v12 = vpop.eup %13689 }
 0x6b8   : > { %v4733_v24 = vsel %vm521_vm2, %v15159_v12, 0.0  ;;  %7295 = vrot.lane.b32.xlu0 %v14371_v54, %s14041_s17 }
 0x6b9   : > { %4734 = vadd.xlane.f32.xlu1 %v4733_v24 }
 0x6bb   : > { %v15165_v14 = vpop.eup %13691 }
 0x6bc   : > { %v4739_v48 = vsel %vm521_vm2, %v15165_v14, 0.0  ;;  %7703 = vrot.lane.b32.xlu0 %v14321_v29, %s14042_s7 }
 0x6bd   : > { %4740 = vadd.xlane.f32.xlu1 %v4739_v48 }
 0x6c7   : > { %v4702_v10 = vpop.xlane.xlu0 %4701 }
 0x6c8   : > { %13693 = vrcp.f32 %v4702_v10 }
 0x6ce   : > { %5917 = vrot.lane.b32.xlu1 %v14373_v55, %s14039_s13 }
 0x6cf   : > { %v4708_v16 = vpop.xlane.xlu0 %4707 }
 0x6d0   : > { %13695 = vrcp.f32 %v4708_v16 }
 0x6d2   : > { %6203 = vrot.lane.b32.xlu1 %v14317_v26, %s14041_s17  ;;  %v13694_v62 = vpop.eup %13693 }
 0x6d3   : > { %v4762_v61 = vmul.f32 %v13694_v62, %v15057_v18 }
 0x6d5   : > { %12969 = vmatmul.mubr.msk.f32.vlgmr.msra.gmra.mrb[70].mxu0 %vm521_vm2, %v4762_v61 }
 0x6d6   : > { %6281 = vrot.lane.b32.xlu1 %v14321_v29, %s14041_s17  ;;  %12977 = vmatpush3.msra.mxu0 %v15031_v63 }
 0x6d7   : > { %12978 = vmatprep.mubr.msk.f32.mxu0 %vm14034_vm1, %v14033_v22  ;;  %v4714_v45 = vpop.xlane.xlu0 %4713  ;;  %12986 = vmatprep.subr.mxu0 %v14033_v22 }
 0x6d8   : > { %13697 = vrcp.f32 %v4714_v45 }
 0x6da   : > { %6359 = vrot.lane.b32.xlu1 %v14323_v30, %s14041_s17  ;;  %v13696_v0 = vpop.eup %13695 }
 0x6db   : > { %v4764_v18 = vmul.f32 %v13696_v0, %v15062_v17 }
 0x6dd   : > { %12979 = vmatmul.mubr.msk.f32.vlgmr.msra.gmra.mrb[72].mxu0 %vm521_vm2, %v4764_v18 }
 0x6de   : > { %6437 = vrot.lane.b32.xlu1 %v14329_v33, %s14041_s17  ;;  %12987 = vmatpush3.msra.mxu0 %v15035_v7 }
 0x6df   : > { %12988 = vmatprep.mubr.msk.f32.mxu0 %vm14034_vm1, %v14033_v22  ;;  %v4720_v63 = vpop.xlane.xlu0 %4719  ;;  %12996 = vmatprep.subr.mxu0 %v14033_v22 }
 0x6e0   : > { %13699 = vrcp.f32 %v4720_v63 }
 0x6e2   : > { %6515 = vrot.lane.b32.xlu1 %v14331_v34, %s14041_s17  ;;  %v13698_v11 = vpop.eup %13697 }
 0x6e3   : > { %v4726_v17 = vpop.xlane.xlu0 %4725  ;;  %v4766_v59 = vmul.f32 %v13698_v11, %v15070_v28 }
 0x6e4   : > { %13701 = vrcp.f32 %v4726_v17 }
 0x6e5   : > { %v4699_v32 = vpop.xlane.xlu1 %4698  ;;  %12989 = vmatmul.mubr.msk.f32.vlgmr.msra.gmra.mrb[74].mxu0 %vm521_vm2, %v4766_v59 }
 0x6e6   : > { %13703 = vrcp.f32 %v4699_v32  ;;  %6593 = vrot.lane.b32.xlu1 %v14333_v35, %s14041_s17  ;;  %12997 = vmatpush3.msra.mxu0 %v15045_v41 }
 0x6e7   : > { %12998 = vmatprep.mubr.msk.f32.mxu0 %vm14034_vm1, %v14033_v22  ;;  %v4732_v7 = vpop.xlane.xlu0 %4731  ;;  %13006 = vmatprep.subr.mxu0 %v14033_v22 }
 0x6e8   : > { %13705 = vrcp.f32 %v4732_v7 }
 0x6e9   : > { %v4705_v8 = vpop.xlane.xlu1 %4704 }
 0x6ea   : > { %13707 = vrcp.f32 %v4705_v8  ;;  %6671 = vrot.lane.b32.xlu1 %v14339_v38, %s14041_s17  ;;  %v13700_v28 = vpop.eup %13699 }
 0x6eb   : > { %v4738_v40 = vpop.xlane.xlu0 %4737  ;;  %v4768_v24 = vmul.f32 %v13700_v28, %v15078_v60 }
 0x6ec   : > { %13709 = vrcp.f32 %v4738_v40 }
 0x6ed   : > { %v4711_v48 = vpop.xlane.xlu1 %4710  ;;  %12999 = vmatmul.mubr.msk.f32.vlgmr.msra.gmra.mrb[76].mxu0 %vm521_vm2, %v4768_v24 }
 0x6ee   : > { %13711 = vrcp.f32 %v4711_v48  ;;  %6749 = vrot.lane.b32.xlu1 %v14341_v39, %s14041_s17  ;;  %v13702_v41 = vpop.eup %13701  ;;  %13007 = vmatpush3.msra.mxu0 %v15049_v23 }
 0x6ef   : > { %13008 = vmatprep.mubr.msk.f32.mxu0 %vm14034_vm1, %v14033_v22  ;;  %13016 = vmatprep.subr.mxu0 %v14033_v22  ;;  %v4770_v16 = vmul.f32 %v13702_v41, %v15085_v15 }
 0x6f0   : > { %v13704_v10 = vpop.eup %13703 }
 0x6f1   : > { %v4717_v60 = vpop.xlane.xlu1 %4716  ;;  %v4761_v62 = vmul.f32 %v13704_v10, %v15083_v37  ;;  %13009 = vmatmul.mubr.msk.f32.vlgmr.msra.gmra.mrb[78].mxu0 %vm521_vm2, %v4770_v16 }
 0x6f2   : > { %13713 = vrcp.f32 %v4717_v60  ;;  %6907 = vrot.lane.b32.xlu1 %v14349_v43, %s14040_s11  ;;  %v13706_v61 = vpop.eup %13705  ;;  %13017 = vmatpush3.msra.mxu0 %v5614_v20 }
 0x6f3   : > { %12964 = vmatmul.mubr.msk.f32.vlgmr.msra.gmra.mrb[58].mxu1 %vm521_vm2, %v4761_v62  ;;  %13018 = vmatprep.mubr.msk.f32.mxu0 %vm14034_vm1, %v14033_v22  ;;  %v4772_v15 = vmul.f32 %v13706_v61, %v15093_v4 }
 0x6f4   : > { %v13708_v23 = vpop.eup %13707  ;;  %12972 = vmatpush3.msra.mxu1 %v15019_v27  ;;  %13026 = vmatprep.subr.mxu0 %v14033_v22 }
 0x6f5   : > { %12973 = vmatprep.mubr.msk.f32.mxu1 %vm14034_vm1, %v14033_v22  ;;  %v4763_v37 = vmul.f32 %v13708_v23, %v15091_v13  ;;  %13019 = vmatmul.mubr.msk.f32.vlgmr.msra.gmra.mrb[80].mxu0 %vm521_vm2, %v4772_v15 }
 0x6f6   : > { %12981 = vmatprep.subr.mxu1 %v14033_v22  ;;  %v13710_v45 = vpop.eup %13709  ;;  %13027 = vmatpush3.msra.mxu0 %v5766_v21 }
 0x6f7   : > { %6905 = vrot.lane.b32.xlu1 %v14349_v43, %s14041_s17  ;;  %12974 = vmatmul.mubr.msk.f32.vlgmr.msra.gmra.mrb[60].mxu1 %vm521_vm2, %v4763_v37  ;;  %v4774_v4 = vmul.f32 %v13710_v45, %v15101_v52 }
 0x6f8   : > { %v13712_v27 = vpop.eup %13711  ;;  %13028 = vmatprep.mubr.msk.f32.mxu0 %vm14034_vm1, %v14033_v22  ;;  %12982 = vmatpush3.msra.mxu1 %v15025_v2 }
 0x6f9   : > { %12983 = vmatprep.mubr.msk.f32.mxu1 %vm14034_vm1, %v14033_v22  ;;  %v4765_v13 = vmul.f32 %v13712_v27, %v15099_v53  ;;  %13029 = vmatmul.mubr.msk.f32.vlgmr.msra.gmra.mrb[82].mxu0 %vm521_vm2, %v4774_v4 }
 0x6fa   : > { %12991 = vmatprep.subr.mxu1 %v14033_v22  ;;  %13036 = vmatprep.subr.mxu0 %v14033_v22 }
 0x6fb   : > { %7063 = vrot.lane.b32.xlu1 %v14357_v47, %s14040_s11  ;;  %12984 = vmatmul.mubr.msk.f32.vlgmr.msra.gmra.mrb[62].mxu1 %vm521_vm2, %v4765_v13 }
 0x6fc   : > { %v13714_v0 = vpop.eup %13713  ;;  %13038 = vmatprep.mubr.msk.f32.mxu0 %vm14034_vm1, %v14033_v22  ;;  %12992 = vmatpush3.msra.mxu1 %v15043_v6  ;;  %v4744_v6 = vpop.xlane.xlu0 %4743 }
 0x6fd   : > { %12993 = vmatprep.mubr.msk.f32.mxu1 %vm14034_vm1, %v14033_v22  ;;  %v4767_v2 = vmul.f32 %v13714_v0, %v15107_v56  ;;  %13001 = vmatprep.subr.mxu1 %v14033_v22 }
 0x6ff   : > { %7061 = vrot.lane.b32.xlu1 %v14357_v47, %s14041_s17  ;;  %12994 = vmatmul.mubr.msk.f32.vlgmr.msra.gmra.mrb[64].mxu1 %vm521_vm2, %v4767_v2 }
 0x700   : > { %13002 = vmatpush3.msra.mxu1 %v15047_v19  ;;  %13003 = vmatprep.mubr.msk.f32.mxu1 %vm14034_vm1, %v14033_v22  ;;  %v5842_v19 = vpop.permute.xlu0 %5841 }
 0x701   : > { %13011 = vmatprep.subr.mxu1 %v14033_v22 }
 0x703   : > { %7219 = vrot.lane.b32.xlu1 %v14365_v51, %s14040_s11 }
 0x704   : > { %v6206_v53 = vpop.permute.xlu0 %6205 }
 0x707   : > { %7217 = vrot.lane.b32.xlu1 %v14365_v51, %s14041_s17 }
 0x708   : > { %v6284_v52 = vpop.permute.xlu0 %6283 }
 0x70b   : > { %7375 = vrot.lane.b32.xlu1 %v14373_v55, %s14040_s11  ;;  %s14046_s11 = smov [#allocation8]  }
 0x70c   : > { %v6362_v56 = vpop.permute.xlu0 %6361 }
 0x70f   : > { %7373 = vrot.lane.b32.xlu1 %v14373_v55, %s14041_s17  ;;  %s13960_s17 = sshll.u32 %s14046_s11, 4  ;;  %s13961_s17 = int_to_ptr.vmem [resolvable:$false] %s13960_s17 }
 0x710   : > { %v6440_v18 = vpop.permute.xlu0 %6439  ;;  %p13963_p7 = scmp.lt.s32.totalorder %s16193_s28, %s13961_s17 }
 0x713   : > { %7627 = vrot.lane.b32.xlu1 %v14317_v26, %s14042_s7 }
 0x714   : > { %v6518_v11 = vpop.permute.xlu0 %6517 }
 0x717   : > { %7779 = vrot.lane.b32.xlu1 %v14323_v30, %s14042_s7 }
 0x718   : > { %v6596_v28 = vpop.permute.xlu0 %6595 }
 0x73e   : > { %v4723_v20 = vpop.xlane.xlu1 %4722 }
 0x73f   : > { %13715 = vrcp.f32 %v4723_v20 }
 0x740   : > { %13717 = vrcp.f32 %v4744_v6 }
 0x742   : > { %v4729_v63 = vpop.xlane.xlu1 %4728 }
 0x743   : > { %13719 = vrcp.f32 %v4729_v63 }
 0x746   : > { %v4735_v21 = vpop.xlane.xlu1 %4734 }
 0x747   : > { %13721 = vrcp.f32 %v4735_v21 }
 0x749   : > { %v13716_v17 = vpop.eup %13715 }
 0x74a   : > { %v4741_v59 = vpop.xlane.xlu1 %4740  ;;  %v4769_v32 = vmul.f32 %v13716_v17, %v15147_v9  ;;  %v13718_v7 = vpop.eup %13717 }
 0x74b   : > { %13723 = vrcp.f32 %v4741_v59  ;;  %v4776_v48 = vmul.f32 %v13718_v7, %v15109_v57  ;;  %v5993_v57 = vld [vmem:[#allocation7 + $0x8] sm:$0xff] }
 0x74c   : > { %13004 = vmatmul.mubr.msk.f32.vlgmr.msra.gmra.mrb[66].mxu1 %vm521_vm2, %v4769_v32 }
 0x74d   : > { %v13720_v8 = vpop.eup %13719  ;;  %13012 = vmatpush3.msra.mxu1 %v15171_v25  ;;  %13013 = vmatprep.mubr.msk.f32.mxu1 %vm14034_vm1, %v14033_v22 }
 0x74e   : > { %v5918_v40 = vpop.permute.xlu1 %5917  ;;  %13021 = vmatprep.subr.mxu1 %v14033_v22  ;;  %v4771_v24 = vmul.f32 %v13720_v8, %v15153_v3  ;;  %v6674_v3 = vpop.permute.xlu0 %6673 }
 0x74f   : > { %13037 = vmatpush3.msra.mxu0 %v5918_v40 }
 0x750   : > { %13014 = vmatmul.mubr.msk.f32.vlgmr.msra.gmra.mrb[68].mxu1 %vm521_vm2, %v4771_v24  ;;  %13039 = vmatmul.mubr.msk.f32.vlgmr.msra.gmra.mrb[84].mxu0 %vm521_vm2, %v4776_v48 }
 0x751   : > { %v13722_v9 = vpop.eup %13721  ;;  %13022 = vmatpush3.msra.mxu1 %v15173_v1  ;;  %13023 = vmatprep.mubr.msk.f32.mxu1 %vm14034_vm1, %v14033_v22 }
 0x752   : > { %v6204_v25 = vpop.permute.xlu1 %6203  ;;  %13031 = vmatprep.subr.mxu1 %v14033_v22  ;;  %v4773_v41 = vmul.f32 %v13722_v9, %v15159_v12  ;;  %13067 = vmatprep.subr.mxu0 %v14033_v22  ;;  %v6752_v12 = vpop.permute.xlu0 %6751 }
 0x753   : > { %13069 = vmatprep.mubr.msk.f32.mxu0 %vm14034_vm1, %v14033_v22 }
 0x754   : > { %13024 = vmatmul.mubr.msk.f32.vlgmr.msra.gmra.mrb[70].mxu1 %vm521_vm2, %v4773_v41 }
 0x755   : > { %v13724_v10 = vpop.eup %13723  ;;  %13032 = vmatpush3.msra.mxu1 %v5842_v19  ;;  %13033 = vmatprep.mubr.msk.f32.mxu1 %vm14034_vm1, %v14033_v22 }
 0x756   : > { %v6282_v1 = vpop.permute.xlu1 %6281  ;;  %13068 = vmatpush3.xpose.msk.msra.mxu0 %vm521_vm2, %v6206_v53  ;;  %v4775_v16 = vmul.f32 %v13724_v10, %v15165_v14  ;;  %13041 = vmatprep.subr.mxu1 %v5993_v57  ;;  %v15310_v62 = vpop.permute.xlu0 %6829 }
 0x757   : > { %13072 = vmatprep.subr.mxu0 %v14033_v22 }
 0x758   : > { %13034 = vmatmul.mubr.msk.f32.vlgmr.msra.gmra.mrb[72].mxu1 %vm521_vm2, %v4775_v16 }
 0x759   : > { %13070 = vmatmul.mubr.msk.f32.vlgmr.msra.gmra.mrb[86].mxu0 %vm521_vm2, %v6204_v25  ;;  %13042 = vmatpush3.msra.mxu1 %v5993_v57 }
 0x75a   : > { %v6360_v60 = vpop.permute.xlu1 %6359  ;;  %13073 = vmatpush3.xpose.msk.msra.mxu0 %vm521_vm2, %v6284_v52  ;;  %13074 = vmatprep.mubr.msk.f32.mxu0 %vm14034_vm1, %v14033_v22  ;;  %v15318_v23 = vpop.permute.xlu0 %6827 }
 0x75b   : > { %13077 = vmatprep.subr.mxu0 %v14033_v22  ;;  %13107 = vmatprep.subr.mxu1 %v14033_v22 }
 0x75d   : > { %13075 = vmatmul.mubr.msk.f32.vlgmr.msra.gmra.mrb[88].mxu0 %vm521_vm2, %v6282_v1 }
 0x75e   : > { %v6438_v14 = vpop.permute.xlu1 %6437  ;;  %13078 = vmatpush3.xpose.msk.msra.mxu0 %vm521_vm2, %v6362_v56  ;;  %13079 = vmatprep.mubr.msk.f32.mxu0 %vm14034_vm1, %v14033_v22  ;;  %v15329_v45 = vpop.permute.xlu0 %6985 }
 0x75f   : > { %13082 = vmatprep.subr.mxu0 %v14033_v22 }
 0x761   : > { %13080 = vmatmul.mubr.msk.f32.vlgmr.msra.gmra.mrb[90].mxu0 %vm521_vm2, %v6360_v60 }
 0x762   : > { %v6516_v61 = vpop.permute.xlu1 %6515  ;;  %13083 = vmatpush3.xpose.msk.msra.mxu0 %vm521_vm2, %v6440_v18  ;;  %13084 = vmatprep.mubr.msk.f32.mxu0 %vm14034_vm1, %v14033_v22  ;;  %v15337_v4 = vpop.permute.xlu0 %6983 }
 0x763   : > { %13087 = vmatprep.subr.mxu0 %v14033_v22 }
 0x765   : > { %13085 = vmatmul.mubr.msk.f32.vlgmr.msra.gmra.mrb[92].mxu0 %vm521_vm2, %v6438_v14 }
 0x766   : > { %v6594_v15 = vpop.permute.xlu1 %6593  ;;  %13088 = vmatpush3.xpose.msk.msra.mxu0 %vm521_vm2, %v6518_v11  ;;  %13089 = vmatprep.mubr.msk.f32.mxu0 %vm14034_vm1, %v14033_v22  ;;  %v15348_v2 = vpop.permute.xlu0 %7141 }
 0x767   : > { %13092 = vmatprep.subr.mxu0 %v14033_v22 }
 0x769   : > { %13090 = vmatmul.mubr.msk.f32.vlgmr.msra.gmra.mrb[94].mxu0 %vm521_vm2, %v6516_v61 }
 0x76a   : > { %v6672_v37 = vpop.permute.xlu1 %6671  ;;  %13093 = vmatpush3.xpose.msk.msra.mxu0 %vm521_vm2, %v6596_v28  ;;  %13094 = vmatprep.mubr.msk.f32.mxu0 %vm14034_vm1, %v14033_v22  ;;  %v15356_v19 = vpop.permute.xlu0 %7139 }
 0x76b   : > { %13097 = vmatprep.subr.mxu0 %v14033_v22 }
 0x76d   : > { %13095 = vmatmul.mubr.msk.f32.vlgmr.msra.gmra.mrb[96].mxu0 %vm521_vm2, %v6594_v15 }
 0x76e   : > { %v6750_v27 = vpop.permute.xlu1 %6749  ;;  %13098 = vmatpush3.xpose.msk.msra.mxu0 %vm521_vm2, %v6674_v3  ;;  %13099 = vmatprep.mubr.msk.f32.mxu0 %vm14034_vm1, %v14033_v22  ;;  %v15361_v56 = vpop.permute.xlu0 %7297 }
 0x76f   : > { %13102 = vmatprep.subr.mxu0 %v14033_v22 }
 0x771   : > { %13100 = vmatmul.mubr.msk.f32.vlgmr.msra.gmra.mrb[98].mxu0 %vm521_vm2, %v6672_v37 }
 0x772   : > { %v6908_v13 = vpop.permute.xlu1 %6907  ;;  %13103 = vmatpush3.xpose.msk.msra.mxu0 %vm521_vm2, %v6752_v12  ;;  %13104 = vmatprep.mubr.msk.f32.mxu0 %vm14034_vm1, %v14033_v22  ;;  %v15368_v18 = vpop.permute.xlu0 %7295 }
 0x773   : > { %13112 = vmatprep.subr.mxu0 %v14033_v22 }
 0x775   : > { %13105 = vmatmul.mubr.msk.f32.vlgmr.msra.gmra.mrb[100].mxu0 %vm521_vm2, %v6750_v27 }
 0x776   : > { %v6906_v0 = vpop.permute.xlu1 %6905  ;;  %13113 = vmatpush3.xpose.msk.msra.mxu0 %vm521_vm2, %v6908_v13  ;;  %13114 = vmatprep.mubr.msk.f32.mxu0 %vm14034_vm1, %v14033_v22  ;;  %v7704_v11 = vpop.permute.xlu0 %7703 }
 0x777   : > { %13122 = vmatprep.subr.mxu0 %v14033_v22 }
 0x779   : > { %13115 = vmatmul.mubr.msk.f32.vlgmr.msra.gmra.mrb[102].mxu0 %vm521_vm2, %v6906_v0 }
 0x77a   : > { %v7064_v6 = vpop.permute.xlu1 %7063  ;;  %13124 = vmatprep.mubr.msk.f32.mxu0 %vm14034_vm1, %v14033_v22 }
 0x77b   : > { %13123 = vmatpush3.xpose.msk.msra.mxu0 %vm521_vm2, %v7064_v6 }
 0x77c   : > { %13132 = vmatprep.subr.mxu0 %v14033_v22 }
 0x77e   : > { %v7062_v53 = vpop.permute.xlu1 %7061 }
 0x77f   : > { %13125 = vmatmul.mubr.msk.f32.vlgmr.msra.gmra.mrb[104].mxu0 %vm521_vm2, %v7062_v53 }
 0x780   : > { %13134 = vmatprep.mubr.msk.f32.mxu0 %vm14034_vm1, %v14033_v22 }
 0x782   : > { %v7220_v52 = vpop.permute.xlu1 %7219 }
 0x783   : > { %13133 = vmatpush3.xpose.msk.msra.mxu0 %vm521_vm2, %v7220_v52 }
 0x784   : > { %13142 = vmatprep.subr.mxu0 %v14033_v22 }
 0x786   : > { %v7218_v20 = vpop.permute.xlu1 %7217 }
 0x787   : > { %13135 = vmatmul.mubr.msk.f32.vlgmr.msra.gmra.mrb[106].mxu0 %vm521_vm2, %v7218_v20 }
 0x788   : > { %13144 = vmatprep.mubr.msk.f32.mxu0 %vm14034_vm1, %v14033_v22 }
 0x78a   : > { %v7376_v63 = vpop.permute.xlu1 %7375 }
 0x78b   : > { %13143 = vmatpush3.xpose.msk.msra.mxu0 %vm521_vm2, %v7376_v63 }
 0x78c   : > { %13152 = vmatprep.subr.mxu0 %v14033_v22 }
 0x78e   : > { %v7374_v21 = vpop.permute.xlu1 %7373 }
 0x78f   : > { %13145 = vmatmul.mubr.msk.f32.vlgmr.msra.gmra.mrb[108].mxu0 %vm521_vm2, %v7374_v21 }
 0x790   : > { %13153 = vmatpush3.msra.mxu0 %v7704_v11  ;;  %13154 = vmatprep.mubr.msk.f32.mxu0 %vm14034_vm1, %v14033_v22 }
 0x791   : > { %13162 = vmatprep.subr.mxu0 %v14033_v22 }
 0x7a8   : > { %v4925_v17 = vpop.f32.mrb[70].mxu0 }
 0x7a9   : > { %v12970_v59 = vpop.f32.mrb[71].mxu0 }
 0x7b0   : > { %v5077_v32 = vpop.f32.mrb[72].mxu0 }
 0x7b1   : > { %v12980_v7 = vpop.f32.mrb[73].mxu0 }
 0x7b8   : > { %v5229_v8 = vpop.f32.mrb[74].mxu0 }
 0x7b9   : > { %v12990_v28 = vpop.f32.mrb[75].mxu0 }
 0x7c0   : > { %v5381_v40 = vpop.f32.mrb[76].mxu0 }
 0x7c1   : > { %v13000_v24 = vpop.f32.mrb[77].mxu0 }
 0x7c2   : > { %v7628_v24 = vpop.permute.xlu1 %7627 }
 0x7c4   : > { %v5533_v48 = vpop.f32.mrb[78].mxu0 }
 0x7c5   : > { %v13010_v9 = vpop.f32.mrb[79].mxu0 }
 0x7c6   : > { %v4849_v25 = vpop.f32.mrb[58].mxu1 }
 0x7c7   : > { %v12965_v41 = vpop.f32.mrb[59].mxu1  ;;  %13043 = vmatprep.mubr.msk.f32.mxu1 %vm521_vm2, %v4849_v25 }
 0x7c8   : > { %13044 = vmatmul.mubr.msk.f32.vlgmr.msra.gmra.mrb[74].mxu1 %vm521_vm2, %v4925_v17  ;;  %v5685_v3 = vpop.f32.mrb[80].mxu0 }
 0x7c9   : > { %13108 = vmatpush3.xpose.msk.msra.mxu1 %vm521_vm2, %v15310_v62  ;;  %v13020_v57 = vpop.f32.mrb[81].mxu0 }
 0x7ca   : > { %13117 = vmatprep.subr.mxu1 %v14033_v22  ;;  %v5001_v10 = vpop.f32.mrb[60].mxu1 }
 0x7cb   : > { %v12975_v1 = vpop.f32.mrb[61].mxu1  ;;  %13046 = vmatprep.mubr.msk.f32.mxu1 %vm521_vm2, %v5001_v10 }
 0x7cc   : > { %v5837_v16 = vpop.f32.mrb[82].mxu0  ;;  %13047 = vmatmul.mubr.msk.f32.gmra.mrb[76].mxu1 %vm521_vm2, %v5077_v32 }
 0x7cd   : > { %v13030_v12 = vpop.f32.mrb[83].mxu0 }
 0x7ce   : > { %v5153_v60 = vpop.f32.mrb[62].mxu1 }
 0x7cf   : > { %v12985_v14 = vpop.f32.mrb[63].mxu1  ;;  %13049 = vmatprep.mubr.msk.f32.mxu1 %vm521_vm2, %v5153_v60 }
 0x7d0   : > { %13050 = vmatmul.mubr.msk.f32.gmra.mrb[78].mxu1 %vm521_vm2, %v5229_v8 }
 0x7d2   : > { %v5305_v61 = vpop.f32.mrb[64].mxu1 }
 0x7d3   : > { %v12995_v15 = vpop.f32.mrb[65].mxu1  ;;  %13052 = vmatprep.mubr.msk.f32.mxu1 %vm521_vm2, %v5305_v61 }
 0x7d4   : > { %13053 = vmatmul.mubr.msk.f32.gmra.mrb[40].mxu1 %vm521_vm2, %v5381_v40 }
 0x81f   : > { %v5457_v62 = vpop.f32.mrb[66].mxu1 }
 0x820   : > { %v13005_v37 = vpop.f32.mrb[67].mxu1  ;;  %13055 = vmatprep.mubr.msk.f32.mxu1 %vm521_vm2, %v5457_v62 }
 0x821   : > { %13056 = vmatmul.mubr.msk.f32.gmra.mrb[42].mxu1 %vm521_vm2, %v5533_v48 }
 0x823   : > { %v5609_v27 = vpop.f32.mrb[68].mxu1  ;;  %v5989_v13 = vpop.f32.mrb[84].mxu0 }
 0x824   : > { %v13015_v0 = vpop.f32.mrb[69].mxu1  ;;  %v13040_v6 = vpop.f32.mrb[85].mxu0  ;;  %13058 = vmatprep.mubr.msk.f32.mxu1 %vm521_vm2, %v5609_v27 }
 0x825   : > { %13059 = vmatmul.mubr.msk.f32.gmra.mrb[44].mxu1 %vm521_vm2, %v5685_v3 }
 0x827   : > { %v5761_v53 = vpop.f32.mrb[70].mxu1 }
 0x828   : > { %v13025_v52 = vpop.f32.mrb[71].mxu1  ;;  %13061 = vmatprep.mubr.msk.f32.mxu1 %vm521_vm2, %v5761_v53  ;;  %v15469_v53 = vpop.permute.xlu1 %7779 }
 0x829   : > { %13062 = vmatmul.mubr.msk.f32.gmra.mrb[46].mxu1 %vm521_vm2, %v5837_v16 }
 0x82b   : > { %v5913_v20 = vpop.f32.mrb[72].mxu1 }
 0x82c   : > { %v13035_v63 = vpop.f32.mrb[73].mxu1  ;;  %13064 = vmatprep.mubr.msk.f32.mxu1 %vm521_vm2, %v5913_v20  ;;  %v15394_v21 = vpop.f32.mrb[86].mxu0 }
 0x82d   : > { %13065 = vmatmul.mubr.msk.f32.gmra.mrb[48].mxu1 %vm521_vm2, %v5989_v13  ;;  %v13071_v11 = vpop.f32.mrb[87].mxu0  ;;  %v7451_v17 = vsel %vm521_vm2, %v15394_v21, -inf }
 0x82e   : > { %7452 = vmax.xlane.f32.xlu0 %v7451_v17  ;;  %13109 = vmatprep.mubr.msk.f32.mxu1 %vm14034_vm1, %v14033_v22 }
 0x830   : > { %v15401_v59 = vpop.f32.mrb[88].mxu0 }
 0x831   : > { %v13076_v32 = vpop.f32.mrb[89].mxu0  ;;  %13110 = vmatmul.mubr.msk.f32.vlgmr.msra.gmra.mrb[80].mxu1 %vm521_vm2, %v15318_v23  ;;  %v7454_v7 = vsel %vm521_vm2, %v15401_v59, -inf }
 0x832   : > { %13118 = vmatpush3.xpose.msk.msra.mxu1 %vm521_vm2, %v15329_v45  ;;  %7455 = vmax.xlane.f32.xlu1 %v7454_v7 }
 0x833   : > { %13119 = vmatprep.mubr.msk.f32.mxu1 %vm14034_vm1, %v14033_v22  ;;  %13127 = vmatprep.subr.mxu1 %v14033_v22 }
 0x834   : > { %v15412_v8 = vpop.f32.mrb[90].mxu0 }
 0x835   : > { %v13081_v28 = vpop.f32.mrb[91].mxu0  ;;  %13120 = vmatmul.mubr.msk.f32.vlgmr.msra.gmra.mrb[82].mxu1 %vm521_vm2, %v15337_v4  ;;  %v7457_v23 = vsel %vm521_vm2, %v15412_v8, -inf }
 0x836   : > { %13128 = vmatpush3.xpose.msk.msra.mxu1 %vm521_vm2, %v15348_v2  ;;  %7458 = vmax.xlane.f32.xlu0 %v7457_v23 }
 0x837   : > { %13129 = vmatprep.mubr.msk.f32.mxu1 %vm14034_vm1, %v14033_v22  ;;  %13137 = vmatprep.subr.mxu1 %v14033_v22 }
 0x838   : > { %v15423_v45 = vpop.f32.mrb[92].mxu0 }
 0x839   : > { %v13086_v40 = vpop.f32.mrb[93].mxu0  ;;  %13130 = vmatmul.mubr.msk.f32.vlgmr.msra.gmra.mrb[84].mxu1 %vm521_vm2, %v15356_v19  ;;  %v7460_v4 = vsel %vm521_vm2, %v15423_v45, -inf }
 0x83a   : > { %13138 = vmatpush3.xpose.msk.msra.mxu1 %vm521_vm2, %v15361_v56  ;;  %7461 = vmax.xlane.f32.xlu0 %v7460_v4 }
 0x83b   : > { %13139 = vmatprep.mubr.msk.f32.mxu1 %vm14034_vm1, %v14033_v22  ;;  %13147 = vmatprep.subr.mxu1 %v14033_v22 }
 0x83c   : > { %v6589_v2 = vpop.f32.mrb[94].mxu0 }
 0x83d   : > { %v13091_v48 = vpop.f32.mrb[95].mxu0  ;;  %13140 = vmatmul.mubr.msk.f32.vlgmr.msra.gmra.mrb[86].mxu1 %vm521_vm2, %v15368_v18  ;;  %v7463_v19 = vsel %vm521_vm2, %v6589_v2, -inf }
 0x83e   : > { %13148 = vmatpush3.msra.mxu1 %v7628_v24  ;;  %7464 = vmax.xlane.f32.xlu1 %v7463_v19 }
 0x83f   : > { %13149 = vmatprep.mubr.msk.f32.mxu1 %vm14034_vm1, %v14033_v22  ;;  %13157 = vmatprep.subr.mxu1 %v14033_v22 }
 0x840   : > { %v6667_v56 = vpop.f32.mrb[96].mxu0 }
 0x841   : > { %v13096_v9 = vpop.f32.mrb[97].mxu0  ;;  %v7466_v25 = vsel %vm521_vm2, %v6667_v56, -inf }
 0x842   : > { %7467 = vmax.xlane.f32.xlu0 %v7466_v25 }
 0x844   : > { %v15441_v41 = vpop.f32.mrb[98].mxu0 }
 0x845   : > { %v13101_v3 = vpop.f32.mrb[99].mxu0  ;;  %v7469_v18 = vsel %vm521_vm2, %v15441_v41, -inf }
 0x846   : > { %7470 = vmax.xlane.f32.xlu1 %v7469_v18 }
 0x848   : > { %v15445_v57 = vpop.f32.mrb[100].mxu0 }
 0x849   : > { %v13106_v10 = vpop.f32.mrb[101].mxu0  ;;  %v7472_v1 = vsel %vm521_vm2, %v15445_v57, -inf }
 0x84a   : > { %7473 = vmax.xlane.f32.xlu0 %v7472_v1 }
 0x84c   : > { %v15449_v16 = vpop.f32.mrb[102].mxu0 }
 0x84d   : > { %v13116_v12 = vpop.f32.mrb[103].mxu0  ;;  %v7478_v60 = vsel %vm521_vm2, %v15449_v16, -inf }
 0x84e   : > { %7479 = vmax.xlane.f32.xlu0 %v7478_v60 }
 0x852   : > { %v15453_v14 = vpop.f32.mrb[104].mxu0 }
 0x853   : > { %v13126_v61 = vpop.f32.mrb[105].mxu0  ;;  %v7484_v15 = vsel %vm521_vm2, %v15453_v14, -inf }
 0x854   : > { %7485 = vmax.xlane.f32.xlu0 %v7484_v15 }
 0x857   : > { %7931 = vrot.lane.b32.xlu1 %v14331_v34, %s14042_s7 }
 0x85a   : > { %v15459_v62 = vpop.f32.mrb[106].mxu0 }
 0x85b   : > { %v13136_v37 = vpop.f32.mrb[107].mxu0  ;;  %v7490_v27 = vsel %vm521_vm2, %v15459_v62, -inf }
 0x85c   : > { %7491 = vmax.xlane.f32.xlu0 %v7490_v27 }
 0x862   : > { %v15463_v13 = vpop.f32.mrb[108].mxu0 }
 0x863   : > { %v13146_v0 = vpop.f32.mrb[109].mxu0  ;;  %v7496_v6 = vsel %vm521_vm2, %v15463_v13, -inf }
 0x864   : > { %7497 = vmax.xlane.f32.xlu0 %v7496_v6 }
 0x87a   : > { %7855 = vrot.lane.b32.xlu0 %v14329_v33, %s14042_s7 }
 0x8bb   : > { %v7453_v52 = vpop.xlane.xlu0 %7452 }
 0x8bc   : > { %v7499_v20 = vsub.f32 %v15394_v21, %v7453_v52 }
 0x8be   : > { %v7515_v63 = vmul.f32 1.442695, %v7499_v20 }
 0x8bf   : > { %v7456_v11 = vpop.xlane.xlu1 %7455 }
 0x8c0   : > { %13725 = vpow2.f32 %v7515_v63  ;;  %v7500_v17 = vsub.f32 %v15401_v59, %v7456_v11 }
 0x8c2   : > { %v7517_v32 = vmul.f32 1.442695, %v7500_v17 }
 0x8c3   : > { %v7459_v7 = vpop.xlane.xlu0 %7458 }
 0x8c4   : > { %13727 = vpow2.f32 %v7517_v32  ;;  %v7501_v28 = vsub.f32 %v15412_v8, %v7459_v7 }
 0x8c6   : > { %v7519_v23 = vmul.f32 1.442695, %v7501_v28 }
 0x8c7   : > { %v7462_v40 = vpop.xlane.xlu0 %7461 }
 0x8c8   : > { %13729 = vpow2.f32 %v7519_v23  ;;  %v7502_v4 = vsub.f32 %v15423_v45, %v7462_v40 }
 0x8ca   : > { %v15475_v24 = vpop.eup %13725  ;;  %v7521_v48 = vmul.f32 1.442695, %v7502_v4 }
 0x8cb   : > { %v7465_v19 = vpop.xlane.xlu1 %7464  ;;  %v7547_v21 = vsel %vm521_vm2, %v15475_v24, 0.0 }
 0x8cc   : > { %13731 = vpow2.f32 %v7521_v48  ;;  %v7503_v9 = vsub.f32 %v6589_v2, %v7465_v19  ;;  %7548 = vadd.xlane.f32.xlu1 %v7547_v21 }
 0x8ce   : > { %v15479_v59 = vpop.eup %13727  ;;  %v7523_v25 = vmul.f32 1.442695, %v7503_v9 }
 0x8cf   : > { %v7468_v3 = vpop.xlane.xlu0 %7467  ;;  %v7550_v8 = vsel %vm521_vm2, %v15479_v59, 0.0 }
 0x8d0   : > { %13733 = vpow2.f32 %v7523_v25  ;;  %v7504_v18 = vsub.f32 %v6667_v56, %v7468_v3  ;;  %7551 = vadd.xlane.f32.xlu0 %v7550_v8 }
 0x8d2   : > { %v15483_v45 = vpop.eup %13729  ;;  %v7525_v10 = vmul.f32 1.442695, %v7504_v18 }
 0x8d3   : > { %v7471_v1 = vpop.xlane.xlu1 %7470  ;;  %v7553_v12 = vsel %vm521_vm2, %v15483_v45, 0.0 }
 0x8d4   : > { %13735 = vpow2.f32 %v7525_v10  ;;  %v7505_v2 = vsub.f32 %v15441_v41, %v7471_v1  ;;  %7554 = vadd.xlane.f32.xlu1 %v7553_v12 }
 0x8d6   : > { %v15488_v60 = vpop.eup %13731  ;;  %v7527_v61 = vmul.f32 1.442695, %v7505_v2 }
 0x8d7   : > { %v7474_v15 = vpop.xlane.xlu0 %7473  ;;  %v7556_v37 = vsel %vm521_vm2, %v15488_v60, 0.0 }
 0x8d8   : > { %13737 = vpow2.f32 %v7527_v61  ;;  %v7506_v56 = vsub.f32 %v15445_v57, %v7474_v15  ;;  %7557 = vadd.xlane.f32.xlu0 %v7556_v37 }
 0x8da   : > { %v15493_v27 = vpop.eup %13733  ;;  %v7529_v0 = vmul.f32 1.442695, %v7506_v56 }
 0x8db   : > { %v7480_v6 = vpop.xlane.xlu0 %7479  ;;  %v7559_v52 = vsel %vm521_vm2, %v15493_v27, 0.0 }
 0x8dc   : > { %13739 = vpow2.f32 %v7529_v0  ;;  %v7508_v41 = vsub.f32 %v15449_v16, %v7480_v6  ;;  %7560 = vadd.xlane.f32.xlu1 %v7559_v52 }
 0x8de   : > { %v15498_v20 = vpop.eup %13735  ;;  %v7533_v63 = vmul.f32 1.442695, %v7508_v41 }
 0x8df   : > { %v7562_v11 = vsel %vm521_vm2, %v15498_v20, 0.0 }
 0x8e0   : > { %13741 = vpow2.f32 %v7533_v63  ;;  %7563 = vadd.xlane.f32.xlu0 %v7562_v11  ;;  %v7932_v11 = vpop.permute.xlu1 %7931 }
 0x8e1   : > { %v7486_v57 = vpop.xlane.xlu0 %7485 }
 0x8e2   : > { %v15502_v17 = vpop.eup %13737  ;;  %v7510_v32 = vsub.f32 %v15453_v14, %v7486_v57 }
 0x8e3   : > { %v7565_v7 = vsel %vm521_vm2, %v15502_v17, 0.0 }
 0x8e4   : > { %v7537_v28 = vmul.f32 1.442695, %v7510_v32  ;;  %7566 = vadd.xlane.f32.xlu1 %v7565_v7 }
 0x8e6   : > { %v15507_v16 = vpop.eup %13739  ;;  %13743 = vpow2.f32 %v7537_v28 }
 0x8e7   : > { %v7568_v23 = vsel %vm521_vm2, %v15507_v16, 0.0 }
 0x8e8   : > { %7569 = vadd.xlane.f32.xlu0 %v7568_v23 }
 0x8e9   : > { %v7492_v40 = vpop.xlane.xlu0 %7491 }
 0x8ea   : > { %v15511_v4 = vpop.eup %13741  ;;  %v7512_v48 = vsub.f32 %v15459_v62, %v7492_v40 }
 0x8eb   : > { %v7574_v14 = vsel %vm521_vm2, %v15511_v4, 0.0 }
 0x8ec   : > { %v7541_v19 = vmul.f32 1.442695, %v7512_v48  ;;  %7575 = vadd.xlane.f32.xlu0 %v7574_v14 }
 0x8ee   : > { %13745 = vpow2.f32 %v7541_v19 }
 0x8f0   : > { %v15516_v21 = vpop.eup %13743 }
 0x8f1   : > { %v7498_v9 = vpop.xlane.xlu0 %7497  ;;  %v7580_v25 = vsel %vm521_vm2, %v15516_v21, 0.0 }
 0x8f2   : > { %v7514_v3 = vsub.f32 %v15463_v13, %v7498_v9  ;;  %7581 = vadd.xlane.f32.xlu0 %v7580_v25 }
 0x8f4   : > { %v7545_v8 = vmul.f32 1.442695, %v7514_v3 }
 0x8f5   : > { %v7856_v57 = vpop.permute.xlu0 %7855 }
 0x8f6   : > { %13747 = vpow2.f32 %v7545_v8 }
 0x8f8   : > { %v15521_v18 = vpop.eup %13745 }
 0x8f9   : > { %v7586_v62 = vsel %vm521_vm2, %v15521_v18, 0.0 }
 0x8fa   : > { %7587 = vadd.xlane.f32.xlu0 %v7586_v62 }
 0x900   : > { %v15525_v10 = vpop.eup %13747 }
 0x901   : > { %v7592_v1 = vsel %vm521_vm2, %v15525_v10, 0.0 }
 0x902   : > { %7593 = vadd.xlane.f32.xlu0 %v7592_v1 }
 0x904   : > { %v15529_v12 = vpop.f32.mrb[80].mxu1 }
 0x905   : > { %v13111_v2 = vpop.f32.mrb[81].mxu1  ;;  %v7475_v13 = vsel %vm521_vm2, %v15529_v12, -inf }
 0x906   : > { %7476 = vmax.xlane.f32.xlu1 %v7475_v13 }
 0x908   : > { %v15533_v61 = vpop.f32.mrb[82].mxu1 }
 0x909   : > { %v13121_v15 = vpop.f32.mrb[83].mxu1  ;;  %v7481_v37 = vsel %vm521_vm2, %v15533_v61, -inf }
 0x90a   : > { %7482 = vmax.xlane.f32.xlu1 %v7481_v37 }
 0x90c   : > { %v15537_v56 = vpop.f32.mrb[84].mxu1 }
 0x90d   : > { %v13131_v0 = vpop.f32.mrb[85].mxu1  ;;  %v7487_v6 = vsel %vm521_vm2, %v15537_v56, -inf }
 0x90e   : > { %7488 = vmax.xlane.f32.xlu1 %v7487_v6 }
 0x910   : > { %v15541_v52 = vpop.f32.mrb[86].mxu1 }
 0x911   : > { %v13141_v41 = vpop.f32.mrb[87].mxu1  ;;  %v7493_v63 = vsel %vm521_vm2, %v15541_v52, -inf }
 0x912   : > { %7494 = vmax.xlane.f32.xlu1 %v7493_v63 }
 0x918   : > { %8083 = vrot.lane.b32.xlu0 %v14339_v38, %s14042_s7 }
 0x91c   : > { %8235 = vrot.lane.b32.xlu0 %v14347_v42, %s14042_s7 }
 0x920   : > { %8387 = vrot.lane.b32.xlu0 %v14355_v46, %s14042_s7 }
 0x923   : > { %8007 = vrot.lane.b32.xlu1 %v14333_v35, %s14042_s7 }
 0x924   : > { %8539 = vrot.lane.b32.xlu0 %v14363_v50, %s14042_s7 }
 0x927   : > { %8159 = vrot.lane.b32.xlu1 %v14341_v39, %s14042_s7 }
 0x928   : > { %8691 = vrot.lane.b32.xlu0 %v14371_v54, %s14042_s7 }
 0x92b   : > { %8311 = vrot.lane.b32.xlu1 %v14349_v43, %s14042_s7 }
 0x92c   : > { %9055 = vrot.lane.b32.xlu0 %v14317_v26, %s14043_s8 }
 0x92f   : > { %8463 = vrot.lane.b32.xlu1 %v14357_v47, %s14042_s7 }
 0x930   : > { %9133 = vrot.lane.b32.xlu0 %v14321_v29, %s14043_s8 }
 0x933   : > { %8615 = vrot.lane.b32.xlu1 %v14365_v51, %s14042_s7 }
 0x934   : > { %9211 = vrot.lane.b32.xlu0 %v14323_v30, %s14043_s8 }
 0x938   : > { %9289 = vrot.lane.b32.xlu0 %v14329_v33, %s14043_s8 }
 0x93c   : > { %9367 = vrot.lane.b32.xlu0 %v14331_v34, %s14043_s8 }
 0x940   : > { %9445 = vrot.lane.b32.xlu0 %v14333_v35, %s14043_s8 }
 0x944   : > { %9523 = vrot.lane.b32.xlu0 %v14339_v38, %s14043_s8 }
 0x948   : > { %9601 = vrot.lane.b32.xlu0 %v14341_v39, %s14043_s8 }
 0x94c   : > { %9679 = vrot.lane.b32.xlu0 %v14347_v42, %s14043_s8 }
 0x950   : > { %9677 = vrot.lane.b32.xlu0 %v14347_v42, %s14044_s24 }
 0x954   : > { %9835 = vrot.lane.b32.xlu0 %v14355_v46, %s14043_s8 }
 0x958   : > { %9833 = vrot.lane.b32.xlu0 %v14355_v46, %s14044_s24 }
 0x959   : > { %v7549_v32 = vpop.xlane.xlu1 %7548 }
 0x95a   : > { %13749 = vrcp.f32 %v7549_v32 }
 0x95c   : > { %9991 = vrot.lane.b32.xlu0 %v14363_v50, %s14043_s8 }
 0x95d   : > { %v7552_v7 = vpop.xlane.xlu0 %7551 }
 0x95e   : > { %13751 = vrcp.f32 %v7552_v7 }
 0x960   : > { %9989 = vrot.lane.b32.xlu0 %v14363_v50, %s14044_s24 }
 0x961   : > { %v7555_v28 = vpop.xlane.xlu1 %7554 }
 0x962   : > { %13753 = vrcp.f32 %v7555_v28 }
 0x964   : > { %v13750_v23 = vpop.eup %13749  ;;  %10147 = vrot.lane.b32.xlu0 %v14371_v54, %s14043_s8 }
 0x965   : > { %v7558_v40 = vpop.xlane.xlu0 %7557  ;;  %v7611_v48 = vmul.f32 %v13750_v23, %v15475_v24 }
 0x966   : > { %13755 = vrcp.f32 %v7558_v40 }
 0x967   : > { %13150 = vmatmul.mubr.msk.f32.vlgmr.msra.gmra.mrb[88].mxu1 %vm521_vm2, %v7611_v48 }
 0x968   : > { %v13752_v14 = vpop.eup %13751  ;;  %13158 = vmatpush3.msra.mxu1 %v15469_v53  ;;  %10145 = vrot.lane.b32.xlu0 %v14371_v54, %s14044_s24 }
 0x969   : > { %v7561_v19 = vpop.xlane.xlu1 %7560  ;;  %v7612_v9 = vmul.f32 %v13752_v14, %v15479_v59  ;;  %13159 = vmatprep.mubr.msk.f32.mxu1 %vm14034_vm1, %v14033_v22  ;;  %13167 = vmatprep.subr.mxu1 %v14033_v22 }
 0x96a   : > { %13757 = vrcp.f32 %v7561_v19 }
 0x96b   : > { %13155 = vmatmul.mubr.msk.f32.vlgmr.msra.gmra.mrb[110].mxu0 %vm521_vm2, %v7612_v9 }
 0x96c   : > { %v13754_v24 = vpop.eup %13753  ;;  %13163 = vmatpush3.msra.mxu0 %v7856_v57  ;;  %10553 = vrot.lane.b32.xlu0 %v14321_v29, %s14045_s26 }
 0x96d   : > { %v7613_v53 = vmul.f32 %v13754_v24, %v15483_v45  ;;  %13164 = vmatprep.mubr.msk.f32.mxu0 %vm14034_vm1, %v14033_v22  ;;  %13172 = vmatprep.subr.mxu0 %v14033_v22  ;;  %v7564_v8 = vpop.xlane.xlu0 %7563 }
 0x96f   : > { %13160 = vmatmul.mubr.msk.f32.vlgmr.msra.gmra.mrb[90].mxu1 %vm521_vm2, %v7613_v53 }
 0x970   : > { %v13756_v59 = vpop.eup %13755  ;;  %13168 = vmatpush3.msra.mxu1 %v7932_v11  ;;  %13169 = vmatprep.mubr.msk.f32.mxu1 %vm14034_vm1, %v14033_v22 }
 0x971   : > { %v7614_v25 = vmul.f32 %v13756_v59, %v15488_v60  ;;  %13177 = vmatprep.subr.mxu1 %v14033_v22  ;;  %v7567_v1 = vpop.xlane.xlu1 %7566 }
 0x972   : > { %13759 = vrcp.f32 %v7567_v1 }
 0x973   : > { %13165 = vmatmul.mubr.msk.f32.vlgmr.msra.gmra.mrb[112].mxu0 %vm521_vm2, %v7614_v25  ;;  %13761 = vrcp.f32 %v7564_v8 }
 0x974   : > { %v13758_v3 = vpop.eup %13757  ;;  %13174 = vmatprep.mubr.msk.f32.mxu0 %vm14034_vm1, %v14033_v22 }
 0x975   : > { %v7615_v45 = vmul.f32 %v13758_v3, %v15493_v27  ;;  %v7570_v62 = vpop.xlane.xlu0 %7569 }
 0x977   : > { %13170 = vmatmul.mubr.msk.f32.vlgmr.msra.gmra.mrb[92].mxu1 %vm521_vm2, %v7615_v45 }
 0x978   : > { %13179 = vmatprep.mubr.msk.f32.mxu1 %vm14034_vm1, %v14033_v22 }
 0x979   : > { %v7576_v2 = vpop.xlane.xlu0 %7575 }
 0x97c   : > { %v13760_v37 = vpop.eup %13759 }
 0x97d   : > { %v7617_v41 = vmul.f32 %v13760_v37, %v15502_v17  ;;  %v13762_v40 = vpop.eup %13761 }
 0x97e   : > { %v7616_v24 = vmul.f32 %v13762_v40, %v15498_v20 }
 0x97f   : > { %v7582_v60 = vpop.xlane.xlu0 %7581 }
 0x987   : > { %v7588_v13 = vpop.xlane.xlu0 %7587 }
 0x98f   : > { %v15623_v15 = vpop.xlane.xlu0 %7593 }
 0x993   : > { %v7477_v0 = vpop.xlane.xlu1 %7476  ;;  %v8084_v6 = vpop.permute.xlu0 %8083 }
 0x994   : > { %v7507_v27 = vsub.f32 %v15529_v12, %v7477_v0  ;;  %13178 = vmatpush3.msra.mxu1 %v8084_v6 }
 0x995   : > { %13180 = vmatmul.mubr.msk.f32.vlgmr.msra.gmra.mrb[94].mxu1 %vm521_vm2, %v7617_v41  ;;  %13187 = vmatprep.subr.mxu1 %v14033_v22 }
 0x996   : > { %v7531_v63 = vmul.f32 1.442695, %v7507_v27  ;;  %13189 = vmatprep.mubr.msk.f32.mxu1 %vm14034_vm1, %v14033_v22 }
 0x997   : > { %v7483_v11 = vpop.xlane.xlu1 %7482  ;;  %v8236_v57 = vpop.permute.xlu0 %8235 }
 0x998   : > { %13763 = vpow2.f32 %v7531_v63  ;;  %v7509_v32 = vsub.f32 %v15533_v61, %v7483_v11  ;;  %13188 = vmatpush3.msra.mxu1 %v8236_v57 }
 0x999   : > { %13197 = vmatprep.subr.mxu1 %v14033_v22  ;;  %13765 = vrcp.f32 %v7570_v62 }
 0x99a   : > { %v7535_v17 = vmul.f32 1.442695, %v7509_v32 }
 0x99b   : > { %v7489_v12 = vpop.xlane.xlu1 %7488 }
 0x99c   : > { %13767 = vpow2.f32 %v7535_v17  ;;  %v7511_v7 = vsub.f32 %v15537_v56, %v7489_v12 }
 0x99d   : > { %13769 = vrcp.f32 %v7576_v2 }
 0x99e   : > { %v7539_v28 = vmul.f32 1.442695, %v7511_v7 }
 0x99f   : > { %v7495_v23 = vpop.xlane.xlu1 %7494 }
 0x9a0   : > { %13771 = vpow2.f32 %v7539_v28  ;;  %v7513_v48 = vsub.f32 %v15541_v52, %v7495_v23 }
 0x9a1   : > { %13773 = vrcp.f32 %v7582_v60 }
 0x9a2   : > { %v15635_v14 = vpop.eup %13763  ;;  %v7543_v61 = vmul.f32 1.442695, %v7513_v48 }
 0x9a3   : > { %v8008_v19 = vpop.permute.xlu1 %8007  ;;  %v7571_v9 = vsel %vm521_vm2, %v15635_v14, 0.0  ;;  %v13766_v53 = vpop.eup %13765 }
 0x9a4   : > { %13775 = vpow2.f32 %v7543_v61  ;;  %7572 = vadd.xlane.f32.xlu1 %v7571_v9  ;;  %13173 = vmatpush3.msra.mxu0 %v8008_v19  ;;  %v7618_v20 = vmul.f32 %v13766_v53, %v15507_v16 }
 0x9a5   : > { %13175 = vmatmul.mubr.msk.f32.vlgmr.msra.gmra.mrb[114].mxu0 %vm521_vm2, %v7616_v24  ;;  %13182 = vmatprep.subr.mxu0 %v14033_v22  ;;  %13777 = vrcp.f32 %v7588_v13 }
 0x9a6   : > { %v15642_v56 = vpop.eup %13767  ;;  %13184 = vmatprep.mubr.msk.f32.mxu0 %vm14034_vm1, %v14033_v22 }
 0x9a7   : > { %v8160_v52 = vpop.permute.xlu1 %8159  ;;  %v7577_v59 = vsel %vm521_vm2, %v15642_v56, 0.0  ;;  %v13770_v25 = vpop.eup %13769 }
 0x9a8   : > { %7578 = vadd.xlane.f32.xlu1 %v7577_v59  ;;  %13183 = vmatpush3.msra.mxu0 %v8160_v52  ;;  %v7620_v45 = vmul.f32 %v13770_v25, %v15511_v4  ;;  %v8843_v25 = vld [vmem:[#allocation7 + $0x10] sm:$0xff] }
 0x9a9   : > { %13185 = vmatmul.mubr.msk.f32.vlgmr.msra.gmra.mrb[116].mxu0 %vm521_vm2, %v7618_v20  ;;  %13192 = vmatprep.subr.mxu0 %v14033_v22 }
 0x9aa   : > { %v15651_v3 = vpop.eup %13771  ;;  %13194 = vmatprep.mubr.msk.f32.mxu0 %vm14034_vm1, %v14033_v22 }
 0x9ab   : > { %v8312_v8 = vpop.permute.xlu1 %8311  ;;  %v7583_v62 = vsel %vm521_vm2, %v15651_v3, 0.0  ;;  %v13774_v1 = vpop.eup %13773 }
 0x9ac   : > { %7584 = vadd.xlane.f32.xlu1 %v7583_v62  ;;  %13193 = vmatpush3.msra.mxu0 %v8312_v8  ;;  %v7622_v2 = vmul.f32 %v13774_v1, %v15516_v21 }
 0x9ad   : > { %13195 = vmatmul.mubr.msk.f32.vlgmr.msra.gmra.mrb[118].mxu0 %vm521_vm2, %v7620_v45  ;;  %13202 = vmatprep.subr.mxu0 %v14033_v22 }
 0x9ae   : > { %v15660_v16 = vpop.eup %13775  ;;  %13204 = vmatprep.mubr.msk.f32.mxu0 %vm14034_vm1, %v14033_v22 }
 0x9af   : > { %v8464_v60 = vpop.permute.xlu1 %8463  ;;  %v7589_v4 = vsel %vm521_vm2, %v15660_v16, 0.0  ;;  %v13778_v13 = vpop.eup %13777 }
 0x9b0   : > { %7590 = vadd.xlane.f32.xlu1 %v7589_v4  ;;  %13203 = vmatpush3.msra.mxu0 %v8464_v60  ;;  %v7624_v37 = vmul.f32 %v13778_v13, %v15521_v18 }
 0x9b1   : > { %13205 = vmatmul.mubr.msk.f32.vlgmr.msra.gmra.mrb[120].mxu0 %vm521_vm2, %v7622_v2  ;;  %13212 = vmatprep.subr.mxu0 %v14033_v22 }
 0x9b2   : > { %13214 = vmatprep.mubr.msk.f32.mxu0 %vm14034_vm1, %v14033_v22 }
 0x9b3   : > { %v8616_v0 = vpop.permute.xlu1 %8615 }
 0x9b4   : > { %13213 = vmatpush3.msra.mxu0 %v8616_v0 }
 0x9b5   : > { %13215 = vmatmul.mubr.msk.f32.vlgmr.msra.gmra.mrb[122].mxu0 %vm521_vm2, %v7624_v37  ;;  %13222 = vmatprep.subr.mxu0 %v14033_v22 }
 0x9b6   : > { %13224 = vmatprep.mubr.msk.f32.mxu0 %vm14034_vm1, %v14033_v22 }
 0x9c1   : > { %8767 = vrot.lane.b32.xlu1 %v14373_v55, %s14042_s7  ;;  %s13962_s7 = scalar_lea.vmem %s13961_s17, 4096 }
 0x9c5   : > { %9053 = vrot.lane.b32.xlu1 %v14317_v26, %s14044_s24 }
 0x9c9   : > { %9131 = vrot.lane.b32.xlu1 %v14321_v29, %s14044_s24  ;;  %v8388_v29 = vpop.permute.xlu0 %8387 }
 0x9cd   : > { %9209 = vrot.lane.b32.xlu1 %v14323_v30, %s14044_s24  ;;  %v8540_v21 = vpop.permute.xlu0 %8539 }
 0x9d1   : > { %9287 = vrot.lane.b32.xlu1 %v14329_v33, %s14044_s24  ;;  %v8692_v18 = vpop.permute.xlu0 %8691 }
 0x9d5   : > { %9365 = vrot.lane.b32.xlu1 %v14331_v34, %s14044_s24  ;;  %v9056_v6 = vpop.permute.xlu0 %9055 }
 0x9d9   : > { %9443 = vrot.lane.b32.xlu1 %v14333_v35, %s14044_s24  ;;  %v15714_v41 = vpop.permute.xlu0 %9133 }
 0x9dd   : > { %9521 = vrot.lane.b32.xlu1 %v14339_v38, %s14044_s24  ;;  %v15716_v27 = vpop.permute.xlu0 %9211 }
 0x9e1   : > { %9599 = vrot.lane.b32.xlu1 %v14341_v39, %s14044_s24  ;;  %v15719_v11 = vpop.permute.xlu0 %9289 }
 0x9e5   : > { %9757 = vrot.lane.b32.xlu1 %v14349_v43, %s14043_s8  ;;  %v15721_v32 = vpop.permute.xlu0 %9367 }
 0x9e9   : > { %9755 = vrot.lane.b32.xlu1 %v14349_v43, %s14044_s24  ;;  %v15725_v61 = vpop.permute.xlu0 %9445 }
 0x9ed   : > { %9913 = vrot.lane.b32.xlu1 %v14357_v47, %s14043_s8 }
 0x9f1   : > { %9911 = vrot.lane.b32.xlu1 %v14357_v47, %s14044_s24 }
 0x9f5   : > { %10069 = vrot.lane.b32.xlu1 %v14365_v51, %s14043_s8 }
 0x9f9   : > { %10067 = vrot.lane.b32.xlu1 %v14365_v51, %s14044_s24 }
 0x9fd   : > { %10225 = vrot.lane.b32.xlu1 %v14373_v55, %s14043_s8 }
 0xa01   : > { %10223 = vrot.lane.b32.xlu1 %v14373_v55, %s14044_s24 }
 0xa05   : > { %10477 = vrot.lane.b32.xlu1 %v14317_v26, %s14045_s26 }
 0xa09   : > { %10629 = vrot.lane.b32.xlu1 %v14323_v30, %s14045_s26 }
 0xa31   : > { %v7573_v63 = vpop.xlane.xlu1 %7572 }
 0xa32   : > { %13779 = vrcp.f32 %v7573_v63 }
 0xa33   : > { %13781 = vrcp.f32 %v15623_v15 }
 0xa35   : > { %v7579_v57 = vpop.xlane.xlu1 %7578 }
 0xa36   : > { %13783 = vrcp.f32 %v7579_v57 }
 0xa39   : > { %v7585_v26 = vpop.xlane.xlu1 %7584 }
 0xa3a   : > { %13785 = vrcp.f32 %v7585_v26  ;;  %v7699_v30 = vpop.f32.mrb[88].mxu1 }
 0xa3b   : > { %v13151_v17 = vpop.f32.mrb[89].mxu1 }
 0xa3c   : > { %v13780_v12 = vpop.eup %13779 }
 0xa3d   : > { %v7619_v7 = vmul.f32 %v13780_v12, %v15635_v14  ;;  %v7591_v28 = vpop.xlane.xlu1 %7590  ;;  %v13782_v23 = vpop.eup %13781 }
 0xa3e   : > { %13787 = vrcp.f32 %v7591_v28  ;;  %v7775_v40 = vpop.f32.mrb[110].mxu0  ;;  %v7626_v19 = vmul.f32 %v13782_v23, %v15525_v10 }
 0xa3f   : > { %v13156_v48 = vpop.f32.mrb[111].mxu0  ;;  %13190 = vmatmul.mubr.msk.f32.vlgmr.msra.gmra.mrb[96].mxu1 %vm521_vm2, %v7619_v7 }
 0xa40   : > { %v13784_v15 = vpop.eup %13783  ;;  %13198 = vmatpush3.msra.mxu1 %v8388_v29  ;;  %13199 = vmatprep.mubr.msk.f32.mxu1 %vm14034_vm1, %v14033_v22 }
 0xa41   : > { %v7621_v9 = vmul.f32 %v13784_v15, %v15642_v56  ;;  %v8768_v24 = vpop.permute.xlu1 %8767  ;;  %13207 = vmatprep.subr.mxu1 %v14033_v22  ;;  %v9524_v56 = vpop.permute.xlu0 %9523 }
 0xa42   : > { %v7851_v14 = vpop.f32.mrb[90].mxu1  ;;  %13223 = vmatpush3.msra.mxu0 %v8768_v24 }
 0xa43   : > { %v13161_v53 = vpop.f32.mrb[91].mxu1  ;;  %13200 = vmatmul.mubr.msk.f32.vlgmr.msra.gmra.mrb[98].mxu1 %vm521_vm2, %v7621_v9  ;;  %13225 = vmatmul.mubr.msk.f32.vlgmr.msra.gmra.mrb[124].mxu0 %vm521_vm2, %v7626_v19 }
 0xa44   : > { %v13786_v52 = vpop.eup %13785  ;;  %13208 = vmatpush3.msra.mxu1 %v8540_v21  ;;  %13209 = vmatprep.mubr.msk.f32.mxu1 %vm14034_vm1, %v14033_v22 }
 0xa45   : > { %v7623_v59 = vmul.f32 %v13786_v52, %v15651_v3  ;;  %v9054_v10 = vpop.permute.xlu1 %9053  ;;  %13217 = vmatprep.subr.mxu1 %v14033_v22  ;;  %13253 = vmatprep.subr.mxu0 %v14033_v22  ;;  %v9602_v60 = vpop.permute.xlu0 %9601 }
 0xa46   : > { %v7927_v20 = vpop.f32.mrb[112].mxu0  ;;  %13255 = vmatprep.mubr.msk.f32.mxu0 %vm14034_vm1, %v14033_v22 }
 0xa47   : > { %v13166_v45 = vpop.f32.mrb[113].mxu0  ;;  %13210 = vmatmul.mubr.msk.f32.vlgmr.msra.gmra.mrb[100].mxu1 %vm521_vm2, %v7623_v59 }
 0xa48   : > { %v13788_v8 = vpop.eup %13787  ;;  %13218 = vmatpush3.msra.mxu1 %v8692_v18  ;;  %13219 = vmatprep.mubr.msk.f32.mxu1 %vm14034_vm1, %v14033_v22 }
 0xa49   : > { %v7625_v3 = vmul.f32 %v13788_v8, %v15660_v16  ;;  %v9132_v62 = vpop.permute.xlu1 %9131  ;;  %13254 = vmatpush3.xpose.msk.msra.mxu0 %vm521_vm2, %v9056_v6  ;;  %13227 = vmatprep.subr.mxu1 %v8843_v25  ;;  %v9680_v13 = vpop.permute.xlu0 %9679 }
 0xa4a   : > { %v8003_v1 = vpop.f32.mrb[92].mxu1  ;;  %13258 = vmatprep.subr.mxu0 %v14033_v22 }
 0xa4b   : > { %v13171_v2 = vpop.f32.mrb[93].mxu1  ;;  %13220 = vmatmul.mubr.msk.f32.vlgmr.msra.gmra.mrb[102].mxu1 %vm521_vm2, %v7625_v3 }
 0xa4c   : > { %13228 = vmatpush3.msra.mxu1 %v8843_v25  ;;  %13229 = vmatprep.mubr.msk.f32.mxu1 %vm521_vm2, %v7699_v30 }
 0xa4d   : > { %13256 = vmatmul.mubr.msk.f32.vlgmr.msra.gmra.mrb[126].mxu0 %vm521_vm2, %v9054_v10  ;;  %v9210_v4 = vpop.permute.xlu1 %9209  ;;  %13293 = vmatprep.subr.mxu1 %v14033_v22  ;;  %v15774_v0 = vpop.permute.xlu0 %9677 }
 0xa4e   : > { %13259 = vmatpush3.xpose.msk.msra.mxu0 %vm521_vm2, %v15714_v41  ;;  %13260 = vmatprep.mubr.msk.f32.mxu0 %vm14034_vm1, %v14033_v22 }
 0xa4f   : > { %13230 = vmatmul.mubr.msk.f32.vlgmr.msra.gmra.mrb[74].mxu1 %vm521_vm2, %v7775_v40  ;;  %13263 = vmatprep.subr.mxu0 %v14033_v22 }
 0xa50   : > { %13232 = vmatprep.mubr.msk.f32.mxu1 %vm521_vm2, %v7851_v14 }
 0xa51   : > { %13261 = vmatmul.mubr.msk.f32.vlgmr.msra.gmra.mrb[128].mxu0 %vm521_vm2, %v9132_v62  ;;  %v9288_v16 = vpop.permute.xlu1 %9287  ;;  %v15783_v18 = vpop.permute.xlu0 %9835 }
 0xa52   : > { %13264 = vmatpush3.xpose.msk.msra.mxu0 %vm521_vm2, %v15716_v27  ;;  %13265 = vmatprep.mubr.msk.f32.mxu0 %vm14034_vm1, %v14033_v22 }
 0xa53   : > { %13294 = vmatpush3.xpose.msk.msra.mxu1 %vm521_vm2, %v9680_v13  ;;  %13268 = vmatprep.subr.mxu0 %v14033_v22 }
 0xa54   : > { %13233 = vmatmul.mubr.msk.f32.gmra.mrb[76].mxu1 %vm521_vm2, %v7927_v20  ;;  %13303 = vmatprep.subr.mxu1 %v14033_v22 }
 0xa55   : > { %13235 = vmatprep.mubr.msk.f32.mxu1 %vm521_vm2, %v8003_v1  ;;  %13266 = vmatmul.mubr.msk.f32.vlgmr.msra.gmra.mrb[130].mxu0 %vm521_vm2, %v9210_v4  ;;  %v9366_v37 = vpop.permute.xlu1 %9365  ;;  %v15795_v41 = vpop.permute.xlu0 %9833 }
 0xa56   : > { %13269 = vmatpush3.xpose.msk.msra.mxu0 %vm521_vm2, %v15719_v11  ;;  %13270 = vmatprep.mubr.msk.f32.mxu0 %vm14034_vm1, %v14033_v22 }
 0xa57   : > { %13273 = vmatprep.subr.mxu0 %v14033_v22 }
 0xa59   : > { %13271 = vmatmul.mubr.msk.f32.vlgmr.msra.gmra.mrb[132].mxu0 %vm521_vm2, %v9288_v16  ;;  %v9444_v29 = vpop.permute.xlu1 %9443  ;;  %v15803_v26 = vpop.permute.xlu0 %9991 }
 0xa5a   : > { %13274 = vmatpush3.xpose.msk.msra.mxu0 %vm521_vm2, %v15721_v32  ;;  %13275 = vmatprep.mubr.msk.f32.mxu0 %vm14034_vm1, %v14033_v22 }
 0xa5b   : > { %13278 = vmatprep.subr.mxu0 %v14033_v22 }
 0xa5d   : > { %13276 = vmatmul.mubr.msk.f32.vlgmr.msra.gmra.mrb[134].mxu0 %vm521_vm2, %v9366_v37  ;;  %v9522_v21 = vpop.permute.xlu1 %9521  ;;  %v15814_v30 = vpop.permute.xlu0 %9989 }
 0xa5e   : > { %13279 = vmatpush3.xpose.msk.msra.mxu0 %vm521_vm2, %v15725_v61  ;;  %13280 = vmatprep.mubr.msk.f32.mxu0 %vm14034_vm1, %v14033_v22 }
 0xa5f   : > { %13283 = vmatprep.subr.mxu0 %v14033_v22 }
 0xa61   : > { %13281 = vmatmul.mubr.msk.f32.vlgmr.msra.gmra.mrb[136].mxu0 %vm521_vm2, %v9444_v29  ;;  %v9600_v6 = vpop.permute.xlu1 %9599  ;;  %v15819_v7 = vpop.permute.xlu0 %10147 }
 0xa62   : > { %13284 = vmatpush3.xpose.msk.msra.mxu0 %vm521_vm2, %v9524_v56  ;;  %13285 = vmatprep.mubr.msk.f32.mxu0 %vm14034_vm1, %v14033_v22 }
 0xa63   : > { %13288 = vmatprep.subr.mxu0 %v14033_v22 }
 0xa65   : > { %13286 = vmatmul.mubr.msk.f32.vlgmr.msra.gmra.mrb[138].mxu0 %vm521_vm2, %v9522_v21  ;;  %v9758_v27 = vpop.permute.xlu1 %9757  ;;  %v15828_v48 = vpop.permute.xlu0 %10145 }
 0xa66   : > { %13289 = vmatpush3.xpose.msk.msra.mxu0 %vm521_vm2, %v9602_v60  ;;  %13290 = vmatprep.mubr.msk.f32.mxu0 %vm14034_vm1, %v14033_v22 }
 0xa67   : > { %13298 = vmatprep.subr.mxu0 %v14033_v22 }
 0xa68   : > { %v8155_v63 = vpop.f32.mrb[94].mxu1 }
 0xa69   : > { %13291 = vmatmul.mubr.msk.f32.vlgmr.msra.gmra.mrb[140].mxu0 %vm521_vm2, %v9600_v6  ;;  %v9756_v11 = vpop.permute.xlu1 %9755  ;;  %v13181_v57 = vpop.f32.mrb[95].mxu1 }
 0xa6a   : > { %13299 = vmatpush3.xpose.msk.msra.mxu0 %vm521_vm2, %v9758_v27  ;;  %13300 = vmatprep.mubr.msk.f32.mxu0 %vm14034_vm1, %v14033_v22  ;;  %v10554_v53 = vpop.permute.xlu0 %10553 }
 0xa6b   : > { %13308 = vmatprep.subr.mxu0 %v14033_v22 }
 0xa6d   : > { %13301 = vmatmul.mubr.msk.f32.vlgmr.msra.gmra.mrb[142].mxu0 %vm521_vm2, %v9756_v11  ;;  %v9914_v32 = vpop.permute.xlu1 %9913 }
 0xa6e   : > { %13309 = vmatpush3.xpose.msk.msra.mxu0 %vm521_vm2, %v9914_v32  ;;  %13310 = vmatprep.mubr.msk.f32.mxu0 %vm14034_vm1, %v14033_v22 }
 0xa6f   : > { %13318 = vmatprep.subr.mxu0 %v14033_v22 }
 0xa71   : > { %v9912_v17 = vpop.permute.xlu1 %9911 }
 0xa72   : > { %13311 = vmatmul.mubr.msk.f32.vlgmr.msra.gmra.mrb[144].mxu0 %vm521_vm2, %v9912_v17 }
 0xa73   : > { %13320 = vmatprep.mubr.msk.f32.mxu0 %vm14034_vm1, %v14033_v22 }
 0xa75   : > { %v10070_v12 = vpop.permute.xlu1 %10069 }
 0xa76   : > { %13319 = vmatpush3.xpose.msk.msra.mxu0 %vm521_vm2, %v10070_v12 }
 0xa77   : > { %13328 = vmatprep.subr.mxu0 %v14033_v22 }
 0xa78   : > { %v8079_v28 = vpop.f32.mrb[114].mxu0 }
 0xa79   : > { %v10068_v23 = vpop.permute.xlu1 %10067  ;;  %v13176_v40 = vpop.f32.mrb[115].mxu0  ;;  %13236 = vmatmul.mubr.msk.f32.gmra.mrb[78].mxu1 %vm521_vm2, %v8079_v28 }
 0xa7a   : > { %13238 = vmatprep.mubr.msk.f32.mxu1 %vm521_vm2, %v8155_v63  ;;  %13321 = vmatmul.mubr.msk.f32.vlgmr.msra.gmra.mrb[146].mxu0 %vm521_vm2, %v10068_v23 }
 0xa7b   : > { %13330 = vmatprep.mubr.msk.f32.mxu0 %vm14034_vm1, %v14033_v22 }
 0xa7c   : > { %v8231_v15 = vpop.f32.mrb[116].mxu0 }
 0xa7d   : > { %v10226_v61 = vpop.permute.xlu1 %10225  ;;  %v13186_v19 = vpop.f32.mrb[117].mxu0  ;;  %13239 = vmatmul.mubr.msk.f32.gmra.mrb[40].mxu1 %vm521_vm2, %v8231_v15 }
 0xa7e   : > { %13329 = vmatpush3.xpose.msk.msra.mxu0 %vm521_vm2, %v10226_v61 }
 0xa7f   : > { %13338 = vmatprep.subr.mxu0 %v14033_v22 }
 0xa80   : > { %v8383_v9 = vpop.f32.mrb[118].mxu0 }
 0xa81   : > { %v10224_v24 = vpop.permute.xlu1 %10223  ;;  %v13196_v14 = vpop.f32.mrb[119].mxu0 }
 0xa82   : > { %13331 = vmatmul.mubr.msk.f32.vlgmr.msra.gmra.mrb[148].mxu0 %vm521_vm2, %v10224_v24 }
 0xa83   : > { %13339 = vmatpush3.msra.mxu0 %v10554_v53  ;;  %13340 = vmatprep.mubr.msk.f32.mxu0 %vm14034_vm1, %v14033_v22 }
 0xa84   : > { %v8535_v52 = vpop.f32.mrb[120].mxu0  ;;  %13348 = vmatprep.subr.mxu0 %v14033_v22 }
 0xa85   : > { %v13206_v59 = vpop.f32.mrb[121].mxu0  ;;  %v10478_v57 = vpop.permute.xlu1 %10477 }
 0xa88   : > { %v8687_v10 = vpop.f32.mrb[122].mxu0 }
 0xa89   : > { %v13216_v56 = vpop.f32.mrb[123].mxu0 }
 0xb12   : > { %v8307_v20 = vpop.f32.mrb[96].mxu1 }
 0xb13   : > { %v13191_v25 = vpop.f32.mrb[97].mxu1  ;;  %13241 = vmatprep.mubr.msk.f32.mxu1 %vm521_vm2, %v8307_v20 }
 0xb14   : > { %13242 = vmatmul.mubr.msk.f32.gmra.mrb[42].mxu1 %vm521_vm2, %v8383_v9 }
 0xb16   : > { %v8459_v45 = vpop.f32.mrb[98].mxu1  ;;  %v8839_v8 = vpop.f32.mrb[124].mxu0 }
 0xb17   : > { %v13201_v3 = vpop.f32.mrb[99].mxu1  ;;  %v13226_v62 = vpop.f32.mrb[125].mxu0  ;;  %13244 = vmatprep.mubr.msk.f32.mxu1 %vm521_vm2, %v8459_v45 }
 0xb18   : > { %13245 = vmatmul.mubr.msk.f32.gmra.mrb[44].mxu1 %vm521_vm2, %v8535_v52 }
 0xb1a   : > { %v8611_v1 = vpop.f32.mrb[100].mxu1 }
 0xb1b   : > { %v13211_v2 = vpop.f32.mrb[101].mxu1  ;;  %13247 = vmatprep.mubr.msk.f32.mxu1 %vm521_vm2, %v8611_v1 }
 0xb1c   : > { %13248 = vmatmul.mubr.msk.f32.gmra.mrb[46].mxu1 %vm521_vm2, %v8687_v10 }
 0xb1e   : > { %v8763_v60 = vpop.f32.mrb[102].mxu1 }
 0xb1f   : > { %v13221_v4 = vpop.f32.mrb[103].mxu1  ;;  %13250 = vmatprep.mubr.msk.f32.mxu1 %vm521_vm2, %v8763_v60 }
 0xb20   : > { %v15844_v16 = vpop.f32.mrb[126].mxu0  ;;  %13251 = vmatmul.mubr.msk.f32.gmra.mrb[48].mxu1 %vm521_vm2, %v8839_v8  ;;  %v15919_v8 = vpop.permute.xlu1 %10629 }
 0xb21   : > { %v13257_v13 = vpop.f32.mrb[127].mxu0  ;;  %v10301_v37 = vsel %vm521_vm2, %v15844_v16, -inf  ;;  %13295 = vmatprep.mubr.msk.f32.mxu1 %vm14034_vm1, %v14033_v22 }
 0xb22   : > { %10302 = vmax.xlane.f32.xlu0 %v10301_v37 }
 0xb24   : > { %v15851_v29 = vpop.f32.mrb[128].mxu0  ;;  %13296 = vmatmul.mubr.msk.f32.vlgmr.msra.gmra.mrb[104].mxu1 %vm521_vm2, %v15774_v0 }
 0xb25   : > { %v13262_v21 = vpop.f32.mrb[129].mxu0  ;;  %13304 = vmatpush3.xpose.msk.msra.mxu1 %vm521_vm2, %v15783_v18  ;;  %v10304_v6 = vsel %vm521_vm2, %v15851_v29, -inf  ;;  %13305 = vmatprep.mubr.msk.f32.mxu1 %vm14034_vm1, %v14033_v22 }
 0xb26   : > { %10305 = vmax.xlane.f32.xlu1 %v10304_v6  ;;  %13313 = vmatprep.subr.mxu1 %v14033_v22 }
 0xb28   : > { %v15862_v27 = vpop.f32.mrb[130].mxu0  ;;  %13306 = vmatmul.mubr.msk.f32.vlgmr.msra.gmra.mrb[106].mxu1 %vm521_vm2, %v15795_v41 }
 0xb29   : > { %v13267_v63 = vpop.f32.mrb[131].mxu0  ;;  %13314 = vmatpush3.xpose.msk.msra.mxu1 %vm521_vm2, %v15803_v26  ;;  %v10307_v0 = vsel %vm521_vm2, %v15862_v27, -inf  ;;  %13315 = vmatprep.mubr.msk.f32.mxu1 %vm14034_vm1, %v14033_v22 }
 0xb2a   : > { %10308 = vmax.xlane.f32.xlu0 %v10307_v0  ;;  %13323 = vmatprep.subr.mxu1 %v14033_v22 }
 0xb2c   : > { %v15873_v18 = vpop.f32.mrb[132].mxu0  ;;  %13316 = vmatmul.mubr.msk.f32.vlgmr.msra.gmra.mrb[108].mxu1 %vm521_vm2, %v15814_v30 }
 0xb2d   : > { %v13272_v11 = vpop.f32.mrb[133].mxu0  ;;  %13324 = vmatpush3.xpose.msk.msra.mxu1 %vm521_vm2, %v15819_v7  ;;  %v10310_v41 = vsel %vm521_vm2, %v15873_v18, -inf  ;;  %13325 = vmatprep.mubr.msk.f32.mxu1 %vm14034_vm1, %v14033_v22 }
 0xb2e   : > { %10311 = vmax.xlane.f32.xlu0 %v10310_v41  ;;  %13333 = vmatprep.subr.mxu1 %v14033_v22 }
 0xb30   : > { %v9439_v26 = vpop.f32.mrb[134].mxu0  ;;  %13326 = vmatmul.mubr.msk.f32.vlgmr.msra.gmra.mrb[110].mxu1 %vm521_vm2, %v15828_v48 }
 0xb31   : > { %v13277_v32 = vpop.f32.mrb[135].mxu0  ;;  %13334 = vmatpush3.msra.mxu1 %v10478_v57  ;;  %v10313_v30 = vsel %vm521_vm2, %v9439_v26, -inf  ;;  %13335 = vmatprep.mubr.msk.f32.mxu1 %vm14034_vm1, %v14033_v22 }
 0xb32   : > { %10314 = vmax.xlane.f32.xlu1 %v10313_v30  ;;  %13343 = vmatprep.subr.mxu1 %v14033_v22 }
 0xb34   : > { %v9517_v17 = vpop.f32.mrb[136].mxu0 }
 0xb35   : > { %v13282_v12 = vpop.f32.mrb[137].mxu0  ;;  %v10316_v7 = vsel %vm521_vm2, %v9517_v17, -inf }
 0xb36   : > { %10317 = vmax.xlane.f32.xlu0 %v10316_v7 }
 0xb38   : > { %v15891_v28 = vpop.f32.mrb[138].mxu0 }
 0xb39   : > { %v13287_v23 = vpop.f32.mrb[139].mxu0  ;;  %v10319_v40 = vsel %vm521_vm2, %v15891_v28, -inf }
 0xb3a   : > { %10320 = vmax.xlane.f32.xlu1 %v10319_v40 }
 0xb3c   : > { %v15895_v48 = vpop.f32.mrb[140].mxu0 }
 0xb3d   : > { %v13292_v15 = vpop.f32.mrb[141].mxu0  ;;  %v10322_v61 = vsel %vm521_vm2, %v15895_v48, -inf }
 0xb3e   : > { %10323 = vmax.xlane.f32.xlu0 %v10322_v61 }
 0xb40   : > { %v15899_v19 = vpop.f32.mrb[142].mxu0 }
 0xb41   : > { %v13302_v9 = vpop.f32.mrb[143].mxu0  ;;  %v10328_v24 = vsel %vm521_vm2, %v15899_v19, -inf }
 0xb42   : > { %10329 = vmax.xlane.f32.xlu0 %v10328_v24 }
 0xb45   : > { %v15903_v14 = vpop.f32.mrb[144].mxu0 }
 0xb46   : > { %v13312_v53 = vpop.f32.mrb[145].mxu0  ;;  %v10334_v52 = vsel %vm521_vm2, %v15903_v14, -inf }
 0xb47   : > { %10335 = vmax.xlane.f32.xlu0 %v10334_v52 }
 0xb4b   : > { %10781 = vrot.lane.b32.xlu1 %v14331_v34, %s14045_s26 }
 0xb4d   : > { %v15909_v59 = vpop.f32.mrb[146].mxu0 }
 0xb4e   : > { %v13322_v10 = vpop.f32.mrb[147].mxu0  ;;  %v10340_v56 = vsel %vm521_vm2, %v15909_v59, -inf }
 0xb4f   : > { %10341 = vmax.xlane.f32.xlu0 %v10340_v56 }
 0xb55   : > { %v15913_v20 = vpop.f32.mrb[148].mxu0 }
 0xb56   : > { %v13332_v25 = vpop.f32.mrb[149].mxu0  ;;  %v10346_v45 = vsel %vm521_vm2, %v15913_v20, -inf }
 0xb57   : > { %10347 = vmax.xlane.f32.xlu0 %v10346_v45 }
 0xb6d   : > { %10705 = vrot.lane.b32.xlu0 %v14329_v33, %s14045_s26 }
 0xbaf   : > { %v10303_v34 = vpop.xlane.xlu0 %10302 }
 0xbb0   : > { %v10349_v3 = vsub.f32 %v15844_v16, %v10303_v34 }
 0xbb2   : > { %v10365_v62 = vmul.f32 1.442695, %v10349_v3 }
 0xbb3   : > { %v10306_v1 = vpop.xlane.xlu1 %10305 }
 0xbb4   : > { %13789 = vpow2.f32 %v10365_v62  ;;  %v10350_v2 = vsub.f32 %v15851_v29, %v10306_v1 }
 0xbb6   : > { %v10367_v60 = vmul.f32 1.442695, %v10350_v2 }
 0xbb7   : > { %v10309_v4 = vpop.xlane.xlu0 %10308 }
 0xbb8   : > { %13791 = vpow2.f32 %v10367_v60  ;;  %v10351_v13 = vsub.f32 %v15862_v27, %v10309_v4 }
 0xbba   : > { %v10369_v37 = vmul.f32 1.442695, %v10351_v13 }
 0xbbb   : > { %v10312_v21 = vpop.xlane.xlu0 %10311 }
 0xbbc   : > { %13793 = vpow2.f32 %v10369_v37  ;;  %v10352_v33 = vsub.f32 %v15873_v18, %v10312_v21 }
 0xbbe   : > { %v15925_v6 = vpop.eup %13789  ;;  %v10371_v63 = vmul.f32 1.442695, %v10352_v33 }
 0xbbf   : > { %v10315_v0 = vpop.xlane.xlu1 %10314  ;;  %v10397_v16 = vsel %vm521_vm2, %v15925_v6, 0.0 }
 0xbc0   : > { %13795 = vpow2.f32 %v10371_v63  ;;  %v10353_v11 = vsub.f32 %v9439_v26, %v10315_v0  ;;  %10398 = vadd.xlane.f32.xlu1 %v10397_v16 }
 0xbc2   : > { %v15929_v29 = vpop.eup %13791  ;;  %v10373_v41 = vmul.f32 1.442695, %v10353_v11 }
 0xbc3   : > { %v10318_v57 = vpop.xlane.xlu0 %10317  ;;  %v10400_v27 = vsel %vm521_vm2, %v15929_v29, 0.0 }
 0xbc4   : > { %13797 = vpow2.f32 %v10373_v41  ;;  %v10354_v32 = vsub.f32 %v9517_v17, %v10318_v57  ;;  %10401 = vadd.xlane.f32.xlu0 %v10400_v27 }
 0xbc6   : > { %v15933_v18 = vpop.eup %13793  ;;  %v10375_v30 = vmul.f32 1.442695, %v10354_v32 }
 0xbc7   : > { %v10321_v12 = vpop.xlane.xlu1 %10320  ;;  %v10403_v7 = vsel %vm521_vm2, %v15933_v18, 0.0 }
 0xbc8   : > { %13799 = vpow2.f32 %v10375_v30  ;;  %v10355_v26 = vsub.f32 %v15891_v28, %v10321_v12  ;;  %10404 = vadd.xlane.f32.xlu1 %v10403_v7 }
 0xbca   : > { %v15938_v23 = vpop.eup %13795  ;;  %v10377_v40 = vmul.f32 1.442695, %v10355_v26 }
 0xbcb   : > { %v10324_v15 = vpop.xlane.xlu0 %10323  ;;  %v10406_v61 = vsel %vm521_vm2, %v15938_v23, 0.0 }
 0xbcc   : > { %13801 = vpow2.f32 %v10377_v40  ;;  %v10356_v17 = vsub.f32 %v15895_v48, %v10324_v15  ;;  %10407 = vadd.xlane.f32.xlu0 %v10406_v61 }
 0xbce   : > { %v15943_v9 = vpop.eup %13797  ;;  %v10379_v24 = vmul.f32 1.442695, %v10356_v17 }
 0xbcf   : > { %v10330_v53 = vpop.xlane.xlu0 %10329  ;;  %v10409_v52 = vsel %vm521_vm2, %v15943_v9, 0.0 }
 0xbd0   : > { %13803 = vpow2.f32 %v10379_v24  ;;  %v10358_v28 = vsub.f32 %v15899_v19, %v10330_v53  ;;  %10410 = vadd.xlane.f32.xlu1 %v10409_v52 }
 0xbd2   : > { %v15948_v10 = vpop.eup %13799  ;;  %v10383_v56 = vmul.f32 1.442695, %v10358_v28 }
 0xbd3   : > { %v10412_v25 = vsel %vm521_vm2, %v15948_v10, 0.0 }
 0xbd4   : > { %13805 = vpow2.f32 %v10383_v56  ;;  %10413 = vadd.xlane.f32.xlu0 %v10412_v25  ;;  %v10336_v48 = vpop.xlane.xlu0 %10335 }
 0xbd5   : > { %v10360_v45 = vsub.f32 %v15903_v14, %v10336_v48 }
 0xbd6   : > { %v15953_v34 = vpop.eup %13801 }
 0xbd7   : > { %v10387_v3 = vmul.f32 1.442695, %v10360_v45  ;;  %v10415_v62 = vsel %vm521_vm2, %v15953_v34, 0.0 }
 0xbd8   : > { %10416 = vadd.xlane.f32.xlu1 %v10415_v62 }
 0xbd9   : > { %13807 = vpow2.f32 %v10387_v3 }
 0xbda   : > { %v15957_v19 = vpop.eup %13803 }
 0xbdb   : > { %v10418_v1 = vsel %vm521_vm2, %v15957_v19, 0.0 }
 0xbdc   : > { %10419 = vadd.xlane.f32.xlu0 %v10418_v1  ;;  %v10342_v2 = vpop.xlane.xlu0 %10341 }
 0xbdd   : > { %v10362_v60 = vsub.f32 %v15909_v59, %v10342_v2 }
 0xbde   : > { %v15962_v4 = vpop.eup %13805 }
 0xbdf   : > { %v10391_v14 = vmul.f32 1.442695, %v10362_v60  ;;  %v10424_v13 = vsel %vm521_vm2, %v15962_v4, 0.0 }
 0xbe0   : > { %10425 = vadd.xlane.f32.xlu0 %v10424_v13 }
 0xbe1   : > { %13809 = vpow2.f32 %v10391_v14 }
 0xbe3   : > { %v15966_v37 = vpop.eup %13807 }
 0xbe4   : > { %v10348_v21 = vpop.xlane.xlu0 %10347  ;;  %v10430_v33 = vsel %vm521_vm2, %v15966_v37, 0.0 }
 0xbe5   : > { %v10364_v63 = vsub.f32 %v15913_v20, %v10348_v21  ;;  %10431 = vadd.xlane.f32.xlu0 %v10430_v33 }
 0xbe7   : > { %v10395_v0 = vmul.f32 1.442695, %v10364_v63 }
 0xbe9   : > { %13811 = vpow2.f32 %v10395_v0 }
 0xbeb   : > { %v15971_v59 = vpop.eup %13809 }
 0xbec   : > { %v10436_v16 = vsel %vm521_vm2, %v15971_v59, 0.0 }
 0xbed   : > { %10437 = vadd.xlane.f32.xlu0 %v10436_v16 }
 0xbf3   : > { %v15975_v11 = vpop.eup %13811 }
 0xbf4   : > { %v10442_v41 = vsel %vm521_vm2, %v15975_v11, 0.0 }
 0xbf5   : > { %10443 = vadd.xlane.f32.xlu0 %v10442_v41 }
 0xbf7   : > { %v15979_v57 = vpop.f32.mrb[104].mxu1 }
 0xbf8   : > { %v13297_v27 = vpop.f32.mrb[105].mxu1  ;;  %v10325_v20 = vsel %vm521_vm2, %v15979_v57, -inf }
 0xbf9   : > { %10326 = vmax.xlane.f32.xlu1 %v10325_v20 }
 0xbfb   : > { %v15983_v32 = vpop.f32.mrb[106].mxu1 }
 0xbfc   : > { %v13307_v30 = vpop.f32.mrb[107].mxu1  ;;  %v10331_v12 = vsel %vm521_vm2, %v15983_v32, -inf }
 0xbfd   : > { %10332 = vmax.xlane.f32.xlu1 %v10331_v12 }
 0xbff   : > { %v15987_v7 = vpop.f32.mrb[108].mxu1 }
 0xc00   : > { %v13317_v26 = vpop.f32.mrb[109].mxu1  ;;  %v10337_v40 = vsel %vm521_vm2, %v15987_v7, -inf }
 0xc01   : > { %10338 = vmax.xlane.f32.xlu1 %v10337_v40 }
 0xc03   : > { %v15991_v15 = vpop.f32.mrb[110].mxu1 }
 0xc04   : > { %v13327_v61 = vpop.f32.mrb[111].mxu1  ;;  %v10343_v17 = vsel %vm521_vm2, %v15991_v15, -inf }
 0xc05   : > { %10344 = vmax.xlane.f32.xlu1 %v10343_v17 }
 0xc0b   : > { %10933 = vrot.lane.b32.xlu0 %v14339_v38, %s14045_s26  ;;  %v10782_v38 = vpop.permute.xlu1 %10781 }
 0xc0f   : > { %11085 = vrot.lane.b32.xlu0 %v14347_v42, %s14045_s26 }
 0xc13   : > { %11237 = vrot.lane.b32.xlu0 %v14355_v46, %s14045_s26 }
 0xc16   : > { %10857 = vrot.lane.b32.xlu1 %v14333_v35, %s14045_s26  ;;  %v10706_v35 = vpop.permute.xlu0 %10705 }
 0xc17   : > { %11389 = vrot.lane.b32.xlu0 %v14363_v50, %s14045_s26 }
 0xc1a   : > { %11009 = vrot.lane.b32.xlu1 %v14341_v39, %s14045_s26 }
 0xc1b   : > { %11541 = vrot.lane.b32.xlu0 %v14371_v54, %s14045_s26 }
 0xc1e   : > { %11161 = vrot.lane.b32.xlu1 %v14349_v43, %s14045_s26 }
 0xc22   : > { %11313 = vrot.lane.b32.xlu1 %v14357_v47, %s14045_s26 }
 0xc26   : > { %11465 = vrot.lane.b32.xlu1 %v14365_v51, %s14045_s26 }
 0xc4d   : > { %v10399_v42 = vpop.xlane.xlu1 %10398 }
 0xc4e   : > { %13813 = vrcp.f32 %v10399_v42 }
 0xc51   : > { %v10402_v46 = vpop.xlane.xlu0 %10401 }
 0xc52   : > { %13815 = vrcp.f32 %v10402_v46 }
 0xc55   : > { %v10405_v50 = vpop.xlane.xlu1 %10404 }
 0xc56   : > { %13817 = vrcp.f32 %v10405_v50 }
 0xc58   : > { %v13814_v39 = vpop.eup %13813 }
 0xc59   : > { %v10461_v54 = vmul.f32 %v13814_v39, %v15925_v6  ;;  %v10408_v24 = vpop.xlane.xlu0 %10407 }
 0xc5a   : > { %13819 = vrcp.f32 %v10408_v24 }
 0xc5b   : > { %13336 = vmatmul.mubr.msk.f32.vlgmr.msra.gmra.mrb[112].mxu1 %vm521_vm2, %v10461_v54 }
 0xc5c   : > { %v13816_v43 = vpop.eup %13815  ;;  %13344 = vmatpush3.msra.mxu1 %v15919_v8  ;;  %13345 = vmatprep.mubr.msk.f32.mxu1 %vm14034_vm1, %v14033_v22 }
 0xc5d   : > { %v10462_v47 = vmul.f32 %v13816_v43, %v15929_v29  ;;  %v10411_v51 = vpop.xlane.xlu1 %10410  ;;  %13353 = vmatprep.subr.mxu1 %v14033_v22 }
 0xc5e   : > { %13821 = vrcp.f32 %v10411_v51 }
 0xc5f   : > { %13341 = vmatmul.mubr.msk.f32.vlgmr.msra.gmra.mrb[150].mxu0 %vm521_vm2, %v10462_v47 }
 0xc60   : > { %v13818_v53 = vpop.eup %13817  ;;  %13349 = vmatpush3.msra.mxu0 %v10706_v35  ;;  %13350 = vmatprep.mubr.msk.f32.mxu0 %vm14034_vm1, %v14033_v22 }
 0xc61   : > { %v10463_v6 = vmul.f32 %v13818_v53, %v15933_v18  ;;  %13358 = vmatprep.subr.mxu0 %v14033_v22  ;;  %v10414_v28 = vpop.xlane.xlu0 %10413 }
 0xc63   : > { %13346 = vmatmul.mubr.msk.f32.vlgmr.msra.gmra.mrb[114].mxu1 %vm521_vm2, %v10463_v6 }
 0xc64   : > { %v13820_v8 = vpop.eup %13819  ;;  %13354 = vmatpush3.msra.mxu1 %v10782_v38  ;;  %13355 = vmatprep.mubr.msk.f32.mxu1 %vm14034_vm1, %v14033_v22 }
 0xc65   : > { %v10464_v29 = vmul.f32 %v13820_v8, %v15938_v23  ;;  %13363 = vmatprep.subr.mxu1 %v14033_v22  ;;  %v10417_v25 = vpop.xlane.xlu1 %10416 }
 0xc66   : > { %13823 = vrcp.f32 %v10417_v25 }
 0xc67   : > { %13351 = vmatmul.mubr.msk.f32.vlgmr.msra.gmra.mrb[152].mxu0 %vm521_vm2, %v10464_v29  ;;  %13825 = vrcp.f32 %v10414_v28 }
 0xc68   : > { %v13822_v52 = vpop.eup %13821  ;;  %13360 = vmatprep.mubr.msk.f32.mxu0 %vm14034_vm1, %v14033_v22 }
 0xc69   : > { %v10465_v18 = vmul.f32 %v13822_v52, %v15943_v9  ;;  %v10420_v56 = vpop.xlane.xlu0 %10419 }
 0xc6b   : > { %13356 = vmatmul.mubr.msk.f32.vlgmr.msra.gmra.mrb[116].mxu1 %vm521_vm2, %v10465_v18 }
 0xc6c   : > { %13365 = vmatprep.mubr.msk.f32.mxu1 %vm14034_vm1, %v14033_v22 }
 0xc6d   : > { %v10426_v48 = vpop.xlane.xlu0 %10425 }
 0xc70   : > { %v13824_v62 = vpop.eup %13823 }
 0xc71   : > { %v10467_v1 = vmul.f32 %v13824_v62, %v15953_v34 }
 0xc72   : > { %v10432_v23 = vpop.xlane.xlu0 %10431 }
 0xc7a   : > { %v10438_v45 = vpop.xlane.xlu0 %10437 }
 0xc82   : > { %v16039_v3 = vpop.xlane.xlu0 %10443 }
 0xc86   : > { %v10327_v2 = vpop.xlane.xlu1 %10326  ;;  %v10934_v60 = vpop.permute.xlu0 %10933 }
 0xc87   : > { %v10357_v9 = vsub.f32 %v15979_v57, %v10327_v2  ;;  %13364 = vmatpush3.msra.mxu1 %v10934_v60  ;;  %v13826_v57 = vpop.eup %13825 }
 0xc88   : > { %13366 = vmatmul.mubr.msk.f32.vlgmr.msra.gmra.mrb[118].mxu1 %vm521_vm2, %v10467_v1  ;;  %13373 = vmatprep.subr.mxu1 %v14033_v22 }
 0xc89   : > { %v10381_v14 = vmul.f32 1.442695, %v10357_v9  ;;  %13375 = vmatprep.mubr.msk.f32.mxu1 %vm14034_vm1, %v14033_v22 }
 0xc8a   : > { %v10333_v13 = vpop.xlane.xlu1 %10332  ;;  %v11086_v21 = vpop.permute.xlu0 %11085 }
 0xc8b   : > { %13827 = vpow2.f32 %v10381_v14  ;;  %v10359_v33 = vsub.f32 %v15983_v32, %v10333_v13  ;;  %13374 = vmatpush3.msra.mxu1 %v11086_v21  ;;  %v10466_v32 = vmul.f32 %v13826_v57, %v15948_v10 }
 0xc8c   : > { %13383 = vmatprep.subr.mxu1 %v14033_v22  ;;  %13829 = vrcp.f32 %v10420_v56 }
 0xc8d   : > { %v10385_v34 = vmul.f32 1.442695, %v10359_v33 }
 0xc8e   : > { %v10339_v63 = vpop.xlane.xlu1 %10338 }
 0xc8f   : > { %13831 = vpow2.f32 %v10385_v34  ;;  %v10361_v0 = vsub.f32 %v15987_v7, %v10339_v63 }
 0xc90   : > { %13833 = vrcp.f32 %v10426_v48 }
 0xc91   : > { %v10389_v16 = vmul.f32 1.442695, %v10361_v0 }
 0xc92   : > { %v10345_v41 = vpop.xlane.xlu1 %10344 }
 0xc93   : > { %13835 = vpow2.f32 %v10389_v16  ;;  %v10363_v27 = vsub.f32 %v15991_v15, %v10345_v41 }
 0xc94   : > { %13837 = vrcp.f32 %v10432_v23 }
 0xc95   : > { %v13828_v20 = vpop.eup %13827  ;;  %v10393_v30 = vmul.f32 1.442695, %v10363_v27 }
 0xc96   : > { %v10858_v12 = vpop.permute.xlu1 %10857  ;;  %v10421_v26 = vsel %vm521_vm2, %v13828_v20, 0.0  ;;  %v13830_v40 = vpop.eup %13829 }
 0xc97   : > { %13839 = vpow2.f32 %v10393_v30  ;;  %10422 = vadd.xlane.f32.xlu1 %v10421_v26  ;;  %13359 = vmatpush3.msra.mxu0 %v10858_v12  ;;  %v10468_v15 = vmul.f32 %v13830_v40, %v15957_v19 }
 0xc98   : > { %13361 = vmatmul.mubr.msk.f32.vlgmr.msra.gmra.mrb[154].mxu0 %vm521_vm2, %v10466_v32  ;;  %13368 = vmatprep.subr.mxu0 %v14033_v22  ;;  %13841 = vrcp.f32 %v10438_v45 }
 0xc99   : > { %v13832_v7 = vpop.eup %13831  ;;  %13370 = vmatprep.mubr.msk.f32.mxu0 %vm14034_vm1, %v14033_v22 }
 0xc9a   : > { %v11010_v61 = vpop.permute.xlu1 %11009  ;;  %v10427_v10 = vsel %vm521_vm2, %v13832_v7, 0.0  ;;  %v13834_v17 = vpop.eup %13833 }
 0xc9b   : > { %10428 = vadd.xlane.f32.xlu1 %v10427_v10  ;;  %13369 = vmatpush3.msra.mxu0 %v11010_v61  ;;  %v10470_v35 = vmul.f32 %v13834_v17, %v15962_v4 }
 0xc9c   : > { %13371 = vmatmul.mubr.msk.f32.vlgmr.msra.gmra.mrb[156].mxu0 %vm521_vm2, %v10468_v15  ;;  %13378 = vmatprep.subr.mxu0 %v14033_v22 }
 0xc9d   : > { %v13836_v38 = vpop.eup %13835  ;;  %13380 = vmatprep.mubr.msk.f32.mxu0 %vm14034_vm1, %v14033_v22 }
 0xc9e   : > { %v11162_v42 = vpop.permute.xlu1 %11161  ;;  %v10433_v46 = vsel %vm521_vm2, %v13836_v38, 0.0  ;;  %v13838_v19 = vpop.eup %13837 }
 0xc9f   : > { %10434 = vadd.xlane.f32.xlu1 %v10433_v46  ;;  %13379 = vmatpush3.msra.mxu0 %v11162_v42  ;;  %v10472_v39 = vmul.f32 %v13838_v19, %v15966_v37  ;;  %v13854_v46 = vld [vmem:[%s14266_s12 + $0x8] sm:$0xff]  ;;  %v16115_v19 = vld [vmem:[%s16245_s4] ss:$0 sm:$0xff] }
 0xca0   : > { %13381 = vmatmul.mubr.msk.f32.vlgmr.msra.gmra.mrb[158].mxu0 %vm521_vm2, %v10470_v35  ;;  %13388 = vmatprep.subr.mxu0 %v14033_v22 }
 0xca1   : > { %v13840_v50 = vpop.eup %13839  ;;  %13390 = vmatprep.mubr.msk.f32.mxu0 %vm14034_vm1, %v14033_v22 }
 0xca2   : > { %v11314_v54 = vpop.permute.xlu1 %11313  ;;  %v10439_v24 = vsel %vm521_vm2, %v13840_v50, 0.0  ;;  %v13842_v4 = vpop.eup %13841 }
 0xca3   : > { %10440 = vadd.xlane.f32.xlu1 %v10439_v24  ;;  %13389 = vmatpush3.msra.mxu0 %v11314_v54  ;;  %v10474_v43 = vmul.f32 %v13842_v4, %v15971_v59  ;;  %v11238_v59 = vpop.permute.xlu0 %11237  ;;  %v13856_v4 = vld [vmem:[%s14266_s12 + $0x18] sm:$0xff] }
 0xca4   : > { %13391 = vmatmul.mubr.msk.f32.vlgmr.msra.gmra.mrb[160].mxu0 %vm521_vm2, %v10472_v39  ;;  %13398 = vmatprep.subr.mxu0 %v14033_v22 }
 0xca5   : > { %13400 = vmatprep.mubr.msk.f32.mxu0 %vm14034_vm1, %v14033_v22 }
 0xca6   : > { %v11466_v47 = vpop.permute.xlu1 %11465 }
 0xca7   : > { %13399 = vmatpush3.msra.mxu0 %v11466_v47  ;;  %v11390_v23 = vpop.permute.xlu0 %11389  ;;  %v13857_v47 = vld [vmem:[%s14266_s12 + $0x10] sm:$0xff] }
 0xca8   : > { %13401 = vmatmul.mubr.msk.f32.vlgmr.msra.gmra.mrb[162].mxu0 %vm521_vm2, %v10474_v43  ;;  %13408 = vmatprep.subr.mxu0 %v14033_v22  ;;  %v505_v43 = vadd.f32 %v13856_v4, %v16115_v19 }
 0xca9   : > { %13410 = vmatprep.mubr.msk.f32.mxu0 %vm14034_vm1, %v14033_v22 }
 0xcab   : > { %v11542_v9 = vpop.permute.xlu0 %11541 }
 0xcb4   : > { %11617 = vrot.lane.b32.xlu1 %v14373_v55, %s14045_s26 }
 0xd24   : > { %v10423_v37 = vpop.xlane.xlu1 %10422 }
 0xd25   : > { %13843 = vrcp.f32 %v10423_v37  ;;  %v504_v37 = vadd.f32 %v13857_v47, %v16115_v19 }
 0xd26   : > { %13845 = vrcp.f32 %v16039_v3 }
 0xd28   : > { %v10429_v51 = vpop.xlane.xlu1 %10428 }
 0xd29   : > { %13847 = vrcp.f32 %v10429_v51 }
 0xd2c   : > { %v10435_v53 = vpop.xlane.xlu1 %10434 }
 0xd2d   : > { %13849 = vrcp.f32 %v10435_v53 }
 0xd2e   : > { %v10549_v6 = vpop.f32.mrb[112].mxu1 }
 0xd2f   : > { %v13844_v8 = vpop.eup %13843  ;;  %v13337_v29 = vpop.f32.mrb[113].mxu1 }
 0xd30   : > { %v10469_v52 = vmul.f32 %v13844_v8, %v13828_v20  ;;  %v10441_v18 = vpop.xlane.xlu1 %10440  ;;  %v13846_v28 = vpop.eup %13845  ;;  %v3340_v8 = vadd.f32 %v14959_v5, %v505_v43  ;;  %v13858_v5 = vld [vmem:[%s14266_s12 + $0x28] sm:$0xff] }
 0xd31   : > { %13851 = vrcp.f32 %v10441_v18  ;;  %v10476_v48 = vmul.f32 %v13846_v28, %v15975_v11  ;;  %v11693_v11 = vld [vmem:[#allocation7 + $0x18] sm:$0xff]  ;;  %v507_v28 = vadd.f32 %v13858_v5, %v16115_v19 }
 0xd32   : > { %v10625_v56 = vpop.f32.mrb[150].mxu0  ;;  %13376 = vmatmul.mubr.msk.f32.vlgmr.msra.gmra.mrb[120].mxu1 %vm521_vm2, %v10469_v52 }
 0xd33   : > { %v13848_v55 = vpop.eup %13847  ;;  %v13342_v25 = vpop.f32.mrb[151].mxu0  ;;  %13384 = vmatpush3.msra.mxu1 %v11238_v59  ;;  %13385 = vmatprep.mubr.msk.f32.mxu1 %vm14034_vm1, %v14033_v22 }
 0xd34   : > { %v10471_v45 = vmul.f32 %v13848_v55, %v13832_v7  ;;  %v11618_v3 = vpop.permute.xlu1 %11617  ;;  %13393 = vmatprep.subr.mxu1 %v14033_v22  ;;  %v3342_v55 = vadd.f32 %v14963_v49, %v507_v28 }
 0xd35   : > { %13409 = vmatpush3.msra.mxu0 %v11618_v3  ;;  %v13860_v3 = vld [vmem:[%s14266_s12 + $0x38] sm:$0xff] }
 0xd36   : > { %v10701_v62 = vpop.f32.mrb[114].mxu1  ;;  %13386 = vmatmul.mubr.msk.f32.vlgmr.msra.gmra.mrb[122].mxu1 %vm521_vm2, %v10471_v45  ;;  %13411 = vmatmul.mubr.msk.f32.vlgmr.msra.gmra.mrb[164].mxu0 %vm521_vm2, %v10476_v48 }
 0xd37   : > { %v13850_v1 = vpop.eup %13849  ;;  %v13347_v2 = vpop.f32.mrb[115].mxu1  ;;  %13394 = vmatpush3.msra.mxu1 %v11390_v23  ;;  %13395 = vmatprep.mubr.msk.f32.mxu1 %vm14034_vm1, %v14033_v22 }
 0xd38   : > { %v10473_v60 = vmul.f32 %v13850_v1, %v13836_v38  ;;  %13403 = vmatprep.subr.mxu1 %v14033_v22  ;;  %v13861_v2 = vld [vmem:[%s14266_s12 + $0x30] sm:$0xff] }
 0xd3a   : > { %v10777_v14 = vpop.f32.mrb[152].mxu0  ;;  %13396 = vmatmul.mubr.msk.f32.vlgmr.msra.gmra.mrb[124].mxu1 %vm521_vm2, %v10473_v60  ;;  %v508_v60 = vadd.f32 %v13861_v2, %v16115_v19 }
 0xd3b   : > { %v13852_v13 = vpop.eup %13851  ;;  %v13352_v21 = vpop.f32.mrb[153].mxu0  ;;  %13404 = vmatpush3.msra.mxu1 %v11542_v9  ;;  %13405 = vmatprep.mubr.msk.f32.mxu1 %vm14034_vm1, %v14033_v22 }
 0xd3c   : > { %v10475_v33 = vmul.f32 %v13852_v13, %v13840_v50  ;;  %13413 = vmatprep.subr.mxu1 %v11693_v11  ;;  %v503_v50 = vadd.f32 %v16115_v19, %v13854_v46  ;;  %v13863_v21 = vld [vmem:[%s14266_s12 + $0x40] sm:$0xff]  ;;  %v13869_v46 = vld [vmem:[%s14266_s12 + $0x70] sm:$0xff] }
 0xd3e   : > { %v10853_v34 = vpop.f32.mrb[116].mxu1  ;;  %13406 = vmatmul.mubr.msk.f32.vlgmr.msra.gmra.mrb[126].mxu1 %vm521_vm2, %v10475_v33  ;;  %v3338_v24 = vadd.f32 %v14955_v31, %v503_v50  ;;  %v3339_v31 = vadd.f32 %v14961_v44, %v504_v37  ;;  %v510_v33 = vadd.f32 %v13863_v21, %v16115_v19  ;;  %v516_v50 = vadd.f32 %v13869_v46, %v16115_v19 }
 0xd3f   : > { %v13357_v63 = vpop.f32.mrb[117].mxu1  ;;  %13415 = vmatprep.mubr.msk.f32.mxu1 %vm521_vm2, %v10549_v6  ;;  %13414 = vmatpush3.msra.mxu1 %v11693_v11 }
 0xd42   : > { %13416 = vmatmul.mubr.msk.f32.vlgmr.msra.gmra.mrb[74].mxu1 %vm521_vm2, %v10625_v56  ;;  %v13859_v56 = vld [vmem:[%s14266_s12 + $0x20] sm:$0xff] }
 0xd43   : > { %13418 = vmatprep.mubr.msk.f32.mxu1 %vm521_vm2, %v10701_v62  ;;  %v506_v44 = vadd.f32 %v13859_v56, %v16115_v19  ;;  %v509_v62 = vadd.f32 %v13860_v3, %v16115_v19 }
 0xd45   : > { %v3341_v25 = vadd.f32 %v14965_v58, %v506_v44 }
 0xd46   : > { %13419 = vmatmul.mubr.msk.f32.gmra.mrb[76].mxu1 %vm521_vm2, %v10777_v14  ;;  %v13862_v14 = vld [vmem:[%s14266_s12 + $0x48] sm:$0xff] }
 0xd47   : > { %13421 = vmatprep.mubr.msk.f32.mxu1 %vm521_vm2, %v10853_v34  ;;  %v511_v13 = vadd.f32 %v13862_v14, %v16115_v19 }
 0xd5b   : > { %v11005_v0 = vpop.f32.mrb[118].mxu1 }
 0xd5c   : > { %v13367_v16 = vpop.f32.mrb[119].mxu1 }
 0xd5d   : > { %v13864_v16 = vld [vmem:[%s14266_s12 + $0x58] sm:$0xff] }
 0xd6b   : > { %v10929_v22 = vpop.f32.mrb[154].mxu0 }
 0xd6c   : > { %v13362_v41 = vpop.f32.mrb[155].mxu0  ;;  %13422 = vmatmul.mubr.msk.f32.gmra.mrb[78].mxu1 %vm521_vm2, %v10929_v22  ;;  %v513_v22 = vadd.f32 %v13864_v16, %v16115_v19 }
 0xd6d   : > { %13424 = vmatprep.mubr.msk.f32.mxu1 %vm521_vm2, %v11005_v0 }
 0xd6f   : > { %v11081_v57 = vpop.f32.mrb[156].mxu0 }
 0xd70   : > { %v13372_v27 = vpop.f32.mrb[157].mxu0  ;;  %13425 = vmatmul.mubr.msk.f32.gmra.mrb[40].mxu1 %vm521_vm2, %v11081_v57  ;;  %v13865_v57 = vld [vmem:[%s14266_s12 + $0x50] sm:$0xff] }
 0xd71   : > { %v512_v27 = vadd.f32 %v13865_v57, %v16115_v19 }
 0xd73   : > { %v11233_v20 = vpop.f32.mrb[158].mxu0 }
 0xd74   : > { %v13382_v30 = vpop.f32.mrb[159].mxu0 }
 0xd77   : > { %v11385_v32 = vpop.f32.mrb[160].mxu0 }
 0xd78   : > { %v13392_v12 = vpop.f32.mrb[161].mxu0 }
 0xd79   : > { %v13866_v12 = vld [vmem:[%s14266_s12 + $0x68] sm:$0xff] }
 0xd7b   : > { %v11537_v26 = vpop.f32.mrb[162].mxu0 }
 0xd7c   : > { %v13402_v40 = vpop.f32.mrb[163].mxu0 }
 0xe05   : > { %v11157_v7 = vpop.f32.mrb[120].mxu1 }
 0xe06   : > { %v13377_v15 = vpop.f32.mrb[121].mxu1  ;;  %13427 = vmatprep.mubr.msk.f32.mxu1 %vm521_vm2, %v11157_v7  ;;  %v13867_v7 = vld [vmem:[%s14266_s12 + $0x60] sm:$0xff] }
 0xe07   : > { %13428 = vmatmul.mubr.msk.f32.gmra.mrb[42].mxu1 %vm521_vm2, %v11233_v20  ;;  %v514_v15 = vadd.f32 %v13867_v7, %v16115_v19 }
 0xe09   : > { %v11309_v61 = vpop.f32.mrb[122].mxu1  ;;  %v11689_v10 = vpop.f32.mrb[164].mxu0 }
 0xe0a   : > { %v13387_v17 = vpop.f32.mrb[123].mxu1  ;;  %v13412_v38 = vpop.f32.mrb[165].mxu0  ;;  %13430 = vmatprep.mubr.msk.f32.mxu1 %vm521_vm2, %v11309_v61 }
 0xe0b   : > { %13431 = vmatmul.mubr.msk.f32.gmra.mrb[44].mxu1 %vm521_vm2, %v11385_v32  ;;  %v13868_v38 = vld [vmem:[%s14266_s12 + $0x78] sm:$0xff]  ;;  %s13956_s12 = scalar_lea.vmem %s16193_s28, 2048 }
 0xe0c   : > { %p13957_p11 = scmp.ne.s32.totalorder %s16193_s28, %s13956_s12  ;;  %p13964_p9 = scmp.lt.s32.totalorder %s13962_s7, %s13956_s12 }
 0xe0d   : > { %v11461_v35 = vpop.f32.mrb[124].mxu1 }
 0xe0e   : > { %v13397_v42 = vpop.f32.mrb[125].mxu1  ;;  %13433 = vmatprep.mubr.msk.f32.mxu1 %vm521_vm2, %v11461_v35  ;;  %v517_v35 = vadd.f32 %v13868_v38, %v16115_v19  ;;  %p13958_p2 = pnand %p13957_p11, %p16260_p0  ;;  %p13965_p12 = por %p13964_p9, %p13963_p7 }
 0xe0f   : > { %13434 = vmatmul.mubr.msk.f32.gmra.mrb[46].mxu1 %vm521_vm2, %v11537_v26  ;;  %v515_v26 = vadd.f32 %v13866_v12, %v16115_v19 }
 0xe10   : > { %p13959_p3 = pneg %p13958_p2 }
 0xe11   : > { %v11613_v39 = vpop.f32.mrb[126].mxu1 }
 0xe12   : > { %v13407_v54 = vpop.f32.mrb[127].mxu1  ;;  %13436 = vmatprep.mubr.msk.f32.mxu1 %vm521_vm2, %v11613_v39  ;;  %p13966_p1 = pnand %p13965_p12, %p13959_p3 }
 0xe13   : > { %13437 = vmatmul.mubr.msk.f32.gmra.mrb[48].mxu1 %vm521_vm2, %v11689_v10 }
 0xe15   : > { %v13417_v51 = vpop.f32.mrb[74].mxu1 }
 0xe16   : > { %v13450_v53 = vadd.f32 %v13417_v51, %v3338_v24  ;;  %v11808_v59 = vpop.f32.mrb[75].mxu1 }
 0xe17   : > { %v13452_v6 = vadd.f32 %v11808_v59, %v14957_v36 }
 0xe18   : > { %11904 = vst.msk [vmem:[%s16129_s10 + $0x8] sm:$0xff] %vm301_vm0, %v13450_v53 }
 0xe19   : > { %11903 = vst.msk [vmem:[%s16129_s10] sm:$0xff] %vm301_vm0, %v13452_v6  ;;  %v13420_v29 = vpop.f32.mrb[76].mxu1 }
 0xe1a   : > { %v13454_v52 = vadd.f32 %v13420_v29, %v3340_v8  ;;  %v11818_v18 = vpop.f32.mrb[77].mxu1 }
 0xe1b   : > { %v13456_v36 = vadd.f32 %v11818_v18, %v3339_v31 }
 0xe1c   : > { %11906 = vst.msk [vmem:[%s16129_s10 + $0x18] sm:$0xff] %vm301_vm0, %v13454_v52 }
 0xe1d   : > { %11905 = vst.msk [vmem:[%s16129_s10 + $0x10] sm:$0xff] %vm301_vm0, %v13456_v36 }
 0xe3f   : > { %v13423_v48 = vpop.f32.mrb[78].mxu1 }
 0xe40   : > { %v13458_v23 = vadd.f32 %v13423_v48, %v3342_v55  ;;  %v11828_v45 = vpop.f32.mrb[79].mxu1 }
 0xe41   : > { %v13460_v1 = vadd.f32 %v11828_v45, %v3341_v25 }
 0xe42   : > { %11908 = vst.msk [vmem:[%s16129_s10 + $0x28] sm:$0xff] %vm301_vm0, %v13458_v23 }
 0xe43   : > { %11907 = vst.msk [vmem:[%s16129_s10 + $0x20] sm:$0xff] %vm301_vm0, %v13460_v1  ;;  %v13426_v49 = vpop.f32.mrb[40].mxu1 }
 0xe44   : > { %v13461_v58 = vadd.f32 %v13426_v49, %v509_v62  ;;  %v11838_v11 = vpop.f32.mrb[41].mxu1 }
 0xe45   : > { %v13462_v9 = vadd.f32 %v11838_v11, %v508_v60 }
 0xe46   : > { %11910 = vst.msk [vmem:[%s16129_s10 + $0x38] sm:$0xff] %vm301_vm0, %v13461_v58 }
 0xe47   : > { %11909 = vst.msk [vmem:[%s16129_s10 + $0x30] sm:$0xff] %vm301_vm0, %v13462_v9 }
 0xeda   : > { %v13429_v34 = vpop.f32.mrb[42].mxu1 }
 0xedb   : > { %v13463_v63 = vadd.f32 %v13429_v34, %v511_v13  ;;  %v11848_v0 = vpop.f32.mrb[43].mxu1 }
 0xedc   : > { %v13464_v41 = vadd.f32 %v11848_v0, %v510_v33 }
 0xedd   : > { %11912 = vst.msk [vmem:[%s16129_s10 + $0x48] sm:$0xff] %vm301_vm0, %v13463_v63 }
 0xede   : > { %11911 = vst.msk [vmem:[%s16129_s10 + $0x40] sm:$0xff] %vm301_vm0, %v13464_v41  ;;  %v13432_v20 = vpop.f32.mrb[44].mxu1 }
 0xedf   : > { %v13465_v30 = vadd.f32 %v13432_v20, %v513_v22  ;;  %v11858_v32 = vpop.f32.mrb[45].mxu1 }
 0xee0   : > { %v13466_v40 = vadd.f32 %v11858_v32, %v512_v27 }
 0xee1   : > { %11914 = vst.msk [vmem:[%s16129_s10 + $0x58] sm:$0xff] %vm301_vm0, %v13465_v30 }
 0xee2   : > { %11913 = vst.msk [vmem:[%s16129_s10 + $0x50] sm:$0xff] %vm301_vm0, %v13466_v40  ;;  %v13435_v61 = vpop.f32.mrb[46].mxu1 }
 0xee3   : > { %v13467_v10 = vadd.f32 %v13435_v61, %v515_v26  ;;  %v11868_v17 = vpop.f32.mrb[47].mxu1 }
 0xee4   : > { %v13468_v42 = vadd.f32 %v11868_v17, %v514_v15 }
 0xee5   : > { %11916 = vst.msk [vmem:[%s16129_s10 + $0x68] sm:$0xff] %vm301_vm0, %v13467_v10 }
 0xee6   : > { %11915 = vst.msk [vmem:[%s16129_s10 + $0x60] sm:$0xff] %vm301_vm0, %v13468_v42  ;;  %v13438_v39 = vpop.f32.mrb[48].mxu1 }
 0xee7   : > { %v13469_v54 = vadd.f32 %v13438_v39, %v517_v35  ;;  %v11878_v24 = vpop.f32.mrb[49].mxu1 }
 0xee8   : > { %v13470_v19 = vadd.f32 %v11878_v24, %v516_v50 }
 0xee9   : > { %11918 = vst.msk [vmem:[%s16129_s10 + $0x78] sm:$0xff] %vm301_vm0, %v13469_v54 }
 0xeea   : > { %11917 = vst.msk [vmem:[%s16129_s10 + $0x70] sm:$0xff] %vm301_vm0, %v13470_v19 }
 0xeeb   : > { %13969 = shalt.err (!%p13966_p1)
}
 0xeec   : > { %s13970_s8 = scalar_lea.hbm %s16191_s30, 2048  ;;  %s13974_s15 = scalar_lea.hbm %s16246_s5, 4096 }
 0xeed   : > { %p13971_p13 = scmp.ne.s32.totalorder %s16191_s30, %s13970_s8  ;;  %p13975_p4 = scmp.lt.u32.totalorder %s16191_s30, %s16246_s5 }
 0xeee   : > { %p13976_p5 = scmp.lt.u32.totalorder %s13974_s15, %s13970_s8  ;;  %p13978_p11 = scmp.lt.u32.totalorder %s13970_s8, %s16191_s30 }
 0xeef   : > { %p13972_p6 = pnand %p13971_p13, %p16260_p0 }
 0xef0   : > { %p13977_p8 = por %p13976_p5, %p13975_p4 }
 0xef1   : > { %p13973_p10 = pneg %p13972_p6 }
 0xef2   : > { %p13979_p2 = por %p13978_p11, %p13977_p8 }
 0xef4   : > { %p13980_p3 = pnand %p13979_p2, %p13973_p10 }
 0xef6   : > { %13983 = shalt.err (!%p13980_p3)
}
 0xef7   : > { %s14047_s6 = smov 128   ;;  %s14048_s13 = smov 8  }
 0xef8   : > { %13523 = dma.vmem_to_hbm [thread:$0]  (%p16260_p0), %s16193_s28, 2048, %s16191_s30, %s11920_s22, %s14047_s6, %s14047_s6, %s14048_s13  }
 0xef9 PF: > { %s11948_s9 = sand.u32 1, %s14014_s18   ;;  %p16261_p7 = scmp.ne.s32.totalorder %s16251_s25, 0 }
 0xefa   : > { %p16262_p9 = scmp.ge.s32.totalorder %s14026_s21, 2  ;;  %s11949_s12 = scalar_lea.sflag [#allocation4], %s11948_s9 }
 0xefc   : > { %p13537_p12 = pnand %p16262_p9, %p16261_p7 }
 0xefe   : > { %14009 = dma.done.wait (!%p13537_p12), %s11949_s12, 2048  }
 0xeff   : > { %14011 = vsyncadd (!%p13537_p12), %s11949_s12, 4294965248  ;;  %p19_p1 = scmp.ge.s32.totalorder %s14195_s29, 4   ;;  %s16263_s18 = smov %s14018_s19 }
 0xf00   : > { %s16264_s19 = smov %s14022_s20  ;;  %s16265_s20 = smov %s14211_s27 }
 0xf01   : > { %s16266_s21 = smov %s14195_s29  ;;  %21 = sbr.rel (!%p19_p1) target bundleno = 6 (0x6), region = 93 }
 0xf08   :  { %11954 = vsyncpa [#allocation3], 1 }
 0xf09   :  { %11956 = vsyncpa [#allocation3 + $0x1], 1 }
 0xf0a   :  { %11957 = vsyncpa [#allocation6], 1 }
 0xf0b   :  { %11958 = vsyncpa [#allocation4], 1 }
 0xf0c   :  { %11960 = vsyncpa [#allocation4 + $0x1], 1 }

</bundles_post_ra>
